<compile_context>
chip_gen: v7x
topology: tpu7x:2x2x1
jax: 0.10.0
libtpu: 0.0.40
codegen_flags: <defaults>
</compile_context>

<pallas_src>
import functools

import jax
import jax.numpy as jnp
from jax.experimental import pallas as pl
from jax.experimental.pallas import tpu as pltpu

# Synthetic environment dims (e.g. CartPole-v1): obs dim 4, 2 actions.
NUM_STATES = 4
NUM_ACTIONS = 2
H1 = 200
H2 = 100

# Lane/sublane-padded sizes used inside the kernel.
S_PAD = 8        # 4   -> 8   (sublane multiple)
H1_PAD = 256     # 200 -> 256 (lane multiple)
H2_PAD = 128     # 100 -> 128
A_PAD = 8        # 2   -> 8   (narrow output store; masked vst cost is trivial)

TB = 1024        # default batch tile (rows per grid step); tunable


def _round_up(n, m):
    return ((n + m - 1) // m) * m


def _bf16_vpu_available():
    """True on chips with a bf16 VPU (v6e / v7x); conservative f32 otherwise."""
    try:
        kind = jax.devices()[0].device_kind.lower()
    except Exception:
        return False
    return any(tag in kind for tag in ("v6", "v7", "7x"))


def mlp_kernel(x_ref, w1_ref, b1_ref, w2_ref, b2_ref, w3_ref, b3_ref, o_ref,
               *, tb, bf16_epilogue):
    ep = jnp.bfloat16 if bf16_epilogue else jnp.float32
    # x is whole-array VMEM resident; slice this grid step's rows (tb % 8 == 0).
    row = pl.multiple_of(pl.program_id(0) * tb, 8)
    x = x_ref[pl.ds(row, tb), :]                     # (tb, S_PAD) bf16
    # fc1 + ReLU: bf16 MXU inputs, f32 accumulation, epilogue in `ep` dtype.
    h1 = jnp.dot(x, w1_ref[...], preferred_element_type=jnp.float32)
    h1 = jnp.maximum(h1.astype(ep) + b1_ref[...].astype(ep), 0).astype(jnp.bfloat16)
    # fc2 + ReLU
    h2 = jnp.dot(h1, w2_ref[...], preferred_element_type=jnp.float32)
    h2 = jnp.maximum(h2.astype(ep) + b2_ref[...].astype(ep), 0).astype(jnp.bfloat16)
    # out (logits, no activation) -- narrow 8-lane f32 store.
    o = jnp.dot(h2, w3_ref[...], preferred_element_type=jnp.float32)
    o_ref[...] = (o + b3_ref[...]).astype(o_ref.dtype)


@functools.partial(jax.jit, static_argnames=("tb", "bf16_epilogue"))
def net_forward(x, w1p, b1p, w2p, b2p, w3p, b3p, *, tb=TB, bf16_epilogue=False):
    """x: [B, NUM_STATES] f32.  Padded bf16 weights / f32 biases (see pad_params).
    Returns [B, NUM_ACTIONS] f32 logits."""
    B = x.shape[0]

    # Grid sizing: aim for ~tb rows/step, but keep the grid even and >= 2 so
    # v7x's two TensorCores both get work; tb_eff stays a multiple of 8.
    grid_n = max(2, -(-B // tb))
    grid_n = _round_up(grid_n, 2)
    tb_eff = _round_up(-(-B // grid_n), 8)
    B_pad = grid_n * tb_eff

    # Pad batch + features; cast MXU input to bf16.
    xp = jnp.zeros((B_pad, S_PAD), jnp.bfloat16)
    xp = xp.at[:B, :NUM_STATES].set(x.astype(jnp.bfloat16))
    # TODO(synk): for multi-million-row batches, switch xp back to a blocked
    # (tb_eff, S_PAD) spec instead of keeping the whole input VMEM-resident.

    # Whole-array VMEM residency: one copy in, no double-buffering, no per-step
    # pipeline bookkeeping (weights/biases/input never change across steps).
    resident = pl.BlockSpec(memory_space=pltpu.MemorySpace.VMEM)

    flops = 2 * B_pad * (S_PAD * H1_PAD + H1_PAD * H2_PAD + H2_PAD * A_PAD)
    bytes_accessed = (
        xp.size * 2
        + B_pad * A_PAD * 4
        + (w1p.size + w2p.size + w3p.size) * 2
        + (b1p.size + b2p.size + b3p.size) * 4
    )

    kernel = functools.partial(mlp_kernel, tb=tb_eff, bf16_epilogue=bf16_epilogue)

    out_padded = pl.pallas_call(
        kernel,
        out_shape=jax.ShapeDtypeStruct((B_pad, A_PAD), jnp.float32),
        grid=(grid_n,),
        in_specs=[resident] * 7,                      # x, w1, b1, w2, b2, w3, b3
        out_specs=pl.BlockSpec((tb_eff, A_PAD), lambda i: (i, 0)),
        compiler_params=pltpu.CompilerParams(
            dimension_semantics=("parallel",),        # v7x: split batch over 2 TCs
        ),
        cost_estimate=pl.CostEstimate(
            flops=flops, transcendentals=0, bytes_accessed=bytes_accessed),
    )(xp, w1p, b1p, w2p, b2p, w3p, b3p)

    # Drop batch padding and the zero-padded action lanes.
    return out_padded[:B, :NUM_ACTIONS]


def init_params(key):
    """Mirrors the PyTorch module: weights explicitly U(0, 1) (as in Net's
    __init__); biases use nn.Linear's default U(-1/sqrt(fan_in), +1/sqrt(fan_in))."""
    k = jax.random.split(key, 6)
    w1 = jax.random.uniform(k[0], (NUM_STATES, H1), jnp.float32, 0.0, 1.0)
    w2 = jax.random.uniform(k[1], (H1, H2), jnp.float32, 0.0, 1.0)
    w3 = jax.random.uniform(k[2], (H2, NUM_ACTIONS), jnp.float32, 0.0, 1.0)
    b1 = jax.random.uniform(k[3], (1, H1), jnp.float32,
                            -1.0 / NUM_STATES ** 0.5, 1.0 / NUM_STATES ** 0.5)
    b2 = jax.random.uniform(k[4], (1, H2), jnp.float32,
                            -1.0 / H1 ** 0.5, 1.0 / H1 ** 0.5)
    b3 = jax.random.uniform(k[5], (1, NUM_ACTIONS), jnp.float32,
                            -1.0 / H2 ** 0.5, 1.0 / H2 ** 0.5)
    return w1, b1, w2, b2, w3, b3


def pad_params(w1, b1, w2, b2, w3, b3):
    """Zero-pad to lane-friendly shapes; weights -> bf16 (MXU input), biases f32."""
    def padw(w, r, c):
        out = jnp.zeros((r, c), jnp.float32).at[:w.shape[0], :w.shape[1]].set(w)
        return out.astype(jnp.bfloat16)

    def padb(b, c):
        return jnp.zeros((1, c), jnp.float32).at[:, :b.shape[1]].set(b)

    return (padw(w1, S_PAD, H1_PAD), padb(b1, H1_PAD),
            padw(w2, H1_PAD, H2_PAD), padb(b2, H2_PAD),
            padw(w3, H2_PAD, A_PAD), padb(b3, A_PAD))


def reference_forward(x, w1, b1, w2, b2, w3, b3, *, bf16_epilogue=False):
    """Pure-JAX reference emulating the kernel's exact dtype schedule
    (bf16 matmul inputs, f32 accumulation, epilogue in the same dtype)."""
    hi = jax.lax.Precision.HIGHEST
    ep = jnp.bfloat16 if bf16_epilogue else jnp.float32

    def bf(a):
        return a.astype(jnp.bfloat16).astype(jnp.float32)

    h1 = jnp.dot(bf(x), bf(w1), precision=hi)
    h1 = jnp.maximum(h1.astype(ep) + b1.astype(ep), 0).astype(jnp.float32)
    h2 = jnp.dot(bf(h1), bf(w2), precision=hi)
    h2 = jnp.maximum(h2.astype(ep) + b2.astype(ep), 0).astype(jnp.float32)
    o = jnp.dot(bf(h2), bf(w3), precision=hi)
    return o + b3


if __name__ == "__main__":
    key = jax.random.PRNGKey(0)
    pkey, xkey = jax.random.split(key)
    params = init_params(pkey)
    padded = pad_params(*params)

    bf16_ep = _bf16_vpu_available()

    # Batched inference (small data, but enough rows that every grid step does
    # real work and the even "parallel" grid exercises both v7x TensorCores).
    B = 4096
    x = jax.random.normal(xkey, (B, NUM_STATES), jnp.float32)

    out = net_forward(x, *padded, tb=TB, bf16_epilogue=bf16_ep)
    out = jax.block_until_ready(out)

    ref = reference_forward(x, *params, bf16_epilogue=bf16_ep)
    assert out.shape == (B, NUM_ACTIONS)
    max_err = float(jnp.max(jnp.abs(out - ref)))
    assert jnp.allclose(out, ref, rtol=5e-3, atol=5e-2), max_err

    print("KERNEL_OK")
</pallas_src>

<mosaic_0001>
module attributes {stable_mosaic.version = 11 : i64} {
  func.func @mlp_kernel(%arg0: i32, %arg1: memref<4096x8xbf16, #tpu.memory_space<vmem>>, %arg2: memref<8x256xbf16, #tpu.memory_space<vmem>>, %arg3: memref<1x256xf32, #tpu.memory_space<vmem>>, %arg4: memref<256x128xbf16, #tpu.memory_space<vmem>>, %arg5: memref<1x128xf32, #tpu.memory_space<vmem>>, %arg6: memref<128x8xbf16, #tpu.memory_space<vmem>>, %arg7: memref<1x8xf32, #tpu.memory_space<vmem>>, %arg8: memref<1024x8xf32, #tpu.memory_space<vmem>>) attributes {dimension_semantics = [#tpu.dimension_semantics<parallel>], iteration_bounds = array<i64: 4>, scalar_prefetch = 0 : i64, scratch_operands = 0 : i64, tpu.core_type = #tpu.core_type<tc>, window_params = [{pipeline_mode = #tpu.pipeline_mode<synchronous>, transform_indices = @transform_0, window_bounds = array<i64: 4096, 8>}, {pipeline_mode = #tpu.pipeline_mode<synchronous>, transform_indices = @transform_1, window_bounds = array<i64: 8, 256>}, {pipeline_mode = #tpu.pipeline_mode<synchronous>, transform_indices = @transform_2, window_bounds = array<i64: 1, 256>}, {pipeline_mode = #tpu.pipeline_mode<synchronous>, transform_indices = @transform_3, window_bounds = array<i64: 256, 128>}, {pipeline_mode = #tpu.pipeline_mode<synchronous>, transform_indices = @transform_4, window_bounds = array<i64: 1, 128>}, {pipeline_mode = #tpu.pipeline_mode<synchronous>, transform_indices = @transform_5, window_bounds = array<i64: 128, 8>}, {pipeline_mode = #tpu.pipeline_mode<synchronous>, transform_indices = @transform_6, window_bounds = array<i64: 1, 8>}, {transform_indices = @transform_7, window_bounds = array<i64: 1024, 8>}]} {
    %c1024_i32 = arith.constant 1024 : i32
    %0 = arith.muli %arg0, %c1024_i32 : i32
    %1 = tpu.assume_multiple %0, 8 : i32
    %2 = arith.index_cast %1 : i32 to index
    %c0 = arith.constant 0 : index
    %3 = vector.load %arg1[%2, %c0] : memref<4096x8xbf16, #tpu.memory_space<vmem>>, vector<1024x8xbf16>
    %c0_0 = arith.constant 0 : index
    %c0_1 = arith.constant 0 : index
    %4 = vector.load %arg2[%c0_0, %c0_1] : memref<8x256xbf16, #tpu.memory_space<vmem>>, vector<8x256xbf16>
    %cst = arith.constant dense<0.000000e+00> : vector<1024x256xf32>
    %5 = tpu.matmul %3, %4, %cst {dimension_numbers = #tpu.dot_dimension_numbers<[1], [0], [0], [1], [0, 0, 1, 1], [], []>} : vector<1024x8xbf16>, vector<8x256xbf16>, vector<1024x256xf32> -> vector<1024x256xf32>
    %c0_2 = arith.constant 0 : index
    %c0_3 = arith.constant 0 : index
    %6 = vector.load %arg3[%c0_2, %c0_3] : memref<1x256xf32, #tpu.memory_space<vmem>>, vector<1x256xf32>
    %7 = vector.broadcast %6 : vector<1x256xf32> to vector<1024x256xf32>
    %8 = arith.addf %5, %7 : vector<1024x256xf32>
    %cst_4 = arith.constant 0.000000e+00 : f32
    %9 = vector.broadcast %cst_4 : f32 to vector<1024x256xf32>
    %10 = arith.maximumf %8, %9 : vector<1024x256xf32>
    %11 = arith.truncf %10 : vector<1024x256xf32> to vector<1024x256xbf16>
    %c0_5 = arith.constant 0 : index
    %c0_6 = arith.constant 0 : index
    %12 = vector.load %arg4[%c0_5, %c0_6] : memref<256x128xbf16, #tpu.memory_space<vmem>>, vector<256x128xbf16>
    %cst_7 = arith.constant dense<0.000000e+00> : vector<1024x128xf32>
    %13 = tpu.matmul %11, %12, %cst_7 {dimension_numbers = #tpu.dot_dimension_numbers<[1], [0], [0], [1], [0, 0, 1, 1], [], []>} : vector<1024x256xbf16>, vector<256x128xbf16>, vector<1024x128xf32> -> vector<1024x128xf32>
    %c0_8 = arith.constant 0 : index
    %c0_9 = arith.constant 0 : index
    %14 = vector.load %arg5[%c0_8, %c0_9] : memref<1x128xf32, #tpu.memory_space<vmem>>, vector<1x128xf32>
    %15 = vector.broadcast %14 : vector<1x128xf32> to vector<1024x128xf32>
    %16 = arith.addf %13, %15 : vector<1024x128xf32>
    %cst_10 = arith.constant 0.000000e+00 : f32
    %17 = vector.broadcast %cst_10 : f32 to vector<1024x128xf32>
    %18 = arith.maximumf %16, %17 : vector<1024x128xf32>
    %19 = arith.truncf %18 : vector<1024x128xf32> to vector<1024x128xbf16>
    %c0_11 = arith.constant 0 : index
    %c0_12 = arith.constant 0 : index
    %20 = vector.load %arg6[%c0_11, %c0_12] : memref<128x8xbf16, #tpu.memory_space<vmem>>, vector<128x8xbf16>
    %cst_13 = arith.constant dense<0.000000e+00> : vector<1024x8xf32>
    %21 = tpu.matmul %19, %20, %cst_13 {dimension_numbers = #tpu.dot_dimension_numbers<[1], [0], [0], [1], [0, 0, 1, 1], [], []>} : vector<1024x128xbf16>, vector<128x8xbf16>, vector<1024x8xf32> -> vector<1024x8xf32>
    %c0_14 = arith.constant 0 : index
    %c0_15 = arith.constant 0 : index
    %22 = vector.load %arg7[%c0_14, %c0_15] : memref<1x8xf32, #tpu.memory_space<vmem>>, vector<1x8xf32>
    %23 = vector.broadcast %22 : vector<1x8xf32> to vector<1024x8xf32>
    %24 = arith.addf %21, %23 : vector<1024x8xf32>
    %c0_16 = arith.constant 0 : index
    %c0_17 = arith.constant 0 : index
    %25 = vector.load %arg8[%c0_16, %c0_17] : memref<1024x8xf32, #tpu.memory_space<vmem>>, vector<1024x8xf32>
    tpu.vector_store %arg8[%c0_16, %c0_17], %24 {strides = array<i32>} : memref<1024x8xf32, #tpu.memory_space<vmem>>, vector<1024x8xf32>,
    return
  }
  func.func @transform_0(%arg0: i32) -> (i32, i32) {
    %c0_i32 = arith.constant 0 : i32
    %c0_i32_0 = arith.constant 0 : i32
    %c0_i32_1 = arith.constant 0 : i32
    return %c0_i32, %c0_i32_0 : i32, i32
  }
  func.func @transform_1(%arg0: i32) -> (i32, i32) {
    %c0_i32 = arith.constant 0 : i32
    %c0_i32_0 = arith.constant 0 : i32
    %c0_i32_1 = arith.constant 0 : i32
    return %c0_i32, %c0_i32_0 : i32, i32
  }
  func.func @transform_2(%arg0: i32) -> (i32, i32) {
    %c0_i32 = arith.constant 0 : i32
    %c0_i32_0 = arith.constant 0 : i32
    %c0_i32_1 = arith.constant 0 : i32
    return %c0_i32, %c0_i32_0 : i32, i32
  }
  func.func @transform_3(%arg0: i32) -> (i32, i32) {
    %c0_i32 = arith.constant 0 : i32
    %c0_i32_0 = arith.constant 0 : i32
    %c0_i32_1 = arith.constant 0 : i32
    return %c0_i32, %c0_i32_0 : i32, i32
  }
  func.func @transform_4(%arg0: i32) -> (i32, i32) {
    %c0_i32 = arith.constant 0 : i32
    %c0_i32_0 = arith.constant 0 : i32
    %c0_i32_1 = arith.constant 0 : i32
    return %c0_i32, %c0_i32_0 : i32, i32
  }
  func.func @transform_5(%arg0: i32) -> (i32, i32) {
    %c0_i32 = arith.constant 0 : i32
    %c0_i32_0 = arith.constant 0 : i32
    %c0_i32_1 = arith.constant 0 : i32
    return %c0_i32, %c0_i32_0 : i32, i32
  }
  func.func @transform_6(%arg0: i32) -> (i32, i32) {
    %c0_i32 = arith.constant 0 : i32
    %c0_i32_0 = arith.constant 0 : i32
    %c0_i32_1 = arith.constant 0 : i32
    return %c0_i32, %c0_i32_0 : i32, i32
  }
  func.func @transform_7(%arg0: i32) -> (i32, i32) {
    %c0_i32 = arith.constant 0 : i32
    %c0_i32_0 = arith.constant 0 : i32
    return %arg0, %c0_i32 : i32, i32
  }
}

</mosaic_0001>

<bundles_post_ra>
// kernel: net_forward.1
= control target key start
LH: loop header
LB: loop body
LE: loop exit
PB: predicated region body
PF: predicated region fallthrough
CT: control target
= control target key end

     0   :  { %s4187_s24 = smov 0   ;;  %s5391_s0 = inlined_call_operand.vmem [shape: bf16[4096,8], index: 0, kind: input, shape index: {}]   ;;  %s5392_s1 = inlined_call_operand.vmem [shape: bf16[8,256], index: 1, kind: input, shape index: {}]   ;;  %s5393_s2 = inlined_call_operand.vmem [shape: f32[1,256], index: 2, kind: input, shape index: {}]   ;;  %s5394_s3 = inlined_call_operand.vmem [shape: bf16[256,128], index: 3, kind: input, shape index: {}]   ;;  %s5395_s4 = inlined_call_operand.vmem [shape: f32[1,128], index: 4, kind: input, shape index: {}]   ;;  %s5396_s5 = inlined_call_operand.vmem [shape: bf16[128,8], index: 5, kind: input, shape index: {}]   ;;  %s5397_s6 = inlined_call_operand.vmem [shape: f32[1,8], index: 6, kind: input, shape index: {}]   ;;  %s5398_s7 = inlined_call_operand.vmem [shape: f32[4096,8], index: 7, kind: output, shape index: {}]  }
   0x1 LB: > { %s3651_s25 = sadd.s32 4294967295, %s4144_s24   ;;  %p3654_p0 = scmp.ge.s32.totalorder %s4144_s24, 1  ;;  %s4144_s24 = sphi %s4187_s24, %s17_s24  }
   0x2   : > { %p227_p1 = scmp.lt.s32.totalorder %s4144_s24, 5 }
   0x4   : > { %p228_p2 = pnand %p3654_p0, %p227_p1 }
   0x5   : > { %v394_v0 = vld [vmem:[%s5392_s1] sm:$0xff] (!%p228_p2)  ;;  %vm925_vm0 = vcmask (!%p228_p2), 1043456   ;;  %s3657_s28 = sshll.u32 (!%p228_p2), %s3651_s25, 10  ;;  %v4146_v3 = vmov (!%p228_p2), 0   ;;  %vm732_vm1 = vcmask (!%p228_p2), 64512   ;;  %v4063_v9 = vld [vmem:[%s5394_s3 + $0x8] sm:$0xff] (!%p228_p2)  }
   0x6   : > { %231 = sbr.rel (%p228_p2) target bundleno = 1176 (0x498), region = 48  ;;  %v3724_v1 = vcombine.high (!%p228_p2), %v394_v0, %v394_v0  ;;  %v3723_v2 = vcombine.low (!%p228_p2), %v394_v0, %v394_v0  ;;  %964 = vmatprep.mubr.bf16.mxu0 (!%p228_p2), %v4146_v3  ;;  %s262_s29 = sshra.s32 (!%p228_p2), %s3657_s28, 3  ;;  %1444 = vmatprep.mubr.bf16.mxu1 (!%p228_p2), %v4146_v3  ;;  %v4060_v7 = vld [vmem:[%s5394_s3] sm:$0xff] (!%p228_p2)   ;;  %v4066_v11 = vld [vmem:[%s5394_s3 + $0x10] sm:$0xff] (!%p228_p2)   ;;  %v4069_v13 = vld [vmem:[%s5394_s3 + $0x18] sm:$0xff] (!%p228_p2)   ;;  %v397_v0 = vlaneseq (!%p228_p2) }
   0x7   : > { %s3658_s30 = sshll.u32 (!%p228_p2), %s262_s29, 2  ;;  %v4072_v16 = vld [vmem:[%s5394_s3 + $0x20] sm:$0xff] (!%p228_p2)   ;;  %v4075_v18 = vld [vmem:[%s5394_s3 + $0x28] sm:$0xff] (!%p228_p2)   ;;  %v4078_v20 = vld [vmem:[%s5394_s3 + $0x30] sm:$0xff] (!%p228_p2)   ;;  %s3655_s26 = sshll.u32 (!%p228_p2), %s3651_s25, 7 }
   0x8   : > { %3725 = vmatprep.subr.msk.bf16.mxu0 (!%p228_p2), %vm925_vm0, %v3724_v1  ;;  %v927_v4 = vsel (!%p228_p2), %vm925_vm0, %v3723_v2, 0  ;;  %s4205_s10 = scalar_lea.vmem (!%p228_p2), %s5391_s0, %s3658_s30  ;;  %4034 = vmatprep.subr.msk.bf16.mxu1 (!%p228_p2), %vm925_vm0, %v3724_v1  ;;  %v4081_v22 = vld [vmem:[%s5394_s3 + $0x38] sm:$0xff] (!%p228_p2)   ;;  %v4084_v24 = vld [vmem:[%s5394_s3 + $0x40] sm:$0xff] (!%p228_p2)   ;;  %v4087_v26 = vld [vmem:[%s5394_s3 + $0x48] sm:$0xff] (!%p228_p2)   ;;  %v398_v1 = vshrl.u32 (!%p228_p2), %v397_v0, 7  ;;  %p255_p3 = scmp.lt.s32.totalorder (!%p228_p2), %s3655_s26, 511 }
   0x9   : > { %933 = vmatpush1.bf16.msra.mxu0 (!%p228_p2), %v927_v4  ;;  %v4047_v5 = vld [vmem:[%s4205_s10] sm:$0xff] (!%p228_p2)   ;;  %4035 = vmatpush1.bf16.msra.mxu1 (!%p228_p2), %v927_v4  ;;  %v4048_v6 = vld [vmem:[%s4205_s10 + $0x8] sm:$0xff] (!%p228_p2)   ;;  %v4049_v10 = vld [vmem:[%s4205_s10 + $0x10] sm:$0xff] (!%p228_p2)  }
   0xa   : > { %2124 = vmatprep.subr.bf16.mxu1 (!%p228_p2), %v4146_v3  ;;  %v4059_v8 = vld [vmem:[%s4205_s10 + $0x180] sm:$0xff] (!%p228_p2)   ;;  %v4062_v12 = vld [vmem:[%s4205_s10 + $0x188] sm:$0xff] (!%p228_p2)   ;;  %v4050_v14 = vld [vmem:[%s4205_s10 + $0x18] sm:$0xff] (!%p228_p2)   ;;  %v399_v4 = vsub.s32 (!%p228_p2), 0, %v398_v1 }
   0xb   : > { %v4065_v15 = vld [vmem:[%s4205_s10 + $0x190] sm:$0xff] (!%p228_p2)   ;;  %v4051_v17 = vld [vmem:[%s4205_s10 + $0x20] sm:$0xff] (!%p228_p2)   ;;  %v4068_v19 = vld [vmem:[%s4205_s10 + $0x198] sm:$0xff] (!%p228_p2)  }
   0xc   : > { %3726 = vmatmul.mubr.msk.bf16.vlgmr.msra.gmra.mrb[0].mxu0 (!%p228_p2), %vm732_vm1, %v4047_v5  ;;  %3774 = vmatmul.mubr.msk.bf16.vlgmr.msra.gmra.mrb[0].mxu1 (!%p228_p2), %vm732_vm1, %v4059_v8  ;;  %v4052_v21 = vld [vmem:[%s4205_s10 + $0x28] sm:$0xff] (!%p228_p2)   ;;  %v4071_v23 = vld [vmem:[%s4205_s10 + $0x1a0] sm:$0xff] (!%p228_p2)   ;;  %v4053_v25 = vld [vmem:[%s4205_s10 + $0x30] sm:$0xff] (!%p228_p2)  }
   0xd   : > { %974 = vmatprep.mubr.bf16.mxu0 %v4146_v3  ;;  %2125 = vmatpush1.bf16.msra.mxu1 %v4060_v7  ;;  %v4074_v27 = vld [vmem:[%s4205_s10 + $0x1a8] sm:$0xff]   ;;  %v4090_v28 = vld [vmem:[%s5394_s3 + $0x50] sm:$0xff]   ;;  %v4054_v29 = vld [vmem:[%s4205_s10 + $0x38] sm:$0xff]   ;;  %s5400_s26 = smov (!%p255_p3, %s3655_s26), 511 }
   0xe   : > { %1454 = vmatprep.mubr.bf16.mxu1 %v4146_v3  ;;  %2126 = vmatprep.subr.bf16.mxu1 %v4146_v3  ;;  %v4093_v30 = vld [vmem:[%s5394_s3 + $0x58] sm:$0xff]   ;;  %v4077_v31 = vld [vmem:[%s4205_s10 + $0x1b0] sm:$0xff]   ;;  %v4096_v32 = vld [vmem:[%s5394_s3 + $0x60] sm:$0xff]   ;;  %s3656_s25 = sshll.u32 %s5400_s26, 3 }
   0xf   : > { %v4055_v33 = vld [vmem:[%s4205_s10 + $0x40] sm:$0xff]   ;;  %v4080_v34 = vld [vmem:[%s4205_s10 + $0x1b8] sm:$0xff]   ;;  %v4099_v35 = vld [vmem:[%s5394_s3 + $0x68] sm:$0xff]   ;;  %s4905_s8 = scalar_lea.vmem %s5398_s7, %s3656_s25 }
  0x10   : > { %v4056_v36 = vld [vmem:[%s4205_s10 + $0x48] sm:$0xff]   ;;  %v4083_v37 = vld [vmem:[%s4205_s10 + $0x1c0] sm:$0xff]   ;;  %v4102_v38 = vld [vmem:[%s5394_s3 + $0x70] sm:$0xff]  }
  0x11   : > { %2127 = vmatpush1.bf16.msra.mxu1 %v4063_v9  ;;  %v4057_v39 = vld [vmem:[%s4205_s10 + $0x50] sm:$0xff]   ;;  %v4086_v40 = vld [vmem:[%s4205_s10 + $0x1c8] sm:$0xff]   ;;  %v4058_v41 = vld [vmem:[%s4205_s10 + $0x58] sm:$0xff]  }
  0x12   : > { %2128 = vmatprep.subr.bf16.mxu1 %v4146_v3  ;;  %v4089_v42 = vld [vmem:[%s4205_s10 + $0x1d0] sm:$0xff]   ;;  %v4105_v43 = vld [vmem:[%s5394_s3 + $0x78] sm:$0xff]   ;;  %v4061_v44 = vld [vmem:[%s4205_s10 + $0x60] sm:$0xff]  }
  0x13   : > { %v4092_v45 = vld [vmem:[%s4205_s10 + $0x1d8] sm:$0xff]   ;;  %v4064_v46 = vld [vmem:[%s4205_s10 + $0x68] sm:$0xff]   ;;  %v4095_v47 = vld [vmem:[%s4205_s10 + $0x1e0] sm:$0xff]  }
  0x14   : > { %3727 = vmatmul.mubr.msk.bf16.gmra.mrb[4].mxu0 %vm732_vm1, %v4048_v6  ;;  %3775 = vmatmul.mubr.msk.bf16.gmra.mrb[4].mxu1 %vm732_vm1, %v4062_v12  ;;  %v4067_v48 = vld [vmem:[%s4205_s10 + $0x70] sm:$0xff]   ;;  %v4098_v49 = vld [vmem:[%s4205_s10 + $0x1e8] sm:$0xff]   ;;  %v4070_v50 = vld [vmem:[%s4205_s10 + $0x78] sm:$0xff]   ;;  %v403_v6 = vsub.s32 1, %v398_v1 }
  0x15   : > { %984 = vmatprep.mubr.bf16.mxu0 %v4146_v3  ;;  %1464 = vmatprep.mubr.bf16.mxu1 %v4146_v3  ;;  %v4101_v51 = vld [vmem:[%s4205_s10 + $0x1f0] sm:$0xff]   ;;  %v4073_v52 = vld [vmem:[%s4205_s10 + $0x80] sm:$0xff]   ;;  %v4104_v53 = vld [vmem:[%s4205_s10 + $0x1f8] sm:$0xff]  }
  0x16   : > { %2129 = vmatpush1.bf16.msra.mxu1 %v4066_v11  ;;  %v4076_v54 = vld [vmem:[%s4205_s10 + $0x88] sm:$0xff]   ;;  %v4079_v55 = vld [vmem:[%s4205_s10 + $0x90] sm:$0xff]   ;;  %v4082_v56 = vld [vmem:[%s4205_s10 + $0x98] sm:$0xff]  }
  0x17   : > { %2130 = vmatprep.subr.bf16.mxu1 %v4146_v3  ;;  %v4085_v57 = vld [vmem:[%s4205_s10 + $0xa0] sm:$0xff]   ;;  %v4088_v58 = vld [vmem:[%s4205_s10 + $0xa8] sm:$0xff]   ;;  %v4091_v59 = vld [vmem:[%s4205_s10 + $0xb0] sm:$0xff]  }
  0x18   : > { %v4094_v60 = vld [vmem:[%s4205_s10 + $0xb8] sm:$0xff]   ;;  %v4119_v61 = vld [vmem:[%s5396_s5] sm:$0xff]   ;;  %v4100_v63 = vld [vmem:[%s4205_s10 + $0xc8] sm:$0xff]  }
  0x19   : > { %3890 = vmatprep.subr.bf16.mxu0 %v4119_v61  ;;  %v4097_v62 = vld [vmem:[%s4205_s10 + $0xc0] sm:$0xff]   ;;  %v4103_v2 = vld [vmem:[%s4205_s10 + $0xd0] sm:$0xff]   ;;  %v4106_v12 = vld [vmem:[%s4205_s10 + $0xd8] sm:$0xff]  }
  0x1a   : > { %2131 = vmatpush1.bf16.msra.mxu1 %v4069_v13  ;;  %3891 = vmatpush3.bf16.msra.mxu0 %v4119_v61  ;;  %v395_v5 = vld [vmem:[%s5393_s2] sm:$0x3] }
  0x1b   : > { %2132 = vmatprep.subr.bf16.mxu1 %v4146_v3  ;;  %v4404_v7 = vrot.slane %v395_v5, %v399_v4  ;;  %v4406_v8 = vrot.slane %v395_v5, %v403_v6 }
  0x1c   : > { %3728 = vmatmul.mubr.msk.bf16.gmra.mrb[8].mxu0 %vm732_vm1, %v4049_v10  ;;  %3776 = vmatmul.mubr.msk.bf16.gmra.mrb[8].mxu1 %vm732_vm1, %v4065_v15 }
  0x1d   : > { %994 = vmatprep.mubr.bf16.mxu0 %v4146_v3  ;;  %1474 = vmatprep.mubr.bf16.mxu1 %v4146_v3 }
  0x1e   : > { %2133 = vmatpush1.bf16.msra.mxu1 %v4072_v16 }
  0x1f   : > { %2134 = vmatprep.subr.bf16.mxu1 %v4146_v3 }
  0x22   : > { %2135 = vmatpush1.bf16.msra.mxu1 %v4075_v18 }
  0x23   : > { %2136 = vmatprep.subr.bf16.mxu1 %v4146_v3 }
  0x24   : > { %3729 = vmatmul.mubr.msk.bf16.gmra.mrb[12].mxu0 %vm732_vm1, %v4050_v14  ;;  %3777 = vmatmul.mubr.msk.bf16.gmra.mrb[12].mxu1 %vm732_vm1, %v4068_v19 }
  0x25   : > { %1004 = vmatprep.mubr.bf16.mxu0 %v4146_v3  ;;  %1484 = vmatprep.mubr.bf16.mxu1 %v4146_v3 }
  0x26   : > { %2137 = vmatpush1.bf16.msra.mxu1 %v4078_v20 }
  0x27   : > { %2138 = vmatprep.subr.bf16.mxu1 %v4146_v3 }
  0x2a   : > { %2139 = vmatpush1.bf16.msra.mxu1 %v4081_v22 }
  0x2b   : > { %2140 = vmatprep.subr.bf16.mxu1 %v4146_v3 }
  0x2c   : > { %3730 = vmatmul.mubr.msk.bf16.gmra.mrb[16].mxu0 %vm732_vm1, %v4051_v17  ;;  %3778 = vmatmul.mubr.msk.bf16.gmra.mrb[16].mxu1 %vm732_vm1, %v4071_v23 }
  0x2d   : > { %1014 = vmatprep.mubr.bf16.mxu0 %v4146_v3  ;;  %1494 = vmatprep.mubr.bf16.mxu1 %v4146_v3 }
  0x2e   : > { %2141 = vmatpush1.bf16.msra.mxu1 %v4084_v24 }
  0x2f   : > { %2142 = vmatprep.subr.bf16.mxu1 %v4146_v3 }
  0x32   : > { %2143 = vmatpush1.bf16.msra.mxu1 %v4087_v26 }
  0x33   : > { %2144 = vmatprep.subr.bf16.mxu1 %v4146_v3 }
  0x34   : > { %3731 = vmatmul.mubr.msk.bf16.gmra.mrb[20].mxu0 %vm732_vm1, %v4052_v21  ;;  %3779 = vmatmul.mubr.msk.bf16.gmra.mrb[20].mxu1 %vm732_vm1, %v4074_v27  ;;  %v4107_v27 = vld [vmem:[%s4205_s10 + $0xe0] sm:$0xff]  }
  0x35   : > { %1024 = vmatprep.mubr.bf16.mxu0 %v4146_v3  ;;  %1504 = vmatprep.mubr.bf16.mxu1 %v4146_v3 }
  0x36   : > { %2145 = vmatpush1.bf16.msra.mxu1 %v4090_v28 }
  0x37   : > { %2146 = vmatprep.subr.bf16.mxu1 %v4146_v3 }
  0x3a   : > { %2147 = vmatpush1.bf16.msra.mxu1 %v4093_v30 }
  0x3b   : > { %2148 = vmatprep.subr.bf16.mxu1 %v4146_v3 }
  0x3c   : > { %3732 = vmatmul.mubr.msk.bf16.gmra.mrb[24].mxu0 %vm732_vm1, %v4053_v25  ;;  %3780 = vmatmul.mubr.msk.bf16.gmra.mrb[24].mxu1 %vm732_vm1, %v4077_v31 }
  0x3d   : > { %1034 = vmatprep.mubr.bf16.mxu0 %v4146_v3  ;;  %1514 = vmatprep.mubr.bf16.mxu1 %v4146_v3 }
  0x3e   : > { %2149 = vmatpush1.bf16.msra.mxu1 %v4096_v32 }
  0x3f   : > { %2150 = vmatprep.subr.bf16.mxu1 %v4146_v3 }
  0x42   : > { %2151 = vmatpush1.bf16.msra.mxu1 %v4099_v35 }
  0x43   : > { %2152 = vmatprep.subr.bf16.mxu1 %v4146_v3 }
  0x44   : > { %3733 = vmatmul.mubr.msk.bf16.gmra.mrb[28].mxu0 %vm732_vm1, %v4054_v29  ;;  %3781 = vmatmul.mubr.msk.bf16.gmra.mrb[28].mxu1 %vm732_vm1, %v4080_v34 }
  0x45   : > { %1044 = vmatprep.mubr.bf16.mxu0 %v4146_v3  ;;  %1524 = vmatprep.mubr.bf16.mxu1 %v4146_v3 }
  0x46   : > { %2153 = vmatpush1.bf16.msra.mxu1 %v4102_v38 }
  0x47   : > { %2154 = vmatprep.subr.bf16.mxu1 %v4146_v3 }
  0x4a   : > { %2155 = vmatpush1.bf16.msra.mxu1 %v4105_v43 }
  0x4c   : > { %3734 = vmatmul.mubr.msk.bf16.gmra.mrb[32].mxu0 %vm732_vm1, %v4055_v33  ;;  %3782 = vmatmul.mubr.msk.bf16.gmra.mrb[32].mxu1 %vm732_vm1, %v4083_v37 }
  0x4d   : > { %1054 = vmatprep.mubr.bf16.mxu0 %v4146_v3  ;;  %1534 = vmatprep.mubr.bf16.mxu1 %v4146_v3 }
  0x54   : > { %3735 = vmatmul.mubr.msk.bf16.gmra.mrb[36].mxu0 %vm732_vm1, %v4056_v36  ;;  %3783 = vmatmul.mubr.msk.bf16.gmra.mrb[36].mxu1 %vm732_vm1, %v4086_v40 }
  0x55   : > { %1064 = vmatprep.mubr.bf16.mxu0 %v4146_v3  ;;  %1544 = vmatprep.mubr.bf16.mxu1 %v4146_v3 }
  0x5c   : > { %3736 = vmatmul.mubr.msk.bf16.gmra.mrb[40].mxu0 %vm732_vm1, %v4057_v39  ;;  %3784 = vmatmul.mubr.msk.bf16.gmra.mrb[40].mxu1 %vm732_vm1, %v4089_v42 }
  0x5d   : > { %1074 = vmatprep.mubr.bf16.mxu0 %v4146_v3  ;;  %1554 = vmatprep.mubr.bf16.mxu1 %v4146_v3 }
  0x64   : > { %3737 = vmatmul.mubr.msk.bf16.gmra.mrb[44].mxu0 %vm732_vm1, %v4058_v41  ;;  %3785 = vmatmul.mubr.msk.bf16.gmra.mrb[44].mxu1 %vm732_vm1, %v4092_v45 }
  0x65   : > { %1084 = vmatprep.mubr.bf16.mxu0 %v4146_v3  ;;  %1564 = vmatprep.mubr.bf16.mxu1 %v4146_v3 }
  0x6c   : > { %3738 = vmatmul.mubr.msk.bf16.gmra.mrb[48].mxu0 %vm732_vm1, %v4061_v44  ;;  %3786 = vmatmul.mubr.msk.bf16.gmra.mrb[48].mxu1 %vm732_vm1, %v4095_v47 }
  0x6d   : > { %1094 = vmatprep.mubr.bf16.mxu0 %v4146_v3  ;;  %1574 = vmatprep.mubr.bf16.mxu1 %v4146_v3 }
  0x74   : > { %3739 = vmatmul.mubr.msk.bf16.gmra.mrb[52].mxu0 %vm732_vm1, %v4064_v46  ;;  %3787 = vmatmul.mubr.msk.bf16.gmra.mrb[52].mxu1 %vm732_vm1, %v4098_v49 }
  0x75   : > { %1104 = vmatprep.mubr.bf16.mxu0 %v4146_v3  ;;  %1584 = vmatprep.mubr.bf16.mxu1 %v4146_v3 }
  0x7c   : > { %3740 = vmatmul.mubr.msk.bf16.gmra.mrb[56].mxu0 %vm732_vm1, %v4067_v48  ;;  %3788 = vmatmul.mubr.msk.bf16.gmra.mrb[56].mxu1 %vm732_vm1, %v4101_v51 }
  0x7d   : > { %1114 = vmatprep.mubr.bf16.mxu0 %v4146_v3  ;;  %1594 = vmatprep.mubr.bf16.mxu1 %v4146_v3 }
  0x84   : > { %3741 = vmatmul.mubr.msk.bf16.gmra.mrb[60].mxu0 %vm732_vm1, %v4070_v50  ;;  %3789 = vmatmul.mubr.msk.bf16.gmra.mrb[60].mxu1 %vm732_vm1, %v4104_v53  ;;  %v4108_v53 = vld [vmem:[%s4205_s10 + $0xe8] sm:$0xff]  }
  0x85   : > { %1124 = vmatprep.mubr.bf16.mxu0 %v4146_v3 }
  0x8c   : > { %3742 = vmatmul.mubr.msk.bf16.gmra.mrb[64].mxu0 %vm732_vm1, %v4073_v52 }
  0x8d   : > { %1134 = vmatprep.mubr.bf16.mxu0 %v4146_v3 }
  0x94   : > { %3743 = vmatmul.mubr.msk.bf16.gmra.mrb[68].mxu0 %vm732_vm1, %v4076_v54 }
  0x95   : > { %1144 = vmatprep.mubr.bf16.mxu0 %v4146_v3 }
  0x9c   : > { %3744 = vmatmul.mubr.msk.bf16.gmra.mrb[72].mxu0 %vm732_vm1, %v4079_v55 }
  0x9d   : > { %1154 = vmatprep.mubr.bf16.mxu0 %v4146_v3 }
  0xa4   : > { %3745 = vmatmul.mubr.msk.bf16.gmra.mrb[76].mxu0 %vm732_vm1, %v4082_v56 }
  0xa5   : > { %1164 = vmatprep.mubr.bf16.mxu0 %v4146_v3 }
  0xac   : > { %3746 = vmatmul.mubr.msk.bf16.gmra.mrb[80].mxu0 %vm732_vm1, %v4085_v57 }
  0xad   : > { %1174 = vmatprep.mubr.bf16.mxu0 %v4146_v3 }
  0xb4   : > { %3747 = vmatmul.mubr.msk.bf16.gmra.mrb[84].mxu0 %vm732_vm1, %v4088_v58 }
  0xb5   : > { %1184 = vmatprep.mubr.bf16.mxu0 %v4146_v3 }
  0xbc   : > { %3748 = vmatmul.mubr.msk.bf16.gmra.mrb[88].mxu0 %vm732_vm1, %v4091_v59 }
  0xbd   : > { %1194 = vmatprep.mubr.bf16.mxu0 %v4146_v3 }
  0xc4   : > { %3749 = vmatmul.mubr.msk.bf16.gmra.mrb[92].mxu0 %vm732_vm1, %v4094_v60 }
  0xc5   : > { %1204 = vmatprep.mubr.bf16.mxu0 %v4146_v3 }
  0xcc   : > { %3750 = vmatmul.mubr.msk.bf16.gmra.mrb[96].mxu0 %vm732_vm1, %v4097_v62 }
  0xcd   : > { %1214 = vmatprep.mubr.bf16.mxu0 %v4146_v3 }
  0xd4   : > { %3751 = vmatmul.mubr.msk.bf16.gmra.mrb[100].mxu0 %vm732_vm1, %v4100_v63 }
  0xd5   : > { %1224 = vmatprep.mubr.bf16.mxu0 %v4146_v3 }
  0xdc   : > { %3752 = vmatmul.mubr.msk.bf16.gmra.mrb[104].mxu0 %vm732_vm1, %v4103_v2 }
  0xdd   : > { %1234 = vmatprep.mubr.bf16.mxu0 %v4146_v3 }
  0xdf   : > { %v966_v9 = vpop.f32.mrb[0].mxu0  ;;  %v1446_v32 = vpop.f32.mrb[0].mxu1 }
  0xe0   : > { %v967_v10 = vadd.f32 %v966_v9, %v4404_v7  ;;  %v968_v11 = vpop.f32.mrb[1].mxu0  ;;  %v1447_v34 = vadd.f32 %v1446_v32, %v4404_v7  ;;  %v1448_v35 = vpop.f32.mrb[1].mxu1 }
  0xe1   : > { %v969_v13 = vadd.f32 %v968_v11, %v4406_v8  ;;  %v970_v14 = vpop.f32.mrb[2].mxu0  ;;  %v1449_v38 = vadd.f32 %v1448_v35, %v4406_v8  ;;  %v1450_v39 = vpop.f32.mrb[2].mxu1 }
  0xe2   : > { %v971_v15 = vadd.f32 %v970_v14, %v4404_v7  ;;  %v972_v16 = vpop.f32.mrb[3].mxu0  ;;  %v1605_v18 = vmax.f32 %v967_v10, 0.0  ;;  %v1797_v42 = vmax.f32 %v1447_v34, 0.0  ;;  %v1451_v43 = vadd.f32 %v1450_v39, %v4404_v7  ;;  %v1452_v44 = vpop.f32.mrb[3].mxu1 }
  0xe3   : > { %v973_v17 = vadd.f32 %v972_v16, %v4406_v8  ;;  %v1606_v20 = vmax.f32 %v969_v13, 0.0  ;;  %v1798_v46 = vmax.f32 %v1449_v38, 0.0  ;;  %v1453_v47 = vadd.f32 %v1452_v44, %v4406_v8 }
  0xe4   : > { %v1607_v19 = vmax.f32 %v971_v15, 0.0  ;;  %3753 = vmatmul.mubr.msk.bf16.gmra.mrb[108].mxu0 %vm732_vm1, %v4106_v12  ;;  %v1799_v50 = vmax.f32 %v1451_v43, 0.0 }
  0xe5   : > { %v1608_v21 = vmax.f32 %v973_v17, 0.0  ;;  %1244 = vmatprep.mubr.bf16.mxu0 %v4146_v3  ;;  %v1800_v54 = vmax.f32 %v1453_v47, 0.0 }
  0xe6   : > { %v1861_v22 = vpack.c.bf16 %v1607_v19, %v1605_v18  ;;  %v4430_v57 = vpack.c.bf16 %v1799_v50, %v1797_v42  ;;  %v4126_v19 = vld [vmem:[%s5396_s5 + $0x8] sm:$0xff]  }
  0xe7   : > { %v976_v23 = vpop.f32.mrb[4].mxu0  ;;  %v1862_v24 = vpack.c.bf16 %v1608_v21, %v1606_v20  ;;  %v1456_v60 = vpop.f32.mrb[4].mxu1  ;;  %v4433_v61 = vpack.c.bf16 %v1800_v54, %v1798_v46  ;;  %3892 = vmatprep.subr.bf16.mxu0 %v4126_v19 }
  0xe8   : > { %v977_v25 = vadd.f32 %v976_v23, %v4404_v7  ;;  %v978_v26 = vpop.f32.mrb[5].mxu0  ;;  %v1457_v63 = vadd.f32 %v1456_v60, %v4404_v7  ;;  %v1458_v0 = vpop.f32.mrb[5].mxu1  ;;  %3893 = vmatpush3.bf16.msra.mxu0 %v4126_v19 }
  0xe9   : > { %v979_v28 = vadd.f32 %v978_v26, %v4406_v8  ;;  %v980_v29 = vpop.f32.mrb[6].mxu0  ;;  %2156 = vmatprep.mubr.bf16.mxu1 %v1862_v24  ;;  %v1459_v4 = vadd.f32 %v1458_v0, %v4406_v8  ;;  %v1460_v5 = vpop.f32.mrb[6].mxu1 }
  0xea   : > { %v981_v30 = vadd.f32 %v980_v29, %v4404_v7  ;;  %v982_v31 = vpop.f32.mrb[7].mxu0  ;;  %2157 = vmatmul.mubr.bf16.vlgmr.msra.gmra.mrb[64].mxu1 %v1861_v22  ;;  %v1609_v36 = vmax.f32 %v977_v25, 0.0  ;;  %v1801_v10 = vmax.f32 %v1457_v63, 0.0  ;;  %v1461_v11 = vadd.f32 %v1460_v5, %v4404_v7  ;;  %v1462_v12 = vpop.f32.mrb[7].mxu1  ;;  %v4109_v22 = vld [vmem:[%s4205_s10 + $0xf0] sm:$0xff]  }
  0xeb   : > { %v983_v33 = vadd.f32 %v982_v31, %v4406_v8  ;;  %v1610_v40 = vmax.f32 %v979_v28, 0.0  ;;  %v1802_v14 = vmax.f32 %v1459_v4, 0.0  ;;  %v1463_v15 = vadd.f32 %v1462_v12, %v4406_v8 }
  0xec   : > { %v1611_v37 = vmax.f32 %v981_v30, 0.0  ;;  %3754 = vmatmul.mubr.msk.bf16.gmra.mrb[112].mxu0 %vm732_vm1, %v4107_v27  ;;  %v1803_v18 = vmax.f32 %v1461_v11, 0.0 }
  0xed   : > { %v1612_v41 = vmax.f32 %v983_v33, 0.0  ;;  %1254 = vmatprep.mubr.bf16.mxu0 %v4146_v3  ;;  %v1804_v23 = vmax.f32 %v1463_v15, 0.0 }
  0xee   : > { %v1863_v45 = vpack.c.bf16 %v1611_v37, %v1609_v36  ;;  %v4448_v26 = vpack.c.bf16 %v1803_v18, %v1801_v10 }
  0xef   : > { %v986_v48 = vpop.f32.mrb[8].mxu0  ;;  %v1864_v49 = vpack.c.bf16 %v1612_v41, %v1610_v40  ;;  %v1466_v29 = vpop.f32.mrb[8].mxu1  ;;  %v4451_v30 = vpack.c.bf16 %v1804_v23, %v1802_v14 }
  0xf0   : > { %v987_v51 = vadd.f32 %v986_v48, %v4404_v7  ;;  %v988_v52 = vpop.f32.mrb[9].mxu0  ;;  %v1467_v32 = vadd.f32 %v1466_v29, %v4404_v7  ;;  %v1468_v33 = vpop.f32.mrb[9].mxu1 }
  0xf1   : > { %v989_v55 = vadd.f32 %v988_v52, %v4406_v8  ;;  %v990_v56 = vpop.f32.mrb[10].mxu0  ;;  %2164 = vmatprep.mubr.bf16.mxu1 %v1864_v49  ;;  %v1469_v36 = vadd.f32 %v1468_v33, %v4406_v8  ;;  %v1470_v37 = vpop.f32.mrb[10].mxu1 }
  0xf2   : > { %v991_v58 = vadd.f32 %v990_v56, %v4404_v7  ;;  %v992_v59 = vpop.f32.mrb[11].mxu0  ;;  %2165 = vmatmul.mubr.bf16.gmra.mrb[68].mxu1 %v1863_v45  ;;  %v1613_v1 = vmax.f32 %v987_v51, 0.0  ;;  %v1805_v40 = vmax.f32 %v1467_v32, 0.0  ;;  %v1471_v41 = vadd.f32 %v1470_v37, %v4404_v7  ;;  %v1472_v42 = vpop.f32.mrb[11].mxu1  ;;  %v4110_v51 = vld [vmem:[%s4205_s10 + $0xf8] sm:$0xff]  }
  0xf3   : > { %v993_v62 = vadd.f32 %v992_v59, %v4406_v8  ;;  %v1614_v6 = vmax.f32 %v989_v55, 0.0  ;;  %v1806_v44 = vmax.f32 %v1469_v36, 0.0  ;;  %v1473_v45 = vadd.f32 %v1472_v42, %v4406_v8 }
  0xf4   : > { %v1615_v2 = vmax.f32 %v991_v58, 0.0  ;;  %3755 = vmatmul.mubr.msk.bf16.gmra.mrb[116].mxu0 %vm732_vm1, %v4108_v53  ;;  %v1807_v48 = vmax.f32 %v1471_v41, 0.0 }
  0xf5   : > { %v1616_v9 = vmax.f32 %v993_v62, 0.0  ;;  %1264 = vmatprep.mubr.bf16.mxu0 %v4146_v3  ;;  %v1808_v52 = vmax.f32 %v1473_v45, 0.0 }
  0xf6   : > { %v1865_v13 = vpack.c.bf16 %v1615_v2, %v1613_v1  ;;  %v4463_v55 = vpack.c.bf16 %v1807_v48, %v1805_v40 }
  0xf7   : > { %v996_v16 = vpop.f32.mrb[12].mxu0  ;;  %v1866_v17 = vpack.c.bf16 %v1616_v9, %v1614_v6  ;;  %v1476_v59 = vpop.f32.mrb[12].mxu1  ;;  %v4466_v60 = vpack.c.bf16 %v1808_v52, %v1806_v44  ;;  %v4112_v52 = vld [vmem:[%s4205_s10 + $0x108] sm:$0xff]  }
  0xf8   : > { %v997_v20 = vadd.f32 %v996_v16, %v4404_v7  ;;  %v998_v21 = vpop.f32.mrb[13].mxu0  ;;  %v1477_v63 = vadd.f32 %v1476_v59, %v4404_v7  ;;  %v1478_v0 = vpop.f32.mrb[13].mxu1 }
  0xf9   : > { %v999_v24 = vadd.f32 %v998_v21, %v4406_v8  ;;  %v1000_v25 = vpop.f32.mrb[14].mxu0  ;;  %2172 = vmatprep.mubr.bf16.mxu1 %v1866_v17  ;;  %v1479_v4 = vadd.f32 %v1478_v0, %v4406_v8  ;;  %v1480_v5 = vpop.f32.mrb[14].mxu1  ;;  %v4111_v21 = vld [vmem:[%s4205_s10 + $0x100] sm:$0xff]  }
  0xfa   : > { %v1001_v27 = vadd.f32 %v1000_v25, %v4404_v7  ;;  %v1002_v28 = vpop.f32.mrb[15].mxu0  ;;  %2173 = vmatmul.mubr.bf16.gmra.mrb[72].mxu1 %v1865_v13  ;;  %v1617_v34 = vmax.f32 %v997_v20, 0.0  ;;  %v1809_v10 = vmax.f32 %v1477_v63, 0.0  ;;  %v1481_v11 = vadd.f32 %v1480_v5, %v4404_v7  ;;  %v1482_v12 = vpop.f32.mrb[15].mxu1 }
  0xfb   : > { %v1003_v31 = vadd.f32 %v1002_v28, %v4406_v8  ;;  %v1618_v38 = vmax.f32 %v999_v24, 0.0  ;;  %v1810_v14 = vmax.f32 %v1479_v4, 0.0  ;;  %v1483_v15 = vadd.f32 %v1482_v12, %v4406_v8 }
  0xfc   : > { %v1619_v35 = vmax.f32 %v1001_v27, 0.0  ;;  %3756 = vmatmul.mubr.msk.bf16.gmra.mrb[120].mxu0 %vm732_vm1, %v4109_v22  ;;  %v1811_v18 = vmax.f32 %v1481_v11, 0.0 }
  0xfd   : > { %v1620_v39 = vmax.f32 %v1003_v31, 0.0  ;;  %1274 = vmatprep.mubr.bf16.mxu0 %v4146_v3  ;;  %v1812_v22 = vmax.f32 %v1483_v15, 0.0 }
  0xfe   : > { %v1867_v43 = vpack.c.bf16 %v1619_v35, %v1617_v34  ;;  %v4478_v25 = vpack.c.bf16 %v1811_v18, %v1809_v10 }
  0xff   : > { %v1006_v46 = vpop.f32.mrb[16].mxu0  ;;  %v1868_v47 = vpack.c.bf16 %v1620_v39, %v1618_v38  ;;  %v1486_v29 = vpop.f32.mrb[16].mxu1  ;;  %v4481_v31 = vpack.c.bf16 %v1812_v22, %v1810_v14 }
 0x100   : > { %v1007_v49 = vadd.f32 %v1006_v46, %v4404_v7  ;;  %v1008_v50 = vpop.f32.mrb[17].mxu0  ;;  %v1487_v33 = vadd.f32 %v1486_v29, %v4404_v7  ;;  %v1488_v34 = vpop.f32.mrb[17].mxu1 }
 0x101   : > { %v1009_v53 = vadd.f32 %v1008_v50, %v4406_v8  ;;  %v1010_v54 = vpop.f32.mrb[18].mxu0  ;;  %2180 = vmatprep.mubr.bf16.mxu1 %v1868_v47  ;;  %v1489_v37 = vadd.f32 %v1488_v34, %v4406_v8  ;;  %v1490_v38 = vpop.f32.mrb[18].mxu1 }
 0x102   : > { %v1011_v56 = vadd.f32 %v1010_v54, %v4404_v7  ;;  %v1012_v58 = vpop.f32.mrb[19].mxu0  ;;  %2181 = vmatmul.mubr.bf16.gmra.mrb[76].mxu1 %v1867_v43  ;;  %v1621_v1 = vmax.f32 %v1007_v49, 0.0  ;;  %v1813_v41 = vmax.f32 %v1487_v33, 0.0  ;;  %v1491_v42 = vadd.f32 %v1490_v38, %v4404_v7  ;;  %v1492_v43 = vpop.f32.mrb[19].mxu1 }
 0x103   : > { %v1013_v62 = vadd.f32 %v1012_v58, %v4406_v8  ;;  %v1622_v6 = vmax.f32 %v1009_v53, 0.0  ;;  %v1814_v45 = vmax.f32 %v1489_v37, 0.0  ;;  %v1493_v46 = vadd.f32 %v1492_v43, %v4406_v8 }
 0x104   : > { %v1623_v2 = vmax.f32 %v1011_v56, 0.0  ;;  %3757 = vmatmul.mubr.msk.bf16.gmra.mrb[124].mxu0 %vm732_vm1, %v4110_v51  ;;  %v1815_v49 = vmax.f32 %v1491_v42, 0.0 }
 0x105   : > { %v1624_v9 = vmax.f32 %v1013_v62, 0.0  ;;  %1284 = vmatprep.mubr.bf16.mxu0 %v4146_v3  ;;  %v1816_v53 = vmax.f32 %v1493_v46, 0.0 }
 0x106   : > { %v1869_v13 = vpack.c.bf16 %v1623_v2, %v1621_v1  ;;  %v4493_v58 = vpack.c.bf16 %v1815_v49, %v1813_v41 }
 0x107   : > { %v1016_v16 = vpop.f32.mrb[20].mxu0  ;;  %v1870_v17 = vpack.c.bf16 %v1624_v9, %v1622_v6  ;;  %v1496_v63 = vpop.f32.mrb[20].mxu1  ;;  %v4496_v0 = vpack.c.bf16 %v1816_v53, %v1814_v45 }
 0x108   : > { %v1017_v19 = vadd.f32 %v1016_v16, %v4404_v7  ;;  %v1018_v20 = vpop.f32.mrb[21].mxu0  ;;  %v1497_v2 = vadd.f32 %v1496_v63, %v4404_v7  ;;  %v1498_v4 = vpop.f32.mrb[21].mxu1 }
 0x109   : > { %v1019_v23 = vadd.f32 %v1018_v20, %v4406_v8  ;;  %v1020_v24 = vpop.f32.mrb[22].mxu0  ;;  %2188 = vmatprep.mubr.bf16.mxu1 %v1870_v17  ;;  %v1499_v9 = vadd.f32 %v1498_v4, %v4406_v8  ;;  %v1500_v10 = vpop.f32.mrb[22].mxu1 }
 0x10a   : > { %v1021_v27 = vadd.f32 %v1020_v24, %v4404_v7  ;;  %v1022_v28 = vpop.f32.mrb[23].mxu0  ;;  %2189 = vmatmul.mubr.bf16.gmra.mrb[80].mxu1 %v1869_v13  ;;  %v1625_v35 = vmax.f32 %v1017_v19, 0.0  ;;  %v1817_v13 = vmax.f32 %v1497_v2, 0.0  ;;  %v1501_v14 = vadd.f32 %v1500_v10, %v4404_v7  ;;  %v1502_v15 = vpop.f32.mrb[23].mxu1  ;;  %v4113_v24 = vld [vmem:[%s4205_s10 + $0x110] sm:$0xff]  }
 0x10b   : > { %v1023_v32 = vadd.f32 %v1022_v28, %v4406_v8  ;;  %v1626_v39 = vmax.f32 %v1019_v23, 0.0  ;;  %v1818_v17 = vmax.f32 %v1499_v9, 0.0  ;;  %v1503_v18 = vadd.f32 %v1502_v15, %v4406_v8 }
 0x10c   : > { %v1627_v36 = vmax.f32 %v1021_v27, 0.0  ;;  %3758 = vmatmul.mubr.msk.bf16.gmra.mrb[128].mxu0 %vm732_vm1, %v4111_v21  ;;  %v1819_v21 = vmax.f32 %v1501_v14, 0.0 }
 0x10d   : > { %v1628_v40 = vmax.f32 %v1023_v32, 0.0  ;;  %1294 = vmatprep.mubr.bf16.mxu0 %v4146_v3  ;;  %v1820_v27 = vmax.f32 %v1503_v18, 0.0 }
 0x10e   : > { %v1871_v44 = vpack.c.bf16 %v1627_v36, %v1625_v35  ;;  %v4508_v32 = vpack.c.bf16 %v1819_v21, %v1817_v13 }
 0x10f   : > { %v1026_v47 = vpop.f32.mrb[24].mxu0  ;;  %v1872_v48 = vpack.c.bf16 %v1628_v40, %v1626_v39  ;;  %v1506_v35 = vpop.f32.mrb[24].mxu1  ;;  %v4511_v36 = vpack.c.bf16 %v1820_v27, %v1818_v17 }
 0x110   : > { %v1027_v50 = vadd.f32 %v1026_v47, %v4404_v7  ;;  %v1028_v51 = vpop.f32.mrb[25].mxu0  ;;  %v1507_v38 = vadd.f32 %v1506_v35, %v4404_v7  ;;  %v1508_v39 = vpop.f32.mrb[25].mxu1 }
 0x111   : > { %v1029_v54 = vadd.f32 %v1028_v51, %v4406_v8  ;;  %v1030_v56 = vpop.f32.mrb[26].mxu0  ;;  %2196 = vmatprep.mubr.bf16.mxu1 %v1872_v48  ;;  %v1509_v42 = vadd.f32 %v1508_v39, %v4406_v8  ;;  %v1510_v43 = vpop.f32.mrb[26].mxu1 }
 0x112   : > { %v1031_v59 = vadd.f32 %v1030_v56, %v4404_v7  ;;  %v1032_v62 = vpop.f32.mrb[27].mxu0  ;;  %2197 = vmatmul.mubr.bf16.gmra.mrb[84].mxu1 %v1871_v44  ;;  %v1629_v5 = vmax.f32 %v1027_v50, 0.0  ;;  %v1821_v46 = vmax.f32 %v1507_v38, 0.0  ;;  %v1511_v47 = vadd.f32 %v1510_v43, %v4404_v7  ;;  %v1512_v48 = vpop.f32.mrb[27].mxu1  ;;  %v4115_v38 = vld [vmem:[%s4205_s10 + $0x120] sm:$0xff]  }
 0x113   : > { %v1033_v1 = vadd.f32 %v1032_v62, %v4406_v8  ;;  %v1630_v11 = vmax.f32 %v1029_v54, 0.0  ;;  %v1822_v50 = vmax.f32 %v1509_v42, 0.0  ;;  %v1513_v51 = vadd.f32 %v1512_v48, %v4406_v8  ;;  %v4114_v62 = vld [vmem:[%s4205_s10 + $0x118] sm:$0xff]  }
 0x114   : > { %v1631_v6 = vmax.f32 %v1031_v59, 0.0  ;;  %3759 = vmatmul.mubr.msk.bf16.gmra.mrb[132].mxu0 %vm732_vm1, %v4112_v52  ;;  %v1823_v54 = vmax.f32 %v1511_v47, 0.0 }
 0x115   : > { %v1632_v12 = vmax.f32 %v1033_v1, 0.0  ;;  %1304 = vmatprep.mubr.bf16.mxu0 %v4146_v3  ;;  %v1824_v63 = vmax.f32 %v1513_v51, 0.0 }
 0x116   : > { %v1873_v16 = vpack.c.bf16 %v1631_v6, %v1629_v5  ;;  %v4523_v4 = vpack.c.bf16 %v1823_v54, %v1821_v46 }
 0x117   : > { %v1036_v19 = vpop.f32.mrb[28].mxu0  ;;  %v1874_v20 = vpack.c.bf16 %v1632_v12, %v1630_v11  ;;  %v1516_v9 = vpop.f32.mrb[28].mxu1  ;;  %v4526_v10 = vpack.c.bf16 %v1824_v63, %v1822_v50 }
 0x118   : > { %v1037_v22 = vadd.f32 %v1036_v19, %v4404_v7  ;;  %v1038_v23 = vpop.f32.mrb[29].mxu0  ;;  %v1517_v12 = vadd.f32 %v1516_v9, %v4404_v7  ;;  %v1518_v13 = vpop.f32.mrb[29].mxu1 }
 0x119   : > { %v1039_v28 = vadd.f32 %v1038_v23, %v4406_v8  ;;  %v1040_v29 = vpop.f32.mrb[30].mxu0  ;;  %2204 = vmatprep.mubr.bf16.mxu1 %v1874_v20  ;;  %v1520_v17 = vpop.f32.mrb[30].mxu1 }
 0x11a   : > { %v1041_v33 = vadd.f32 %v1040_v29, %v4404_v7  ;;  %v1042_v34 = vpop.f32.mrb[31].mxu0  ;;  %2205 = vmatmul.mubr.bf16.gmra.mrb[88].mxu1 %v1873_v16  ;;  %v1633_v40 = vmax.f32 %v1037_v22, 0.0  ;;  %v1519_v16 = vadd.f32 %v1518_v13, %v4406_v8  ;;  %v1825_v20 = vmax.f32 %v1517_v12, 0.0  ;;  %v1522_v22 = vpop.f32.mrb[31].mxu1 }
 0x11b   : > { %v1043_v37 = vadd.f32 %v1042_v34, %v4406_v8  ;;  %v1634_v44 = vmax.f32 %v1039_v28, 0.0  ;;  %v1521_v21 = vadd.f32 %v1520_v17, %v4404_v7  ;;  %v1523_v27 = vadd.f32 %v1522_v22, %v4406_v8  ;;  %v4129_v34 = vld [vmem:[%s5396_s5 + $0x10] sm:$0xff]  }
 0x11c   : > { %v1635_v41 = vmax.f32 %v1041_v33, 0.0  ;;  %3760 = vmatmul.mubr.msk.bf16.gmra.mrb[136].mxu0 %vm732_vm1, %v4113_v24  ;;  %v1826_v24 = vmax.f32 %v1519_v16, 0.0  ;;  %3894 = vmatprep.subr.bf16.mxu0 %v4129_v34 }
 0x11d   : > { %v1636_v45 = vmax.f32 %v1043_v37, 0.0  ;;  %1314 = vmatprep.mubr.bf16.mxu0 %v4146_v3  ;;  %v1827_v33 = vmax.f32 %v1521_v21, 0.0  ;;  %v1828_v39 = vmax.f32 %v1523_v27, 0.0  ;;  %3895 = vmatpush3.bf16.msra.mxu0 %v4129_v34 }
 0x11e   : > { %v1875_v49 = vpack.c.bf16 %v1635_v41, %v1633_v40 }
 0x11f   : > { %v1046_v52 = vpop.f32.mrb[32].mxu0  ;;  %v1876_v53 = vpack.c.bf16 %v1636_v45, %v1634_v44  ;;  %v4541_v42 = vpack.c.bf16 %v1827_v33, %v1825_v20  ;;  %v1526_v45 = vpop.f32.mrb[32].mxu1  ;;  %v4544_v46 = vpack.c.bf16 %v1828_v39, %v1826_v24 }
 0x120   : > { %v1047_v56 = vadd.f32 %v1046_v52, %v4404_v7  ;;  %v1048_v59 = vpop.f32.mrb[33].mxu0  ;;  %v1527_v48 = vadd.f32 %v1526_v45, %v4404_v7 }
 0x121   : > { %v1049_v1 = vadd.f32 %v1048_v59, %v4406_v8  ;;  %v1050_v2 = vpop.f32.mrb[34].mxu0  ;;  %2212 = vmatprep.mubr.bf16.mxu1 %v1876_v53 }
 0x122   : > { %v1051_v5 = vadd.f32 %v1050_v2, %v4404_v7  ;;  %v1052_v6 = vpop.f32.mrb[35].mxu0  ;;  %2213 = vmatmul.mubr.bf16.gmra.mrb[92].mxu1 %v1875_v49  ;;  %v1637_v14 = vmax.f32 %v1047_v56, 0.0  ;;  %v1528_v49 = vpop.f32.mrb[33].mxu1  ;;  %v1829_v59 = vmax.f32 %v1527_v48, 0.0 }
 0x123   : > { %v1053_v11 = vadd.f32 %v1052_v6, %v4406_v8  ;;  %v1638_v18 = vmax.f32 %v1049_v1, 0.0  ;;  %v1529_v52 = vadd.f32 %v1528_v49, %v4406_v8  ;;  %v1530_v53 = vpop.f32.mrb[34].mxu1 }
 0x124   : > { %v1639_v15 = vmax.f32 %v1051_v5, 0.0  ;;  %3761 = vmatmul.mubr.msk.bf16.gmra.mrb[140].mxu0 %vm732_vm1, %v4114_v62  ;;  %v1531_v62 = vadd.f32 %v1530_v53, %v4404_v7  ;;  %v1532_v63 = vpop.f32.mrb[35].mxu1  ;;  %v4130_v53 = vld [vmem:[%s5396_s5 + $0x18] sm:$0xff]  }
 0x125   : > { %v1640_v19 = vmax.f32 %v1053_v11, 0.0  ;;  %1324 = vmatprep.mubr.bf16.mxu0 %v4146_v3  ;;  %v1830_v2 = vmax.f32 %v1529_v52, 0.0  ;;  %v1533_v5 = vadd.f32 %v1532_v63, %v4406_v8  ;;  %3896 = vmatprep.subr.bf16.mxu0 %v4130_v53 }
 0x126   : > { %v1877_v23 = vpack.c.bf16 %v1639_v15, %v1637_v14  ;;  %v1831_v11 = vmax.f32 %v1531_v62, 0.0  ;;  %v4116_v14 = vld [vmem:[%s4205_s10 + $0x128] sm:$0xff]   ;;  %3897 = vmatpush3.bf16.msra.mxu0 %v4130_v53 }
 0x127   : > { %v1056_v28 = vpop.f32.mrb[36].mxu0  ;;  %v1878_v29 = vpack.c.bf16 %v1640_v19, %v1638_v18  ;;  %v1832_v15 = vmax.f32 %v1533_v5, 0.0  ;;  %v1536_v21 = vpop.f32.mrb[36].mxu1 }
 0x128   : > { %v1057_v35 = vadd.f32 %v1056_v28, %v4404_v7  ;;  %v1058_v37 = vpop.f32.mrb[37].mxu0  ;;  %v4556_v18 = vpack.c.bf16 %v1831_v11, %v1829_v59  ;;  %v1537_v24 = vadd.f32 %v1536_v21, %v4404_v7  ;;  %v1538_v27 = vpop.f32.mrb[37].mxu1 }
 0x129   : > { %v1059_v40 = vadd.f32 %v1058_v37, %v4406_v8  ;;  %v1060_v41 = vpop.f32.mrb[38].mxu0  ;;  %2220 = vmatprep.mubr.bf16.mxu1 %v1878_v29  ;;  %v4559_v22 = vpack.c.bf16 %v1832_v15, %v1830_v2  ;;  %v1539_v33 = vadd.f32 %v1538_v27, %v4406_v8  ;;  %v1540_v34 = vpop.f32.mrb[38].mxu1  ;;  %v4131_v15 = vld [vmem:[%s5396_s5 + $0x20] sm:$0xff]  }
 0x12a   : > { %v1061_v43 = vadd.f32 %v1060_v41, %v4404_v7  ;;  %v1062_v44 = vpop.f32.mrb[39].mxu0  ;;  %2221 = vmatmul.mubr.bf16.gmra.mrb[96].mxu1 %v1877_v23  ;;  %v1641_v50 = vmax.f32 %v1057_v35, 0.0  ;;  %v1541_v39 = vadd.f32 %v1540_v34, %v4404_v7  ;;  %3898 = vmatprep.subr.bf16.mxu0 %v4131_v15 }
 0x12b   : > { %v1063_v47 = vadd.f32 %v1062_v44, %v4406_v8  ;;  %v1642_v54 = vmax.f32 %v1059_v40, 0.0  ;;  %v1542_v40 = vpop.f32.mrb[39].mxu1  ;;  %3899 = vmatpush3.bf16.msra.mxu0 %v4131_v15 }
 0x12c   : > { %v1643_v51 = vmax.f32 %v1061_v43, 0.0  ;;  %3762 = vmatmul.mubr.msk.bf16.gmra.mrb[144].mxu0 %vm732_vm1, %v4115_v38  ;;  %v1833_v38 = vmax.f32 %v1537_v24, 0.0  ;;  %v1834_v43 = vmax.f32 %v1539_v33, 0.0  ;;  %v1543_v44 = vadd.f32 %v1542_v40, %v4406_v8 }
 0x12d   : > { %v1644_v56 = vmax.f32 %v1063_v47, 0.0  ;;  %1334 = vmatprep.mubr.bf16.mxu0 %v4146_v3  ;;  %v1835_v48 = vmax.f32 %v1541_v39, 0.0  ;;  %v4132_v39 = vld [vmem:[%s5396_s5 + $0x28] sm:$0xff]  }
 0x12e   : > { %v1879_v1 = vpack.c.bf16 %v1643_v51, %v1641_v50  ;;  %v4117_v51 = vld [vmem:[%s4205_s10 + $0x130] sm:$0xff]   ;;  %v1836_v52 = vmax.f32 %v1543_v44, 0.0  ;;  %3900 = vmatprep.subr.bf16.mxu0 %v4132_v39 }
 0x12f   : > { %v1066_v6 = vpop.f32.mrb[40].mxu0  ;;  %v1880_v9 = vpack.c.bf16 %v1644_v56, %v1642_v54  ;;  %v4574_v59 = vpack.c.bf16 %v1835_v48, %v1833_v38  ;;  %3901 = vmatpush3.bf16.msra.mxu0 %v4132_v39 }
 0x130   : > { %v1067_v12 = vadd.f32 %v1066_v6, %v4404_v7  ;;  %v1068_v13 = vpop.f32.mrb[41].mxu0  ;;  %v4577_v2 = vpack.c.bf16 %v1836_v52, %v1834_v43 }
 0x131   : > { %v1069_v16 = vadd.f32 %v1068_v13, %v4406_v8  ;;  %v1070_v17 = vpop.f32.mrb[42].mxu0  ;;  %2228 = vmatprep.mubr.bf16.mxu1 %v1880_v9 }
 0x132   : > { %v1071_v19 = vadd.f32 %v1070_v17, %v4404_v7  ;;  %v1072_v20 = vpop.f32.mrb[43].mxu0  ;;  %2229 = vmatmul.mubr.bf16.gmra.mrb[100].mxu1 %v1879_v1  ;;  %v1645_v28 = vmax.f32 %v1067_v12, 0.0  ;;  %v1546_v1 = vpop.f32.mrb[40].mxu1 }
 0x133   : > { %v1073_v23 = vadd.f32 %v1072_v20, %v4406_v8  ;;  %v1646_v35 = vmax.f32 %v1069_v16, 0.0  ;;  %v1547_v6 = vadd.f32 %v1546_v1, %v4404_v7  ;;  %v1548_v9 = vpop.f32.mrb[41].mxu1 }
 0x134   : > { %v1647_v29 = vmax.f32 %v1071_v19, 0.0  ;;  %3763 = vmatmul.mubr.msk.bf16.gmra.mrb[148].mxu0 %vm732_vm1, %v4116_v14  ;;  %v1549_v13 = vadd.f32 %v1548_v9, %v4406_v8  ;;  %v1550_v14 = vpop.f32.mrb[42].mxu1 }
 0x135   : > { %v1648_v37 = vmax.f32 %v1073_v23, 0.0  ;;  %1344 = vmatprep.mubr.bf16.mxu0 %v4146_v3  ;;  %v1837_v19 = vmax.f32 %v1547_v6, 0.0  ;;  %v1551_v20 = vadd.f32 %v1550_v14, %v4404_v7  ;;  %v1552_v21 = vpop.f32.mrb[43].mxu1 }
 0x136   : > { %v1881_v41 = vpack.c.bf16 %v1647_v29, %v1645_v28  ;;  %v1838_v24 = vmax.f32 %v1549_v13, 0.0  ;;  %v1553_v27 = vadd.f32 %v1552_v21, %v4406_v8 }
 0x137   : > { %v1076_v45 = vpop.f32.mrb[44].mxu0  ;;  %v1882_v47 = vpack.c.bf16 %v1648_v37, %v1646_v35  ;;  %v1839_v33 = vmax.f32 %v1551_v20, 0.0  ;;  %v4118_v37 = vld [vmem:[%s4205_s10 + $0x138] sm:$0xff]   ;;  %v4120_v20 = vld [vmem:[%s4205_s10 + $0x140] sm:$0xff]  }
 0x138   : > { %v1077_v49 = vadd.f32 %v1076_v45, %v4404_v7  ;;  %v1078_v50 = vpop.f32.mrb[45].mxu0  ;;  %v1840_v38 = vmax.f32 %v1553_v27, 0.0 }
 0x139   : > { %v1079_v54 = vadd.f32 %v1078_v50, %v4406_v8  ;;  %v1080_v56 = vpop.f32.mrb[46].mxu0  ;;  %2236 = vmatprep.mubr.bf16.mxu1 %v1882_v47  ;;  %v4595_v43 = vpack.c.bf16 %v1839_v33, %v1837_v19  ;;  %v1556_v47 = vpop.f32.mrb[44].mxu1 }
 0x13a   : > { %v1081_v62 = vadd.f32 %v1080_v56, %v4404_v7  ;;  %v1082_v63 = vpop.f32.mrb[47].mxu0  ;;  %2237 = vmatmul.mubr.bf16.gmra.mrb[104].mxu1 %v1881_v41  ;;  %v1649_v11 = vmax.f32 %v1077_v49, 0.0  ;;  %v4598_v48 = vpack.c.bf16 %v1840_v38, %v1838_v24  ;;  %v1557_v50 = vadd.f32 %v1556_v47, %v4404_v7 }
 0x13b   : > { %v1083_v5 = vadd.f32 %v1082_v63, %v4406_v8  ;;  %v1650_v16 = vmax.f32 %v1079_v54, 0.0 }
 0x13c   : > { %v1651_v12 = vmax.f32 %v1081_v62, 0.0  ;;  %3764 = vmatmul.mubr.msk.bf16.gmra.mrb[152].mxu0 %vm732_vm1, %v4117_v51  ;;  %v1558_v51 = vpop.f32.mrb[45].mxu1  ;;  %v4133_v62 = vld [vmem:[%s5396_s5 + $0x30] sm:$0xff]  }
 0x13d   : > { %v1652_v17 = vmax.f32 %v1083_v5, 0.0  ;;  %1354 = vmatprep.mubr.bf16.mxu0 %v4146_v3  ;;  %v1559_v54 = vadd.f32 %v1558_v51, %v4406_v8  ;;  %v1560_v56 = vpop.f32.mrb[46].mxu1  ;;  %v1841_v5 = vmax.f32 %v1557_v50, 0.0  ;;  %3902 = vmatprep.subr.bf16.mxu0 %v4133_v62 }
 0x13e   : > { %v1883_v23 = vpack.c.bf16 %v1651_v12, %v1649_v11  ;;  %v1561_v6 = vadd.f32 %v1560_v56, %v4404_v7  ;;  %v1562_v9 = vpop.f32.mrb[47].mxu1  ;;  %3903 = vmatpush3.bf16.msra.mxu0 %v4133_v62 }
 0x13f   : > { %v1086_v28 = vpop.f32.mrb[48].mxu0  ;;  %v1884_v29 = vpack.c.bf16 %v1652_v17, %v1650_v16  ;;  %v1842_v12 = vmax.f32 %v1559_v54, 0.0  ;;  %v1563_v13 = vadd.f32 %v1562_v9, %v4406_v8  ;;  %v4121_v9 = vld [vmem:[%s4205_s10 + $0x148] sm:$0xff]  }
 0x140   : > { %v1087_v34 = vadd.f32 %v1086_v28, %v4404_v7  ;;  %v1088_v35 = vpop.f32.mrb[49].mxu0  ;;  %v1843_v16 = vmax.f32 %v1561_v6, 0.0 }
 0x141   : > { %v1089_v40 = vadd.f32 %v1088_v35, %v4406_v8  ;;  %v1090_v41 = vpop.f32.mrb[50].mxu0  ;;  %2244 = vmatprep.mubr.bf16.mxu1 %v1884_v29  ;;  %v1844_v21 = vmax.f32 %v1563_v13, 0.0 }
 0x142   : > { %v1091_v44 = vadd.f32 %v1090_v41, %v4404_v7  ;;  %v1092_v45 = vpop.f32.mrb[51].mxu0  ;;  %2245 = vmatmul.mubr.bf16.gmra.mrb[108].mxu1 %v1883_v23  ;;  %v1653_v52 = vmax.f32 %v1087_v34, 0.0  ;;  %v4134_v23 = vld [vmem:[%s5396_s5 + $0x38] sm:$0xff]   ;;  %v4616_v28 = vpack.c.bf16 %v1843_v16, %v1841_v5  ;;  %v1566_v34 = vpop.f32.mrb[48].mxu1 }
 0x143   : > { %v1093_v49 = vadd.f32 %v1092_v45, %v4406_v8  ;;  %v1654_v63 = vmax.f32 %v1089_v40, 0.0  ;;  %3904 = vmatprep.subr.bf16.mxu0 %v4134_v23  ;;  %v4619_v35 = vpack.c.bf16 %v1844_v21, %v1842_v12  ;;  %v1567_v38 = vadd.f32 %v1566_v34, %v4404_v7  ;;  %v1568_v39 = vpop.f32.mrb[49].mxu1 }
 0x144   : > { %v1655_v53 = vmax.f32 %v1091_v44, 0.0  ;;  %3765 = vmatmul.mubr.msk.bf16.gmra.mrb[156].mxu0 %vm732_vm1, %v4118_v37  ;;  %v1569_v44 = vadd.f32 %v1568_v39, %v4406_v8  ;;  %v1570_v45 = vpop.f32.mrb[50].mxu1 }
 0x145   : > { %v1656_v1 = vmax.f32 %v1093_v49, 0.0  ;;  %1364 = vmatprep.mubr.bf16.mxu0 %v4146_v3  ;;  %3905 = vmatpush3.bf16.msra.mxu0 %v4134_v23  ;;  %v1845_v50 = vmax.f32 %v1567_v38, 0.0  ;;  %v1571_v51 = vadd.f32 %v1570_v45, %v4404_v7 }
 0x146   : > { %v1885_v11 = vpack.c.bf16 %v1655_v53, %v1653_v52  ;;  %v1572_v52 = vpop.f32.mrb[51].mxu1  ;;  %v1846_v54 = vmax.f32 %v1569_v44, 0.0 }
 0x147   : > { %v1096_v14 = vpop.f32.mrb[52].mxu0  ;;  %v1886_v15 = vpack.c.bf16 %v1656_v1, %v1654_v63  ;;  %v1573_v56 = vadd.f32 %v1572_v52, %v4406_v8  ;;  %v1847_v1 = vmax.f32 %v1571_v51, 0.0 }
 0x148   : > { %v1097_v17 = vadd.f32 %v1096_v14, %v4404_v7  ;;  %v1098_v19 = vpop.f32.mrb[53].mxu0 }
 0x149   : > { %v1099_v24 = vadd.f32 %v1098_v19, %v4406_v8  ;;  %v1100_v27 = vpop.f32.mrb[54].mxu0  ;;  %2252 = vmatprep.mubr.bf16.mxu1 %v1886_v15  ;;  %v4631_v14 = vpack.c.bf16 %v1847_v1, %v1845_v50 }
 0x14a   : > { %v1101_v29 = vadd.f32 %v1100_v27, %v4404_v7  ;;  %v1102_v33 = vpop.f32.mrb[55].mxu0  ;;  %2253 = vmatmul.mubr.bf16.gmra.mrb[112].mxu1 %v1885_v11  ;;  %v1657_v40 = vmax.f32 %v1097_v17, 0.0  ;;  %v1848_v11 = vmax.f32 %v1573_v56, 0.0  ;;  %v1576_v17 = vpop.f32.mrb[52].mxu1 }
 0x14b   : > { %v1103_v37 = vadd.f32 %v1102_v33, %v4406_v8  ;;  %v1658_v47 = vmax.f32 %v1099_v24, 0.0  ;;  %v1577_v21 = vadd.f32 %v1576_v17, %v4404_v7  ;;  %v1578_v23 = vpop.f32.mrb[53].mxu1 }
 0x14c   : > { %v1659_v41 = vmax.f32 %v1101_v29, 0.0  ;;  %3766 = vmatmul.mubr.msk.bf16.gmra.mrb[160].mxu0 %vm732_vm1, %v4120_v20  ;;  %v4634_v19 = vpack.c.bf16 %v1848_v11, %v1846_v54  ;;  %v1579_v29 = vadd.f32 %v1578_v23, %v4406_v8  ;;  %v1580_v33 = vpop.f32.mrb[54].mxu1 }
 0x14d   : > { %v1660_v49 = vmax.f32 %v1103_v37, 0.0  ;;  %1374 = vmatprep.mubr.bf16.mxu0 %v4146_v3  ;;  %v1849_v38 = vmax.f32 %v1577_v21, 0.0  ;;  %v1581_v39 = vadd.f32 %v1580_v33, %v4404_v7 }
 0x14e   : > { %v1887_v53 = vpack.c.bf16 %v1659_v41, %v1657_v40  ;;  %v1582_v40 = vpop.f32.mrb[55].mxu1  ;;  %v1850_v44 = vmax.f32 %v1579_v29, 0.0 }
 0x14f   : > { %v1106_v62 = vpop.f32.mrb[56].mxu0  ;;  %v1888_v63 = vpack.c.bf16 %v1660_v49, %v1658_v47  ;;  %v1583_v45 = vadd.f32 %v1582_v40, %v4406_v8  ;;  %v1851_v50 = vmax.f32 %v1581_v39, 0.0 }
 0x150   : > { %v1107_v5 = vadd.f32 %v1106_v62, %v4404_v7  ;;  %v1108_v6 = vpop.f32.mrb[57].mxu0 }
 0x151   : > { %v1109_v12 = vadd.f32 %v1108_v6, %v4406_v8  ;;  %v1110_v13 = vpop.f32.mrb[58].mxu0  ;;  %2260 = vmatprep.mubr.bf16.mxu1 %v1888_v63  ;;  %v1852_v54 = vmax.f32 %v1583_v45, 0.0  ;;  %v4646_v63 = vpack.c.bf16 %v1851_v50, %v1849_v38  ;;  %v1586_v6 = vpop.f32.mrb[56].mxu1  ;;  %v4123_v45 = vld [vmem:[%s4205_s10 + $0x158] sm:$0xff]  }
 0x152   : > { %v1111_v15 = vadd.f32 %v1110_v13, %v4404_v7  ;;  %v1112_v16 = vpop.f32.mrb[59].mxu0  ;;  %2261 = vmatmul.mubr.bf16.gmra.mrb[116].mxu1 %v1887_v53  ;;  %v1661_v24 = vmax.f32 %v1107_v5, 0.0  ;;  %v4122_v53 = vld [vmem:[%s4205_s10 + $0x150] sm:$0xff]   ;;  %v1588_v13 = vpop.f32.mrb[57].mxu1 }
 0x153   : > { %v1113_v20 = vadd.f32 %v1112_v16, %v4406_v8  ;;  %v1662_v34 = vmax.f32 %v1109_v12, 0.0  ;;  %v1587_v12 = vadd.f32 %v1586_v6, %v4404_v7  ;;  %v1589_v17 = vadd.f32 %v1588_v13, %v4406_v8 }
 0x154   : > { %v1663_v27 = vmax.f32 %v1111_v15, 0.0  ;;  %3767 = vmatmul.mubr.msk.bf16.gmra.mrb[164].mxu0 %vm732_vm1, %v4121_v9  ;;  %v4649_v9 = vpack.c.bf16 %v1852_v54, %v1850_v44 }
 0x155   : > { %v1664_v37 = vmax.f32 %v1113_v20, 0.0  ;;  %1384 = vmatprep.mubr.bf16.mxu0 %v4146_v3  ;;  %v1590_v20 = vpop.f32.mrb[58].mxu1 }
 0x156   : > { %v1889_v41 = vpack.c.bf16 %v1663_v27, %v1661_v24  ;;  %v1853_v24 = vmax.f32 %v1587_v12, 0.0  ;;  %v1591_v27 = vadd.f32 %v1590_v20, %v4404_v7  ;;  %v1592_v29 = vpop.f32.mrb[59].mxu1 }
 0x157   : > { %v1116_v47 = vpop.f32.mrb[60].mxu0  ;;  %v1890_v49 = vpack.c.bf16 %v1664_v37, %v1662_v34  ;;  %v1854_v34 = vmax.f32 %v1589_v17, 0.0  ;;  %v1593_v37 = vadd.f32 %v1592_v29, %v4406_v8  ;;  %v1596_v54 = vpop.f32.mrb[60].mxu1 }
 0x158   : > { %v1117_v51 = vadd.f32 %v1116_v47, %v4404_v7  ;;  %v1118_v52 = vpop.f32.mrb[61].mxu0  ;;  %v1855_v40 = vmax.f32 %v1591_v27, 0.0 }
 0x159   : > { %v1119_v56 = vadd.f32 %v1118_v52, %v4406_v8  ;;  %v1120_v62 = vpop.f32.mrb[62].mxu0  ;;  %2268 = vmatprep.mubr.bf16.mxu1 %v1890_v49  ;;  %v1856_v47 = vmax.f32 %v1593_v37, 0.0 }
 0x15a   : > { %v1121_v1 = vadd.f32 %v1120_v62, %v4404_v7  ;;  %v1122_v5 = vpop.f32.mrb[63].mxu0  ;;  %2269 = vmatmul.mubr.bf16.gmra.mrb[120].mxu1 %v1889_v41  ;;  %v1665_v15 = vmax.f32 %v1117_v51, 0.0  ;;  %v4661_v51 = vpack.c.bf16 %v1855_v40, %v1853_v24 }
 0x15b   : > { %v1123_v11 = vadd.f32 %v1122_v5, %v4406_v8  ;;  %v1666_v21 = vmax.f32 %v1119_v56, 0.0  ;;  %v4664_v56 = vpack.c.bf16 %v1856_v47, %v1854_v34  ;;  %v1598_v5 = vpop.f32.mrb[61].mxu1 }
 0x15c   : > { %v1667_v16 = vmax.f32 %v1121_v1, 0.0  ;;  %3768 = vmatmul.mubr.msk.bf16.gmra.mrb[168].mxu0 %vm732_vm1, %v4122_v53  ;;  %v1597_v1 = vadd.f32 %v1596_v54, %v4404_v7  ;;  %v1599_v12 = vadd.f32 %v1598_v5, %v4406_v8  ;;  %v1600_v13 = vpop.f32.mrb[62].mxu1 }
 0x15d   : > { %v1668_v23 = vmax.f32 %v1123_v11, 0.0  ;;  %1394 = vmatprep.mubr.bf16.mxu0 %v4146_v3  ;;  %v1601_v20 = vadd.f32 %v1600_v13, %v4404_v7 }
 0x15e   : > { %v1891_v33 = vpack.c.bf16 %v1667_v16, %v1665_v15  ;;  %v1857_v17 = vmax.f32 %v1597_v1, 0.0  ;;  %v1858_v24 = vmax.f32 %v1599_v12, 0.0 }
 0x15f   : > { %v1126_v38 = vpop.f32.mrb[64].mxu0  ;;  %v1892_v39 = vpack.c.bf16 %v1668_v23, %v1666_v21  ;;  %v1602_v21 = vpop.f32.mrb[63].mxu1  ;;  %v1859_v34 = vmax.f32 %v1601_v20, 0.0 }
 0x160   : > { %v1127_v41 = vadd.f32 %v1126_v38, %v4404_v7  ;;  %v1128_v44 = vpop.f32.mrb[65].mxu0  ;;  %v1603_v27 = vadd.f32 %v1602_v21, %v4406_v8 }
 0x161   : > { %v1129_v49 = vadd.f32 %v1128_v44, %v4406_v8  ;;  %v1130_v50 = vpop.f32.mrb[66].mxu0  ;;  %2276 = vmatprep.mubr.bf16.mxu1 %v1892_v39  ;;  %v4124_v39 = vld [vmem:[%s4205_s10 + $0x160] sm:$0xff]  }
 0x162   : > { %v1131_v52 = vadd.f32 %v1130_v50, %v4404_v7  ;;  %v1132_v53 = vpop.f32.mrb[67].mxu0  ;;  %2277 = vmatmul.mubr.bf16.gmra.mrb[124].mxu1 %v1891_v33  ;;  %v1669_v6 = vmax.f32 %v1127_v41, 0.0  ;;  %v1860_v40 = vmax.f32 %v1603_v27, 0.0 }
 0x163   : > { %v1133_v62 = vadd.f32 %v1132_v53, %v4406_v8  ;;  %v1670_v15 = vmax.f32 %v1129_v49, 0.0 }
 0x164   : > { %v1671_v11 = vmax.f32 %v1131_v52, 0.0  ;;  %3769 = vmatmul.mubr.msk.bf16.gmra.mrb[172].mxu0 %vm732_vm1, %v4123_v45  ;;  %v4676_v45 = vpack.c.bf16 %v1859_v34, %v1857_v17  ;;  %v4679_v50 = vpack.c.bf16 %v1860_v40, %v1858_v24 }
 0x165   : > { %v1672_v16 = vmax.f32 %v1133_v62, 0.0  ;;  %1404 = vmatprep.mubr.bf16.mxu0 %v4146_v3 }
 0x166   : > { %v1893_v23 = vpack.c.bf16 %v1671_v11, %v1669_v6 }
 0x167   : > { %v1894_v29 = vpack.c.bf16 %v1672_v16, %v1670_v15  ;;  %v1136_v33 = vpop.f32.mrb[68].mxu0  ;;  %v4125_v15 = vld [vmem:[%s4205_s10 + $0x168] sm:$0xff]  }
 0x168   : > { %v1137_v37 = vadd.f32 %v1136_v33, %v4404_v7  ;;  %v1138_v38 = vpop.f32.mrb[69].mxu0 }
 0x169   : > { %v1139_v41 = vadd.f32 %v1138_v38, %v4406_v8  ;;  %v1140_v44 = vpop.f32.mrb[70].mxu0  ;;  %2284 = vmatprep.mubr.bf16.mxu1 %v1894_v29 }
 0x16a   : > { %v1141_v47 = vadd.f32 %v1140_v44, %v4404_v7  ;;  %v1142_v49 = vpop.f32.mrb[71].mxu0  ;;  %2285 = vmatmul.mubr.bf16.gmra.mrb[128].mxu1 %v1893_v23  ;;  %v1673_v53 = vmax.f32 %v1137_v37, 0.0 }
 0x16b   : > { %v1143_v52 = vadd.f32 %v1142_v49, %v4406_v8  ;;  %v1674_v62 = vmax.f32 %v1139_v41, 0.0  ;;  %v4127_v41 = vld [vmem:[%s4205_s10 + $0x170] sm:$0xff]  }
 0x16c   : > { %v1675_v54 = vmax.f32 %v1141_v47, 0.0  ;;  %3770 = vmatmul.mubr.msk.bf16.gmra.mrb[176].mxu0 %vm732_vm1, %v4124_v39 }
 0x16d   : > { %v1676_v1 = vmax.f32 %v1143_v52, 0.0  ;;  %1414 = vmatprep.mubr.bf16.mxu0 %v4146_v3 }
 0x16e   : > { %v1895_v5 = vpack.c.bf16 %v1675_v54, %v1673_v53 }
 0x16f   : > { %v1896_v6 = vpack.c.bf16 %v1676_v1, %v1674_v62  ;;  %v1146_v11 = vpop.f32.mrb[72].mxu0 }
 0x170   : > { %v1147_v12 = vadd.f32 %v1146_v11, %v4404_v7  ;;  %v1148_v13 = vpop.f32.mrb[73].mxu0 }
 0x171   : > { %v1149_v16 = vadd.f32 %v1148_v13, %v4406_v8  ;;  %v1150_v17 = vpop.f32.mrb[74].mxu0  ;;  %2292 = vmatprep.mubr.bf16.mxu1 %v1896_v6 }
 0x172   : > { %v1151_v20 = vadd.f32 %v1150_v17, %v4404_v7  ;;  %v1152_v21 = vpop.f32.mrb[75].mxu0  ;;  %2293 = vmatmul.mubr.bf16.gmra.mrb[132].mxu1 %v1895_v5  ;;  %v1677_v24 = vmax.f32 %v1147_v12, 0.0 }
 0x173   : > { %v1153_v23 = vadd.f32 %v1152_v21, %v4406_v8  ;;  %v1678_v29 = vmax.f32 %v1149_v16, 0.0  ;;  %v4128_v16 = vld [vmem:[%s4205_s10 + $0x178] sm:$0xff]  }
 0x174   : > { %v1679_v27 = vmax.f32 %v1151_v20, 0.0  ;;  %3771 = vmatmul.mubr.msk.bf16.gmra.mrb[180].mxu0 %vm732_vm1, %v4125_v15 }
 0x175   : > { %v1680_v33 = vmax.f32 %v1153_v23, 0.0  ;;  %1424 = vmatprep.mubr.bf16.mxu0 %v4146_v3 }
 0x176   : > { %v1897_v34 = vpack.c.bf16 %v1679_v27, %v1677_v24 }
 0x177   : > { %v1898_v37 = vpack.c.bf16 %v1680_v33, %v1678_v29  ;;  %v1156_v38 = vpop.f32.mrb[76].mxu0 }
 0x178   : > { %v1157_v39 = vadd.f32 %v1156_v38, %v4404_v7  ;;  %v1158_v40 = vpop.f32.mrb[77].mxu0 }
 0x179   : > { %v1159_v44 = vadd.f32 %v1158_v40, %v4406_v8  ;;  %v1160_v47 = vpop.f32.mrb[78].mxu0  ;;  %2300 = vmatprep.mubr.bf16.mxu1 %v1898_v37 }
 0x17a   : > { %v1161_v49 = vadd.f32 %v1160_v47, %v4404_v7  ;;  %v1162_v52 = vpop.f32.mrb[79].mxu0  ;;  %2301 = vmatmul.mubr.bf16.gmra.mrb[136].mxu1 %v1897_v34  ;;  %v1681_v54 = vmax.f32 %v1157_v39, 0.0 }
 0x17b   : > { %v1163_v53 = vadd.f32 %v1162_v52, %v4406_v8  ;;  %v1682_v1 = vmax.f32 %v1159_v44, 0.0 }
 0x17c   : > { %v1683_v62 = vmax.f32 %v1161_v49, 0.0  ;;  %3772 = vmatmul.mubr.msk.bf16.gmra.mrb[184].mxu0 %vm732_vm1, %v4127_v41 }
 0x17d   : > { %v1684_v5 = vmax.f32 %v1163_v53, 0.0  ;;  %1434 = vmatprep.mubr.bf16.mxu0 %v4146_v3 }
 0x17e   : > { %v1899_v6 = vpack.c.bf16 %v1683_v62, %v1681_v54 }
 0x17f   : > { %v1900_v11 = vpack.c.bf16 %v1684_v5, %v1682_v1  ;;  %v1166_v12 = vpop.f32.mrb[80].mxu0 }
 0x180   : > { %v1167_v13 = vadd.f32 %v1166_v12, %v4404_v7  ;;  %v1168_v15 = vpop.f32.mrb[81].mxu0 }
 0x181   : > { %v1169_v17 = vadd.f32 %v1168_v15, %v4406_v8  ;;  %v1170_v20 = vpop.f32.mrb[82].mxu0  ;;  %2308 = vmatprep.mubr.bf16.mxu1 %v1900_v11 }
 0x182   : > { %v1171_v21 = vadd.f32 %v1170_v20, %v4404_v7  ;;  %v1172_v23 = vpop.f32.mrb[83].mxu0  ;;  %2309 = vmatmul.mubr.bf16.gmra.mrb[140].mxu1 %v1899_v6  ;;  %v1685_v27 = vmax.f32 %v1167_v13, 0.0 }
 0x183   : > { %v1173_v24 = vadd.f32 %v1172_v23, %v4406_v8  ;;  %v1686_v3 = vmax.f32 %v1169_v17, 0.0 }
 0x184   : > { %v1687_v29 = vmax.f32 %v1171_v21, 0.0  ;;  %3773 = vmatmul.mubr.msk.bf16.gmra.mrb[188].mxu0 %vm732_vm1, %v4128_v16 }
 0x185   : > { %v1688_v33 = vmax.f32 %v1173_v24, 0.0 }
 0x186   : > { %v1901_v34 = vpack.c.bf16 %v1687_v29, %v1685_v27 }
 0x187   : > { %v1902_v37 = vpack.c.bf16 %v1688_v33, %v1686_v3  ;;  %v1176_v38 = vpop.f32.mrb[84].mxu0 }
 0x188   : > { %v1177_v39 = vadd.f32 %v1176_v38, %v4404_v7  ;;  %v1178_v40 = vpop.f32.mrb[85].mxu0 }
 0x189   : > { %v1179_v41 = vadd.f32 %v1178_v40, %v4406_v8  ;;  %v1180_v44 = vpop.f32.mrb[86].mxu0  ;;  %2316 = vmatprep.mubr.bf16.mxu1 %v1902_v37 }
 0x18a   : > { %v1181_v47 = vadd.f32 %v1180_v44, %v4404_v7  ;;  %v1182_v49 = vpop.f32.mrb[87].mxu0  ;;  %2317 = vmatmul.mubr.bf16.gmra.mrb[144].mxu1 %v1901_v34  ;;  %v1689_v53 = vmax.f32 %v1177_v39, 0.0 }
 0x18b   : > { %v1183_v52 = vadd.f32 %v1182_v49, %v4406_v8  ;;  %v1690_v62 = vmax.f32 %v1179_v41, 0.0 }
 0x18c   : > { %v1691_v54 = vmax.f32 %v1181_v47, 0.0 }
 0x18d   : > { %v1692_v1 = vmax.f32 %v1183_v52, 0.0 }
 0x18e   : > { %v1903_v5 = vpack.c.bf16 %v1691_v54, %v1689_v53 }
 0x18f   : > { %v1904_v6 = vpack.c.bf16 %v1692_v1, %v1690_v62  ;;  %v1186_v11 = vpop.f32.mrb[88].mxu0 }
 0x190   : > { %v1187_v12 = vadd.f32 %v1186_v11, %v4404_v7  ;;  %v1188_v13 = vpop.f32.mrb[89].mxu0 }
 0x191   : > { %v1189_v15 = vadd.f32 %v1188_v13, %v4406_v8  ;;  %v1190_v16 = vpop.f32.mrb[90].mxu0  ;;  %2324 = vmatprep.mubr.bf16.mxu1 %v1904_v6 }
 0x192   : > { %v1191_v17 = vadd.f32 %v1190_v16, %v4404_v7  ;;  %v1192_v20 = vpop.f32.mrb[91].mxu0  ;;  %2325 = vmatmul.mubr.bf16.gmra.mrb[148].mxu1 %v1903_v5  ;;  %v1693_v23 = vmax.f32 %v1187_v12, 0.0 }
 0x193   : > { %v1193_v21 = vadd.f32 %v1192_v20, %v4406_v8  ;;  %v1694_v27 = vmax.f32 %v1189_v15, 0.0 }
 0x194   : > { %v1695_v24 = vmax.f32 %v1191_v17, 0.0 }
 0x195   : > { %v1696_v29 = vmax.f32 %v1193_v21, 0.0 }
 0x196   : > { %v1905_v3 = vpack.c.bf16 %v1695_v24, %v1693_v23 }
 0x197   : > { %v1906_v33 = vpack.c.bf16 %v1696_v29, %v1694_v27  ;;  %v1196_v34 = vpop.f32.mrb[92].mxu0 }
 0x198   : > { %v1197_v37 = vadd.f32 %v1196_v34, %v4404_v7  ;;  %v1198_v38 = vpop.f32.mrb[93].mxu0 }
 0x199   : > { %v1199_v39 = vadd.f32 %v1198_v38, %v4406_v8  ;;  %v1200_v40 = vpop.f32.mrb[94].mxu0  ;;  %2332 = vmatprep.mubr.bf16.mxu1 %v1906_v33 }
 0x19a   : > { %v1201_v41 = vadd.f32 %v1200_v40, %v4404_v7  ;;  %v1202_v44 = vpop.f32.mrb[95].mxu0  ;;  %2333 = vmatmul.mubr.bf16.gmra.mrb[152].mxu1 %v1905_v3  ;;  %v1697_v49 = vmax.f32 %v1197_v37, 0.0 }
 0x19b   : > { %v1203_v47 = vadd.f32 %v1202_v44, %v4406_v8  ;;  %v1698_v53 = vmax.f32 %v1199_v39, 0.0 }
 0x19c   : > { %v1699_v52 = vmax.f32 %v1201_v41, 0.0 }
 0x19d   : > { %v1700_v54 = vmax.f32 %v1203_v47, 0.0 }
 0x19e   : > { %v1907_v62 = vpack.c.bf16 %v1699_v52, %v1697_v49 }
 0x19f   : > { %v1908_v1 = vpack.c.bf16 %v1700_v54, %v1698_v53  ;;  %v1206_v5 = vpop.f32.mrb[96].mxu0 }
 0x1a0   : > { %v1207_v6 = vadd.f32 %v1206_v5, %v4404_v7  ;;  %v1208_v11 = vpop.f32.mrb[97].mxu0 }
 0x1a1   : > { %v1209_v12 = vadd.f32 %v1208_v11, %v4406_v8  ;;  %v1210_v13 = vpop.f32.mrb[98].mxu0  ;;  %2340 = vmatprep.mubr.bf16.mxu1 %v1908_v1 }
 0x1a2   : > { %v1211_v15 = vadd.f32 %v1210_v13, %v4404_v7  ;;  %v1212_v16 = vpop.f32.mrb[99].mxu0  ;;  %2341 = vmatmul.mubr.bf16.gmra.mrb[156].mxu1 %v1907_v62  ;;  %v1701_v20 = vmax.f32 %v1207_v6, 0.0 }
 0x1a3   : > { %v1213_v17 = vadd.f32 %v1212_v16, %v4406_v8  ;;  %v1702_v23 = vmax.f32 %v1209_v12, 0.0 }
 0x1a4   : > { %v1703_v21 = vmax.f32 %v1211_v15, 0.0 }
 0x1a5   : > { %v1704_v24 = vmax.f32 %v1213_v17, 0.0 }
 0x1a6   : > { %v1909_v27 = vpack.c.bf16 %v1703_v21, %v1701_v20 }
 0x1a7   : > { %v1910_v29 = vpack.c.bf16 %v1704_v24, %v1702_v23  ;;  %v1216_v3 = vpop.f32.mrb[100].mxu0 }
 0x1a8   : > { %v1217_v33 = vadd.f32 %v1216_v3, %v4404_v7  ;;  %v1218_v34 = vpop.f32.mrb[101].mxu0 }
 0x1a9   : > { %v1219_v37 = vadd.f32 %v1218_v34, %v4406_v8  ;;  %v1220_v38 = vpop.f32.mrb[102].mxu0  ;;  %2348 = vmatprep.mubr.bf16.mxu1 %v1910_v29 }
 0x1aa   : > { %v1221_v39 = vadd.f32 %v1220_v38, %v4404_v7  ;;  %v1222_v40 = vpop.f32.mrb[103].mxu0  ;;  %2349 = vmatmul.mubr.bf16.gmra.mrb[160].mxu1 %v1909_v27  ;;  %v1705_v44 = vmax.f32 %v1217_v33, 0.0 }
 0x1ab   : > { %v1223_v41 = vadd.f32 %v1222_v40, %v4406_v8  ;;  %v1706_v49 = vmax.f32 %v1219_v37, 0.0  ;;  %v4735_v40 = vld [vmem:[%s5395_s4] ss:$0 sm:$0xff] }
 0x1ac   : > { %v1707_v47 = vmax.f32 %v1221_v39, 0.0 }
 0x1ad   : > { %v1708_v52 = vmax.f32 %v1223_v41, 0.0 }
 0x1ae   : > { %v1911_v53 = vpack.c.bf16 %v1707_v47, %v1705_v44 }
 0x1af   : > { %v1912_v54 = vpack.c.bf16 %v1708_v52, %v1706_v49  ;;  %v1226_v62 = vpop.f32.mrb[104].mxu0 }
 0x1b0   : > { %v1227_v1 = vadd.f32 %v1226_v62, %v4404_v7  ;;  %v1228_v5 = vpop.f32.mrb[105].mxu0 }
 0x1b1   : > { %v1229_v6 = vadd.f32 %v1228_v5, %v4406_v8  ;;  %v1230_v11 = vpop.f32.mrb[106].mxu0  ;;  %2356 = vmatprep.mubr.bf16.mxu1 %v1912_v54 }
 0x1b2   : > { %v1231_v12 = vadd.f32 %v1230_v11, %v4404_v7  ;;  %v1232_v13 = vpop.f32.mrb[107].mxu0  ;;  %2357 = vmatmul.mubr.bf16.gmra.mrb[164].mxu1 %v1911_v53  ;;  %v1709_v16 = vmax.f32 %v1227_v1, 0.0 }
 0x1b3   : > { %v1233_v15 = vadd.f32 %v1232_v13, %v4406_v8  ;;  %v1710_v20 = vmax.f32 %v1229_v6, 0.0 }
 0x1b4   : > { %v1711_v17 = vmax.f32 %v1231_v12, 0.0 }
 0x1b5   : > { %v1712_v21 = vmax.f32 %v1233_v15, 0.0 }
 0x1b6   : > { %v1913_v23 = vpack.c.bf16 %v1711_v17, %v1709_v16 }
 0x1b7   : > { %v1914_v24 = vpack.c.bf16 %v1712_v21, %v1710_v20  ;;  %v1236_v27 = vpop.f32.mrb[108].mxu0 }
 0x1b8   : > { %v1237_v29 = vadd.f32 %v1236_v27, %v4404_v7  ;;  %v1238_v3 = vpop.f32.mrb[109].mxu0 }
 0x1b9   : > { %v1239_v33 = vadd.f32 %v1238_v3, %v4406_v8  ;;  %v1240_v34 = vpop.f32.mrb[110].mxu0  ;;  %2364 = vmatprep.mubr.bf16.mxu1 %v1914_v24 }
 0x1ba   : > { %v1241_v37 = vadd.f32 %v1240_v34, %v4404_v7  ;;  %v1242_v38 = vpop.f32.mrb[111].mxu0  ;;  %2365 = vmatmul.mubr.bf16.gmra.mrb[168].mxu1 %v1913_v23  ;;  %v1713_v41 = vmax.f32 %v1237_v29, 0.0 }
 0x1bb   : > { %v1243_v39 = vadd.f32 %v1242_v38, %v4406_v8  ;;  %v1714_v47 = vmax.f32 %v1239_v33, 0.0 }
 0x1bc   : > { %v1715_v44 = vmax.f32 %v1241_v37, 0.0 }
 0x1bd   : > { %v1716_v49 = vmax.f32 %v1243_v39, 0.0  ;;  %v2158_v52 = vpop.f32.mrb[64].mxu1 }
 0x1be   : > { %v1915_v53 = vpack.c.bf16 %v1715_v44, %v1713_v41  ;;  %v2159_v54 = vadd.f32 %v4735_v40, %v2158_v52  ;;  %v2160_v62 = vpop.f32.mrb[65].mxu1 }
 0x1bf   : > { %v1916_v1 = vpack.c.bf16 %v1716_v49, %v1714_v47  ;;  %v1246_v5 = vpop.f32.mrb[112].mxu0  ;;  %v2161_v6 = vpop.f32.mrb[66].mxu1 }
 0x1c0   : > { %v1247_v11 = vadd.f32 %v1246_v5, %v4404_v7  ;;  %v2162_v12 = vadd.f32 %v4735_v40, %v2161_v6  ;;  %v1248_v13 = vpop.f32.mrb[113].mxu0  ;;  %v2163_v15 = vpop.f32.mrb[67].mxu1  ;;  %v2669_v20 = vmax.f32 %v2159_v54, 0.0 }
 0x1c1   : > { %v1249_v16 = vadd.f32 %v1248_v13, %v4406_v8  ;;  %v1250_v17 = vpop.f32.mrb[114].mxu0  ;;  %2372 = vmatprep.mubr.bf16.mxu1 %v1916_v1 }
 0x1c2   : > { %v2670_v21 = vmax.f32 %v2162_v12, 0.0  ;;  %v1251_v23 = vadd.f32 %v1250_v17, %v4404_v7  ;;  %v1252_v24 = vpop.f32.mrb[115].mxu0  ;;  %2373 = vmatmul.mubr.bf16.gmra.mrb[172].mxu1 %v1915_v53  ;;  %v1717_v29 = vmax.f32 %v1247_v11, 0.0 }
 0x1c3   : > { %v1253_v27 = vadd.f32 %v1252_v24, %v4406_v8  ;;  %v1718_v34 = vmax.f32 %v1249_v16, 0.0 }
 0x1c4   : > { %v2797_v3 = vpack.c.bf16 %v2670_v21, %v2669_v20  ;;  %v1719_v33 = vmax.f32 %v1251_v23, 0.0 }
 0x1c5   : > { %v1720_v37 = vmax.f32 %v1253_v27, 0.0  ;;  %v2166_v38 = vpop.f32.mrb[68].mxu1 }
 0x1c6   : > { %v1917_v39 = vpack.c.bf16 %v1719_v33, %v1717_v29  ;;  %v2167_v41 = vadd.f32 %v4735_v40, %v2166_v38  ;;  %v2168_v44 = vpop.f32.mrb[69].mxu1  ;;  %3906 = vmatprep.mubr.bf16.mxu0 %v2797_v3 }
 0x1c7   : > { %v1918_v47 = vpack.c.bf16 %v1720_v37, %v1718_v34  ;;  %v1256_v49 = vpop.f32.mrb[116].mxu0  ;;  %v2169_v52 = vpop.f32.mrb[70].mxu1 }
 0x1c8   : > { %v1257_v54 = vadd.f32 %v1256_v49, %v4404_v7  ;;  %v2170_v53 = vadd.f32 %v4735_v40, %v2169_v52  ;;  %v1258_v62 = vpop.f32.mrb[117].mxu0  ;;  %v2171_v1 = vpop.f32.mrb[71].mxu1  ;;  %v2671_v11 = vmax.f32 %v2167_v41, 0.0 }
 0x1c9   : > { %v1259_v5 = vadd.f32 %v1258_v62, %v4406_v8  ;;  %v1260_v6 = vpop.f32.mrb[118].mxu0  ;;  %2380 = vmatprep.mubr.bf16.mxu1 %v1918_v47 }
 0x1ca   : > { %v2672_v12 = vmax.f32 %v2170_v53, 0.0  ;;  %v1261_v13 = vadd.f32 %v1260_v6, %v4404_v7  ;;  %v1262_v15 = vpop.f32.mrb[119].mxu0  ;;  %2381 = vmatmul.mubr.bf16.gmra.mrb[176].mxu1 %v1917_v39  ;;  %v1721_v17 = vmax.f32 %v1257_v54, 0.0 }
 0x1cb   : > { %v1263_v16 = vadd.f32 %v1262_v15, %v4406_v8  ;;  %v1722_v23 = vmax.f32 %v1259_v5, 0.0 }
 0x1cc   : > { %v2798_v20 = vpack.c.bf16 %v2672_v12, %v2671_v11  ;;  %v1723_v21 = vmax.f32 %v1261_v13, 0.0 }
 0x1cd   : > { %v1724_v24 = vmax.f32 %v1263_v16, 0.0  ;;  %v2174_v27 = vpop.f32.mrb[72].mxu1 }
 0x1ce   : > { %v1919_v29 = vpack.c.bf16 %v1723_v21, %v1721_v17  ;;  %v2175_v3 = vadd.f32 %v4735_v40, %v2174_v27  ;;  %v2176_v33 = vpop.f32.mrb[73].mxu1  ;;  %3907 = vmatmul.mubr.bf16.vlgmr.msra.gmra.mrb[192].mxu0 %v2798_v20 }
 0x1cf   : > { %v1920_v34 = vpack.c.bf16 %v1724_v24, %v1722_v23  ;;  %v1266_v37 = vpop.f32.mrb[120].mxu0  ;;  %v2177_v38 = vpop.f32.mrb[74].mxu1 }
 0x1d0   : > { %v1267_v41 = vadd.f32 %v1266_v37, %v4404_v7  ;;  %v2178_v39 = vadd.f32 %v4735_v40, %v2177_v38  ;;  %v1268_v44 = vpop.f32.mrb[121].mxu0  ;;  %v2179_v47 = vpop.f32.mrb[75].mxu1  ;;  %v2673_v54 = vmax.f32 %v2175_v3, 0.0 }
 0x1d1   : > { %v1269_v49 = vadd.f32 %v1268_v44, %v4406_v8  ;;  %v1270_v52 = vpop.f32.mrb[122].mxu0  ;;  %2388 = vmatprep.mubr.bf16.mxu1 %v1920_v34 }
 0x1d2   : > { %v2674_v53 = vmax.f32 %v2178_v39, 0.0  ;;  %v1271_v62 = vadd.f32 %v1270_v52, %v4404_v7  ;;  %v1272_v1 = vpop.f32.mrb[123].mxu0  ;;  %2389 = vmatmul.mubr.bf16.gmra.mrb[180].mxu1 %v1919_v29  ;;  %v1725_v6 = vmax.f32 %v1267_v41, 0.0 }
 0x1d3   : > { %v1273_v5 = vadd.f32 %v1272_v1, %v4406_v8  ;;  %v1726_v13 = vmax.f32 %v1269_v49, 0.0 }
 0x1d4   : > { %v2799_v11 = vpack.c.bf16 %v2674_v53, %v2673_v54  ;;  %v1727_v12 = vmax.f32 %v1271_v62, 0.0 }
 0x1d5   : > { %v1728_v15 = vmax.f32 %v1273_v5, 0.0  ;;  %v2182_v16 = vpop.f32.mrb[76].mxu1 }
 0x1d6   : > { %v1921_v17 = vpack.c.bf16 %v1727_v12, %v1725_v6  ;;  %v2183_v20 = vadd.f32 %v4735_v40, %v2182_v16  ;;  %v2184_v21 = vpop.f32.mrb[77].mxu1  ;;  %3910 = vmatprep.mubr.bf16.mxu0 %v2799_v11 }
 0x1d7   : > { %v1922_v23 = vpack.c.bf16 %v1728_v15, %v1726_v13  ;;  %v1276_v24 = vpop.f32.mrb[124].mxu0  ;;  %v2185_v27 = vpop.f32.mrb[78].mxu1 }
 0x1d8   : > { %v1277_v3 = vadd.f32 %v1276_v24, %v4404_v7  ;;  %v2186_v29 = vadd.f32 %v4735_v40, %v2185_v27  ;;  %v1278_v33 = vpop.f32.mrb[125].mxu0  ;;  %v2187_v34 = vpop.f32.mrb[79].mxu1  ;;  %v2675_v41 = vmax.f32 %v2183_v20, 0.0 }
 0x1d9   : > { %v1279_v37 = vadd.f32 %v1278_v33, %v4406_v8  ;;  %v1280_v38 = vpop.f32.mrb[126].mxu0  ;;  %2396 = vmatprep.mubr.bf16.mxu1 %v1922_v23 }
 0x1da   : > { %v2676_v39 = vmax.f32 %v2186_v29, 0.0  ;;  %v1281_v44 = vadd.f32 %v1280_v38, %v4404_v7  ;;  %v1282_v47 = vpop.f32.mrb[127].mxu0  ;;  %2397 = vmatmul.mubr.bf16.gmra.mrb[184].mxu1 %v1921_v17  ;;  %v1729_v52 = vmax.f32 %v1277_v3, 0.0 }
 0x1db   : > { %v1283_v49 = vadd.f32 %v1282_v47, %v4406_v8  ;;  %v1730_v62 = vmax.f32 %v1279_v37, 0.0 }
 0x1dc   : > { %v2800_v54 = vpack.c.bf16 %v2676_v39, %v2675_v41  ;;  %v1731_v53 = vmax.f32 %v1281_v44, 0.0 }
 0x1dd   : > { %v1732_v1 = vmax.f32 %v1283_v49, 0.0  ;;  %v2190_v5 = vpop.f32.mrb[80].mxu1 }
 0x1de   : > { %v1923_v6 = vpack.c.bf16 %v1731_v53, %v1729_v52  ;;  %v2191_v11 = vadd.f32 %v4735_v40, %v2190_v5  ;;  %v2192_v12 = vpop.f32.mrb[81].mxu1  ;;  %3911 = vmatmul.mubr.bf16.gmra.mrb[196].mxu0 %v2800_v54 }
 0x1df   : > { %v1924_v13 = vpack.c.bf16 %v1732_v1, %v1730_v62  ;;  %v1286_v15 = vpop.f32.mrb[128].mxu0  ;;  %v2193_v16 = vpop.f32.mrb[82].mxu1 }
 0x1e0   : > { %v1287_v20 = vadd.f32 %v1286_v15, %v4404_v7  ;;  %v2194_v17 = vadd.f32 %v4735_v40, %v2193_v16  ;;  %v1288_v21 = vpop.f32.mrb[129].mxu0  ;;  %v2195_v23 = vpop.f32.mrb[83].mxu1  ;;  %v2677_v3 = vmax.f32 %v2191_v11, 0.0 }
 0x1e1   : > { %v1289_v24 = vadd.f32 %v1288_v21, %v4406_v8  ;;  %v1290_v27 = vpop.f32.mrb[130].mxu0  ;;  %2404 = vmatprep.mubr.bf16.mxu1 %v1924_v13 }
 0x1e2   : > { %v2678_v29 = vmax.f32 %v2194_v17, 0.0  ;;  %v1291_v33 = vadd.f32 %v1290_v27, %v4404_v7  ;;  %v1292_v34 = vpop.f32.mrb[131].mxu0  ;;  %2405 = vmatmul.mubr.bf16.gmra.mrb[188].mxu1 %v1923_v6  ;;  %v1733_v38 = vmax.f32 %v1287_v20, 0.0 }
 0x1e3   : > { %v1293_v37 = vadd.f32 %v1292_v34, %v4406_v8  ;;  %v1734_v44 = vmax.f32 %v1289_v24, 0.0 }
 0x1e4   : > { %v2801_v41 = vpack.c.bf16 %v2678_v29, %v2677_v3  ;;  %v1735_v39 = vmax.f32 %v1291_v33, 0.0 }
 0x1e5   : > { %v1736_v47 = vmax.f32 %v1293_v37, 0.0  ;;  %v2198_v49 = vpop.f32.mrb[84].mxu1 }
 0x1e6   : > { %v1925_v52 = vpack.c.bf16 %v1735_v39, %v1733_v38  ;;  %v2199_v54 = vadd.f32 %v4735_v40, %v2198_v49  ;;  %v2200_v53 = vpop.f32.mrb[85].mxu1  ;;  %3914 = vmatprep.mubr.bf16.mxu0 %v2801_v41 }
 0x1e7   : > { %v1926_v62 = vpack.c.bf16 %v1736_v47, %v1734_v44  ;;  %v1296_v1 = vpop.f32.mrb[132].mxu0  ;;  %v2201_v5 = vpop.f32.mrb[86].mxu1 }
 0x1e8   : > { %v1297_v11 = vadd.f32 %v1296_v1, %v4404_v7  ;;  %v2202_v6 = vadd.f32 %v4735_v40, %v2201_v5  ;;  %v1298_v12 = vpop.f32.mrb[133].mxu0  ;;  %v2203_v13 = vpop.f32.mrb[87].mxu1  ;;  %v2679_v20 = vmax.f32 %v2199_v54, 0.0 }
 0x1e9   : > { %v1299_v15 = vadd.f32 %v1298_v12, %v4406_v8  ;;  %v1300_v16 = vpop.f32.mrb[134].mxu0  ;;  %2412 = vmatprep.mubr.bf16.mxu1 %v1926_v62 }
 0x1ea   : > { %v2680_v17 = vmax.f32 %v2202_v6, 0.0  ;;  %v1301_v21 = vadd.f32 %v1300_v16, %v4404_v7  ;;  %v1302_v23 = vpop.f32.mrb[135].mxu0  ;;  %2413 = vmatmul.mubr.bf16.gmra.mrb[192].mxu1 %v1925_v52  ;;  %v1737_v27 = vmax.f32 %v1297_v11, 0.0 }
 0x1eb   : > { %v1303_v24 = vadd.f32 %v1302_v23, %v4406_v8  ;;  %v1738_v33 = vmax.f32 %v1299_v15, 0.0 }
 0x1ec   : > { %v2802_v3 = vpack.c.bf16 %v2680_v17, %v2679_v20  ;;  %v1739_v29 = vmax.f32 %v1301_v21, 0.0 }
 0x1ed   : > { %v1740_v34 = vmax.f32 %v1303_v24, 0.0  ;;  %v2206_v37 = vpop.f32.mrb[88].mxu1 }
 0x1ee   : > { %v1927_v38 = vpack.c.bf16 %v1739_v29, %v1737_v27  ;;  %v2207_v41 = vadd.f32 %v4735_v40, %v2206_v37  ;;  %v2208_v39 = vpop.f32.mrb[89].mxu1  ;;  %3915 = vmatmul.mubr.bf16.gmra.mrb[200].mxu0 %v2802_v3 }
 0x1ef   : > { %v1928_v44 = vpack.c.bf16 %v1740_v34, %v1738_v33  ;;  %v1306_v47 = vpop.f32.mrb[136].mxu0  ;;  %v2209_v49 = vpop.f32.mrb[90].mxu1 }
 0x1f0   : > { %v1307_v54 = vadd.f32 %v1306_v47, %v4404_v7  ;;  %v2210_v52 = vadd.f32 %v4735_v40, %v2209_v49  ;;  %v1308_v53 = vpop.f32.mrb[137].mxu0  ;;  %v2211_v62 = vpop.f32.mrb[91].mxu1  ;;  %v2681_v11 = vmax.f32 %v2207_v41, 0.0 }
 0x1f1   : > { %v1309_v1 = vadd.f32 %v1308_v53, %v4406_v8  ;;  %v1310_v5 = vpop.f32.mrb[138].mxu0  ;;  %2420 = vmatprep.mubr.bf16.mxu1 %v1928_v44 }
 0x1f2   : > { %v2682_v6 = vmax.f32 %v2210_v52, 0.0  ;;  %v1311_v12 = vadd.f32 %v1310_v5, %v4404_v7  ;;  %v1312_v13 = vpop.f32.mrb[139].mxu0  ;;  %2421 = vmatmul.mubr.bf16.gmra.mrb[196].mxu1 %v1927_v38  ;;  %v1741_v16 = vmax.f32 %v1307_v54, 0.0 }
 0x1f3   : > { %v1313_v15 = vadd.f32 %v1312_v13, %v4406_v8  ;;  %v1742_v21 = vmax.f32 %v1309_v1, 0.0 }
 0x1f4   : > { %v2803_v20 = vpack.c.bf16 %v2682_v6, %v2681_v11  ;;  %v1743_v17 = vmax.f32 %v1311_v12, 0.0 }
 0x1f5   : > { %v1744_v23 = vmax.f32 %v1313_v15, 0.0  ;;  %v2214_v24 = vpop.f32.mrb[92].mxu1 }
 0x1f6   : > { %v1929_v27 = vpack.c.bf16 %v1743_v17, %v1741_v16  ;;  %v2215_v3 = vadd.f32 %v4735_v40, %v2214_v24  ;;  %v2216_v29 = vpop.f32.mrb[93].mxu1  ;;  %3918 = vmatprep.mubr.bf16.mxu0 %v2803_v20 }
 0x1f7   : > { %v1930_v33 = vpack.c.bf16 %v1744_v23, %v1742_v21  ;;  %v1316_v34 = vpop.f32.mrb[140].mxu0  ;;  %v2217_v37 = vpop.f32.mrb[94].mxu1 }
 0x1f8   : > { %v1317_v41 = vadd.f32 %v1316_v34, %v4404_v7  ;;  %v2218_v38 = vadd.f32 %v4735_v40, %v2217_v37  ;;  %v1318_v39 = vpop.f32.mrb[141].mxu0  ;;  %v2219_v44 = vpop.f32.mrb[95].mxu1  ;;  %v2683_v54 = vmax.f32 %v2215_v3, 0.0 }
 0x1f9   : > { %v1319_v47 = vadd.f32 %v1318_v39, %v4406_v8  ;;  %v1320_v49 = vpop.f32.mrb[142].mxu0  ;;  %2428 = vmatprep.mubr.bf16.mxu1 %v1930_v33 }
 0x1fa   : > { %v2684_v52 = vmax.f32 %v2218_v38, 0.0  ;;  %v1321_v53 = vadd.f32 %v1320_v49, %v4404_v7  ;;  %v1322_v62 = vpop.f32.mrb[143].mxu0  ;;  %2429 = vmatmul.mubr.bf16.gmra.mrb[200].mxu1 %v1929_v27  ;;  %v1745_v5 = vmax.f32 %v1317_v41, 0.0 }
 0x1fb   : > { %v1323_v1 = vadd.f32 %v1322_v62, %v4406_v8  ;;  %v1746_v12 = vmax.f32 %v1319_v47, 0.0 }
 0x1fc   : > { %v2804_v11 = vpack.c.bf16 %v2684_v52, %v2683_v54  ;;  %v1747_v6 = vmax.f32 %v1321_v53, 0.0 }
 0x1fd   : > { %v1748_v13 = vmax.f32 %v1323_v1, 0.0  ;;  %v2222_v15 = vpop.f32.mrb[96].mxu1 }
 0x1fe   : > { %v1931_v16 = vpack.c.bf16 %v1747_v6, %v1745_v5  ;;  %v2223_v20 = vadd.f32 %v4735_v40, %v2222_v15  ;;  %v2224_v17 = vpop.f32.mrb[97].mxu1  ;;  %3919 = vmatmul.mubr.bf16.gmra.mrb[204].mxu0 %v2804_v11 }
 0x1ff   : > { %v1932_v21 = vpack.c.bf16 %v1748_v13, %v1746_v12  ;;  %v1326_v23 = vpop.f32.mrb[144].mxu0  ;;  %v2225_v24 = vpop.f32.mrb[98].mxu1 }
 0x200   : > { %v1327_v3 = vadd.f32 %v1326_v23, %v4404_v7  ;;  %v2226_v27 = vadd.f32 %v4735_v40, %v2225_v24  ;;  %v1328_v29 = vpop.f32.mrb[145].mxu0  ;;  %v2227_v33 = vpop.f32.mrb[99].mxu1  ;;  %v2685_v41 = vmax.f32 %v2223_v20, 0.0 }
 0x201   : > { %v1329_v34 = vadd.f32 %v1328_v29, %v4406_v8  ;;  %v1330_v37 = vpop.f32.mrb[146].mxu0  ;;  %2436 = vmatprep.mubr.bf16.mxu1 %v1932_v21 }
 0x202   : > { %v2686_v38 = vmax.f32 %v2226_v27, 0.0  ;;  %v1331_v39 = vadd.f32 %v1330_v37, %v4404_v7  ;;  %v1332_v44 = vpop.f32.mrb[147].mxu0  ;;  %2437 = vmatmul.mubr.bf16.gmra.mrb[204].mxu1 %v1931_v16  ;;  %v1749_v49 = vmax.f32 %v1327_v3, 0.0 }
 0x203   : > { %v1333_v47 = vadd.f32 %v1332_v44, %v4406_v8  ;;  %v1750_v53 = vmax.f32 %v1329_v34, 0.0 }
 0x204   : > { %v2805_v54 = vpack.c.bf16 %v2686_v38, %v2685_v41  ;;  %v1751_v52 = vmax.f32 %v1331_v39, 0.0 }
 0x205   : > { %v1752_v62 = vmax.f32 %v1333_v47, 0.0  ;;  %v2230_v1 = vpop.f32.mrb[100].mxu1 }
 0x206   : > { %v1933_v5 = vpack.c.bf16 %v1751_v52, %v1749_v49  ;;  %v2231_v11 = vadd.f32 %v4735_v40, %v2230_v1  ;;  %v2232_v6 = vpop.f32.mrb[101].mxu1  ;;  %3922 = vmatprep.mubr.bf16.mxu0 %v2805_v54 }
 0x207   : > { %v1934_v12 = vpack.c.bf16 %v1752_v62, %v1750_v53  ;;  %v1336_v13 = vpop.f32.mrb[148].mxu0  ;;  %v2233_v15 = vpop.f32.mrb[102].mxu1 }
 0x208   : > { %v1337_v20 = vadd.f32 %v1336_v13, %v4404_v7  ;;  %v2234_v16 = vadd.f32 %v4735_v40, %v2233_v15  ;;  %v1338_v17 = vpop.f32.mrb[149].mxu0  ;;  %v2235_v21 = vpop.f32.mrb[103].mxu1  ;;  %v2687_v3 = vmax.f32 %v2231_v11, 0.0 }
 0x209   : > { %v1339_v23 = vadd.f32 %v1338_v17, %v4406_v8  ;;  %v1340_v24 = vpop.f32.mrb[150].mxu0  ;;  %2444 = vmatprep.mubr.bf16.mxu1 %v1934_v12 }
 0x20a   : > { %v2688_v27 = vmax.f32 %v2234_v16, 0.0  ;;  %v1341_v29 = vadd.f32 %v1340_v24, %v4404_v7  ;;  %v1342_v33 = vpop.f32.mrb[151].mxu0  ;;  %2445 = vmatmul.mubr.bf16.gmra.mrb[208].mxu1 %v1933_v5  ;;  %v1753_v37 = vmax.f32 %v1337_v20, 0.0 }
 0x20b   : > { %v1343_v34 = vadd.f32 %v1342_v33, %v4406_v8  ;;  %v1754_v39 = vmax.f32 %v1339_v23, 0.0 }
 0x20c   : > { %v2806_v41 = vpack.c.bf16 %v2688_v27, %v2687_v3  ;;  %v1755_v38 = vmax.f32 %v1341_v29, 0.0 }
 0x20d   : > { %v1756_v44 = vmax.f32 %v1343_v34, 0.0  ;;  %v2238_v47 = vpop.f32.mrb[104].mxu1 }
 0x20e   : > { %v1935_v49 = vpack.c.bf16 %v1755_v38, %v1753_v37  ;;  %v2239_v54 = vadd.f32 %v4735_v40, %v2238_v47  ;;  %v2240_v52 = vpop.f32.mrb[105].mxu1  ;;  %3923 = vmatmul.mubr.bf16.gmra.mrb[208].mxu0 %v2806_v41 }
 0x20f   : > { %v1936_v53 = vpack.c.bf16 %v1756_v44, %v1754_v39  ;;  %v1346_v62 = vpop.f32.mrb[152].mxu0  ;;  %v2241_v1 = vpop.f32.mrb[106].mxu1 }
 0x210   : > { %v1347_v11 = vadd.f32 %v1346_v62, %v4404_v7  ;;  %v2242_v5 = vadd.f32 %v4735_v40, %v2241_v1  ;;  %v1348_v6 = vpop.f32.mrb[153].mxu0  ;;  %v2243_v12 = vpop.f32.mrb[107].mxu1  ;;  %v2689_v20 = vmax.f32 %v2239_v54, 0.0 }
 0x211   : > { %v1349_v13 = vadd.f32 %v1348_v6, %v4406_v8  ;;  %v1350_v15 = vpop.f32.mrb[154].mxu0  ;;  %2452 = vmatprep.mubr.bf16.mxu1 %v1936_v53 }
 0x212   : > { %v2690_v16 = vmax.f32 %v2242_v5, 0.0  ;;  %v1351_v17 = vadd.f32 %v1350_v15, %v4404_v7  ;;  %v1352_v21 = vpop.f32.mrb[155].mxu0  ;;  %2453 = vmatmul.mubr.bf16.gmra.mrb[212].mxu1 %v1935_v49  ;;  %v1757_v24 = vmax.f32 %v1347_v11, 0.0 }
 0x213   : > { %v1353_v23 = vadd.f32 %v1352_v21, %v4406_v8  ;;  %v1758_v29 = vmax.f32 %v1349_v13, 0.0 }
 0x214   : > { %v2807_v3 = vpack.c.bf16 %v2690_v16, %v2689_v20  ;;  %v1759_v27 = vmax.f32 %v1351_v17, 0.0 }
 0x215   : > { %v1760_v33 = vmax.f32 %v1353_v23, 0.0  ;;  %v2246_v34 = vpop.f32.mrb[108].mxu1 }
 0x216   : > { %v1937_v37 = vpack.c.bf16 %v1759_v27, %v1757_v24  ;;  %v2247_v41 = vadd.f32 %v4735_v40, %v2246_v34  ;;  %v2248_v38 = vpop.f32.mrb[109].mxu1  ;;  %3926 = vmatprep.mubr.bf16.mxu0 %v2807_v3 }
 0x217   : > { %v1938_v39 = vpack.c.bf16 %v1760_v33, %v1758_v29  ;;  %v1356_v44 = vpop.f32.mrb[156].mxu0  ;;  %v2249_v47 = vpop.f32.mrb[110].mxu1 }
 0x218   : > { %v1357_v54 = vadd.f32 %v1356_v44, %v4404_v7  ;;  %v2250_v49 = vadd.f32 %v4735_v40, %v2249_v47  ;;  %v1358_v52 = vpop.f32.mrb[157].mxu0  ;;  %v2251_v53 = vpop.f32.mrb[111].mxu1  ;;  %v2691_v11 = vmax.f32 %v2247_v41, 0.0 }
 0x219   : > { %v1359_v62 = vadd.f32 %v1358_v52, %v4406_v8  ;;  %v1360_v1 = vpop.f32.mrb[158].mxu0  ;;  %2460 = vmatprep.mubr.bf16.mxu1 %v1938_v39 }
 0x21a   : > { %v2692_v5 = vmax.f32 %v2250_v49, 0.0  ;;  %v1361_v6 = vadd.f32 %v1360_v1, %v4404_v7  ;;  %v1362_v12 = vpop.f32.mrb[159].mxu0  ;;  %2461 = vmatmul.mubr.bf16.gmra.mrb[216].mxu1 %v1937_v37  ;;  %v1761_v15 = vmax.f32 %v1357_v54, 0.0 }
 0x21b   : > { %v1363_v13 = vadd.f32 %v1362_v12, %v4406_v8  ;;  %v1762_v17 = vmax.f32 %v1359_v62, 0.0 }
 0x21c   : > { %v2808_v20 = vpack.c.bf16 %v2692_v5, %v2691_v11  ;;  %v1763_v16 = vmax.f32 %v1361_v6, 0.0 }
 0x21d   : > { %v1764_v21 = vmax.f32 %v1363_v13, 0.0  ;;  %v2254_v23 = vpop.f32.mrb[112].mxu1 }
 0x21e   : > { %v1939_v24 = vpack.c.bf16 %v1763_v16, %v1761_v15  ;;  %v2255_v3 = vadd.f32 %v4735_v40, %v2254_v23  ;;  %v2256_v27 = vpop.f32.mrb[113].mxu1  ;;  %3927 = vmatmul.mubr.bf16.gmra.mrb[212].mxu0 %v2808_v20 }
 0x21f   : > { %v1940_v29 = vpack.c.bf16 %v1764_v21, %v1762_v17  ;;  %v1366_v33 = vpop.f32.mrb[160].mxu0  ;;  %v2257_v34 = vpop.f32.mrb[114].mxu1 }
 0x220   : > { %v1367_v41 = vadd.f32 %v1366_v33, %v4404_v7  ;;  %v2258_v37 = vadd.f32 %v4735_v40, %v2257_v34  ;;  %v1368_v38 = vpop.f32.mrb[161].mxu0  ;;  %v2259_v39 = vpop.f32.mrb[115].mxu1  ;;  %v2693_v54 = vmax.f32 %v2255_v3, 0.0 }
 0x221   : > { %v1369_v44 = vadd.f32 %v1368_v38, %v4406_v8  ;;  %v1370_v47 = vpop.f32.mrb[162].mxu0  ;;  %2468 = vmatprep.mubr.bf16.mxu1 %v1940_v29 }
 0x222   : > { %v2694_v49 = vmax.f32 %v2258_v37, 0.0  ;;  %v1371_v52 = vadd.f32 %v1370_v47, %v4404_v7  ;;  %v1372_v53 = vpop.f32.mrb[163].mxu0  ;;  %2469 = vmatmul.mubr.bf16.gmra.mrb[220].mxu1 %v1939_v24  ;;  %v1765_v1 = vmax.f32 %v1367_v41, 0.0 }
 0x223   : > { %v1373_v62 = vadd.f32 %v1372_v53, %v4406_v8  ;;  %v1766_v6 = vmax.f32 %v1369_v44, 0.0 }
 0x224   : > { %v2809_v11 = vpack.c.bf16 %v2694_v49, %v2693_v54  ;;  %v1767_v5 = vmax.f32 %v1371_v52, 0.0 }
 0x225   : > { %v1768_v12 = vmax.f32 %v1373_v62, 0.0  ;;  %v2262_v13 = vpop.f32.mrb[116].mxu1 }
 0x226   : > { %v1941_v15 = vpack.c.bf16 %v1767_v5, %v1765_v1  ;;  %v2263_v20 = vadd.f32 %v4735_v40, %v2262_v13  ;;  %v2264_v16 = vpop.f32.mrb[117].mxu1  ;;  %3930 = vmatprep.mubr.bf16.mxu0 %v2809_v11 }
 0x227   : > { %v1942_v17 = vpack.c.bf16 %v1768_v12, %v1766_v6  ;;  %v1376_v21 = vpop.f32.mrb[164].mxu0  ;;  %v2265_v23 = vpop.f32.mrb[118].mxu1 }
 0x228   : > { %v1377_v3 = vadd.f32 %v1376_v21, %v4404_v7  ;;  %v2266_v24 = vadd.f32 %v4735_v40, %v2265_v23  ;;  %v1378_v27 = vpop.f32.mrb[165].mxu0  ;;  %v2267_v29 = vpop.f32.mrb[119].mxu1  ;;  %v2695_v41 = vmax.f32 %v2263_v20, 0.0 }
 0x229   : > { %v1379_v33 = vadd.f32 %v1378_v27, %v4406_v8  ;;  %v1380_v34 = vpop.f32.mrb[166].mxu0  ;;  %2476 = vmatprep.mubr.bf16.mxu1 %v1942_v17 }
 0x22a   : > { %v2696_v37 = vmax.f32 %v2266_v24, 0.0  ;;  %v1381_v38 = vadd.f32 %v1380_v34, %v4404_v7  ;;  %v1382_v39 = vpop.f32.mrb[167].mxu0  ;;  %2477 = vmatmul.mubr.bf16.gmra.mrb[224].mxu1 %v1941_v15  ;;  %v1769_v47 = vmax.f32 %v1377_v3, 0.0 }
 0x22b   : > { %v1383_v44 = vadd.f32 %v1382_v39, %v4406_v8  ;;  %v1770_v52 = vmax.f32 %v1379_v33, 0.0 }
 0x22c   : > { %v2810_v54 = vpack.c.bf16 %v2696_v37, %v2695_v41  ;;  %v1771_v49 = vmax.f32 %v1381_v38, 0.0 }
 0x22d   : > { %v1772_v53 = vmax.f32 %v1383_v44, 0.0  ;;  %v2270_v62 = vpop.f32.mrb[120].mxu1 }
 0x22e   : > { %v1943_v1 = vpack.c.bf16 %v1771_v49, %v1769_v47  ;;  %v2271_v11 = vadd.f32 %v4735_v40, %v2270_v62  ;;  %v2272_v5 = vpop.f32.mrb[121].mxu1  ;;  %3931 = vmatmul.mubr.bf16.gmra.mrb[216].mxu0 %v2810_v54 }
 0x22f   : > { %v1944_v6 = vpack.c.bf16 %v1772_v53, %v1770_v52  ;;  %v1386_v12 = vpop.f32.mrb[168].mxu0  ;;  %v2273_v13 = vpop.f32.mrb[122].mxu1 }
 0x230   : > { %v1387_v20 = vadd.f32 %v1386_v12, %v4404_v7  ;;  %v2274_v15 = vadd.f32 %v4735_v40, %v2273_v13  ;;  %v1388_v16 = vpop.f32.mrb[169].mxu0  ;;  %v2275_v17 = vpop.f32.mrb[123].mxu1  ;;  %v2697_v3 = vmax.f32 %v2271_v11, 0.0 }
 0x231   : > { %v1389_v21 = vadd.f32 %v1388_v16, %v4406_v8  ;;  %v1390_v23 = vpop.f32.mrb[170].mxu0  ;;  %2484 = vmatprep.mubr.bf16.mxu1 %v1944_v6 }
 0x232   : > { %v2698_v24 = vmax.f32 %v2274_v15, 0.0  ;;  %v1391_v27 = vadd.f32 %v1390_v23, %v4404_v7  ;;  %v1392_v29 = vpop.f32.mrb[171].mxu0  ;;  %2485 = vmatmul.mubr.bf16.gmra.mrb[228].mxu1 %v1943_v1  ;;  %v1773_v34 = vmax.f32 %v1387_v20, 0.0 }
 0x233   : > { %v1393_v33 = vadd.f32 %v1392_v29, %v4406_v8  ;;  %v1774_v38 = vmax.f32 %v1389_v21, 0.0 }
 0x234   : > { %v2811_v41 = vpack.c.bf16 %v2698_v24, %v2697_v3  ;;  %v1775_v37 = vmax.f32 %v1391_v27, 0.0 }
 0x235   : > { %v1776_v39 = vmax.f32 %v1393_v33, 0.0  ;;  %v2278_v44 = vpop.f32.mrb[124].mxu1 }
 0x236   : > { %v1945_v47 = vpack.c.bf16 %v1775_v37, %v1773_v34  ;;  %v2279_v54 = vadd.f32 %v4735_v40, %v2278_v44  ;;  %v2280_v49 = vpop.f32.mrb[125].mxu1  ;;  %3934 = vmatprep.mubr.bf16.mxu0 %v2811_v41 }
 0x237   : > { %v1946_v52 = vpack.c.bf16 %v1776_v39, %v1774_v38  ;;  %v1396_v53 = vpop.f32.mrb[172].mxu0  ;;  %v2281_v62 = vpop.f32.mrb[126].mxu1 }
 0x238   : > { %v1397_v11 = vadd.f32 %v1396_v53, %v4404_v7  ;;  %v2282_v1 = vadd.f32 %v4735_v40, %v2281_v62  ;;  %v1398_v5 = vpop.f32.mrb[173].mxu0  ;;  %v2283_v6 = vpop.f32.mrb[127].mxu1  ;;  %v2699_v20 = vmax.f32 %v2279_v54, 0.0 }
 0x239   : > { %v1399_v12 = vadd.f32 %v1398_v5, %v4406_v8  ;;  %v1400_v13 = vpop.f32.mrb[174].mxu0  ;;  %2492 = vmatprep.mubr.bf16.mxu1 %v1946_v52 }
 0x23a   : > { %v2700_v15 = vmax.f32 %v2282_v1, 0.0  ;;  %v1401_v16 = vadd.f32 %v1400_v13, %v4404_v7  ;;  %v1402_v17 = vpop.f32.mrb[175].mxu0  ;;  %2493 = vmatmul.mubr.bf16.gmra.mrb[232].mxu1 %v1945_v47  ;;  %v1777_v23 = vmax.f32 %v1397_v11, 0.0 }
 0x23b   : > { %v1403_v21 = vadd.f32 %v1402_v17, %v4406_v8  ;;  %v1778_v27 = vmax.f32 %v1399_v12, 0.0 }
 0x23c   : > { %v2812_v3 = vpack.c.bf16 %v2700_v15, %v2699_v20  ;;  %v1779_v24 = vmax.f32 %v1401_v16, 0.0 }
 0x23d   : > { %v1780_v29 = vmax.f32 %v1403_v21, 0.0  ;;  %v2286_v33 = vpop.f32.mrb[128].mxu1 }
 0x23e   : > { %v1947_v34 = vpack.c.bf16 %v1779_v24, %v1777_v23  ;;  %v2287_v41 = vadd.f32 %v4735_v40, %v2286_v33  ;;  %v2288_v37 = vpop.f32.mrb[129].mxu1  ;;  %3935 = vmatmul.mubr.bf16.gmra.mrb[220].mxu0 %v2812_v3 }
 0x23f   : > { %v1948_v38 = vpack.c.bf16 %v1780_v29, %v1778_v27  ;;  %v1406_v39 = vpop.f32.mrb[176].mxu0  ;;  %v2289_v44 = vpop.f32.mrb[130].mxu1 }
 0x240   : > { %v1407_v54 = vadd.f32 %v1406_v39, %v4404_v7  ;;  %v2290_v47 = vadd.f32 %v4735_v40, %v2289_v44  ;;  %v1408_v49 = vpop.f32.mrb[177].mxu0  ;;  %v2291_v52 = vpop.f32.mrb[131].mxu1  ;;  %v2701_v11 = vmax.f32 %v2287_v41, 0.0 }
 0x241   : > { %v1409_v53 = vadd.f32 %v1408_v49, %v4406_v8  ;;  %v1410_v62 = vpop.f32.mrb[178].mxu0  ;;  %2500 = vmatprep.mubr.bf16.mxu1 %v1948_v38 }
 0x242   : > { %v2702_v1 = vmax.f32 %v2290_v47, 0.0  ;;  %v1411_v5 = vadd.f32 %v1410_v62, %v4404_v7  ;;  %v1412_v6 = vpop.f32.mrb[179].mxu0  ;;  %2501 = vmatmul.mubr.bf16.gmra.mrb[236].mxu1 %v1947_v34  ;;  %v1781_v13 = vmax.f32 %v1407_v54, 0.0 }
 0x243   : > { %v1413_v12 = vadd.f32 %v1412_v6, %v4406_v8  ;;  %v1782_v16 = vmax.f32 %v1409_v53, 0.0 }
 0x244   : > { %v2813_v20 = vpack.c.bf16 %v2702_v1, %v2701_v11  ;;  %v1783_v15 = vmax.f32 %v1411_v5, 0.0 }
 0x245   : > { %v1784_v17 = vmax.f32 %v1413_v12, 0.0  ;;  %v2294_v21 = vpop.f32.mrb[132].mxu1 }
 0x246   : > { %v1949_v23 = vpack.c.bf16 %v1783_v15, %v1781_v13  ;;  %v2295_v3 = vadd.f32 %v4735_v40, %v2294_v21  ;;  %v2296_v24 = vpop.f32.mrb[133].mxu1  ;;  %3938 = vmatprep.mubr.bf16.mxu0 %v2813_v20 }
 0x247   : > { %v1950_v27 = vpack.c.bf16 %v1784_v17, %v1782_v16  ;;  %v1416_v29 = vpop.f32.mrb[180].mxu0  ;;  %v2297_v33 = vpop.f32.mrb[134].mxu1 }
 0x248   : > { %v1417_v41 = vadd.f32 %v1416_v29, %v4404_v7  ;;  %v2298_v34 = vadd.f32 %v4735_v40, %v2297_v33  ;;  %v1418_v37 = vpop.f32.mrb[181].mxu0  ;;  %v2299_v38 = vpop.f32.mrb[135].mxu1  ;;  %v2703_v54 = vmax.f32 %v2295_v3, 0.0 }
 0x249   : > { %v1419_v39 = vadd.f32 %v1418_v37, %v4406_v8  ;;  %v1420_v44 = vpop.f32.mrb[182].mxu0  ;;  %2508 = vmatprep.mubr.bf16.mxu1 %v1950_v27 }
 0x24a   : > { %v2704_v47 = vmax.f32 %v2298_v34, 0.0  ;;  %v1421_v49 = vadd.f32 %v1420_v44, %v4404_v7  ;;  %v1422_v52 = vpop.f32.mrb[183].mxu0  ;;  %2509 = vmatmul.mubr.bf16.gmra.mrb[240].mxu1 %v1949_v23  ;;  %v1785_v62 = vmax.f32 %v1417_v41, 0.0 }
 0x24b   : > { %v1423_v53 = vadd.f32 %v1422_v52, %v4406_v8  ;;  %v1786_v5 = vmax.f32 %v1419_v39, 0.0 }
 0x24c   : > { %v2814_v11 = vpack.c.bf16 %v2704_v47, %v2703_v54  ;;  %v1787_v1 = vmax.f32 %v1421_v49, 0.0 }
 0x24d   : > { %v1788_v6 = vmax.f32 %v1423_v53, 0.0  ;;  %v2302_v12 = vpop.f32.mrb[136].mxu1 }
 0x24e   : > { %v1951_v13 = vpack.c.bf16 %v1787_v1, %v1785_v62  ;;  %v2303_v20 = vadd.f32 %v4735_v40, %v2302_v12  ;;  %v2304_v15 = vpop.f32.mrb[137].mxu1  ;;  %3939 = vmatmul.mubr.bf16.gmra.mrb[224].mxu0 %v2814_v11 }
 0x24f   : > { %v1952_v16 = vpack.c.bf16 %v1788_v6, %v1786_v5  ;;  %v1426_v17 = vpop.f32.mrb[184].mxu0  ;;  %v2305_v21 = vpop.f32.mrb[138].mxu1 }
 0x250   : > { %v1427_v3 = vadd.f32 %v1426_v17, %v4404_v7  ;;  %v2306_v23 = vadd.f32 %v4735_v40, %v2305_v21  ;;  %v1428_v24 = vpop.f32.mrb[185].mxu0  ;;  %v2307_v27 = vpop.f32.mrb[139].mxu1  ;;  %v2705_v41 = vmax.f32 %v2303_v20, 0.0 }
 0x251   : > { %v1429_v29 = vadd.f32 %v1428_v24, %v4406_v8  ;;  %v1430_v33 = vpop.f32.mrb[186].mxu0  ;;  %2516 = vmatprep.mubr.bf16.mxu1 %v1952_v16 }
 0x252   : > { %v2706_v34 = vmax.f32 %v2306_v23, 0.0  ;;  %v1431_v37 = vadd.f32 %v1430_v33, %v4404_v7  ;;  %v1432_v38 = vpop.f32.mrb[187].mxu0  ;;  %2517 = vmatmul.mubr.bf16.gmra.mrb[244].mxu1 %v1951_v13  ;;  %v1789_v44 = vmax.f32 %v1427_v3, 0.0 }
 0x253   : > { %v1433_v39 = vadd.f32 %v1432_v38, %v4406_v8  ;;  %v1790_v49 = vmax.f32 %v1429_v29, 0.0 }
 0x254   : > { %v2815_v54 = vpack.c.bf16 %v2706_v34, %v2705_v41  ;;  %v1791_v47 = vmax.f32 %v1431_v37, 0.0 }
 0x255   : > { %v1792_v52 = vmax.f32 %v1433_v39, 0.0  ;;  %v2310_v53 = vpop.f32.mrb[140].mxu1 }
 0x256   : > { %v1953_v62 = vpack.c.bf16 %v1791_v47, %v1789_v44  ;;  %v2311_v11 = vadd.f32 %v4735_v40, %v2310_v53  ;;  %v2312_v1 = vpop.f32.mrb[141].mxu1  ;;  %3942 = vmatprep.mubr.bf16.mxu0 %v2815_v54  ;;  %v4860_v44 = vld [vmem:[%s5395_s4] ss:$0 sm:$0xff] }
 0x257   : > { %v1954_v5 = vpack.c.bf16 %v1792_v52, %v1790_v49  ;;  %v1436_v6 = vpop.f32.mrb[188].mxu0  ;;  %v2313_v12 = vpop.f32.mrb[142].mxu1 }
 0x258   : > { %v1437_v20 = vadd.f32 %v1436_v6, %v4404_v7  ;;  %v2314_v13 = vadd.f32 %v4735_v40, %v2313_v12  ;;  %v1438_v15 = vpop.f32.mrb[189].mxu0  ;;  %v2315_v16 = vpop.f32.mrb[143].mxu1  ;;  %v2707_v3 = vmax.f32 %v2311_v11, 0.0 }
 0x259   : > { %v1439_v17 = vadd.f32 %v1438_v15, %v4406_v8  ;;  %v1440_v21 = vpop.f32.mrb[190].mxu0  ;;  %2524 = vmatprep.mubr.bf16.mxu1 %v1954_v5 }
 0x25a   : > { %v2708_v23 = vmax.f32 %v2314_v13, 0.0  ;;  %v1441_v24 = vadd.f32 %v1440_v21, %v4404_v7  ;;  %v1442_v27 = vpop.f32.mrb[191].mxu0  ;;  %2525 = vmatmul.mubr.bf16.gmra.mrb[248].mxu1 %v1953_v62  ;;  %v1793_v33 = vmax.f32 %v1437_v20, 0.0 }
 0x25b   : > { %v1443_v29 = vadd.f32 %v1442_v27, %v4406_v8  ;;  %v1794_v37 = vmax.f32 %v1439_v17, 0.0 }
 0x25c   : > { %v2816_v41 = vpack.c.bf16 %v2708_v23, %v2707_v3  ;;  %v1795_v34 = vmax.f32 %v1441_v24, 0.0 }
 0x25d   : > { %v1796_v38 = vmax.f32 %v1443_v29, 0.0  ;;  %v2318_v40 = vpop.f32.mrb[144].mxu1 }
 0x25e   : > { %v1955_v39 = vpack.c.bf16 %v1795_v34, %v1793_v33  ;;  %v2319_v54 = vadd.f32 %v4860_v44, %v2318_v40  ;;  %v2320_v47 = vpop.f32.mrb[145].mxu1  ;;  %3943 = vmatmul.mubr.bf16.gmra.mrb[228].mxu0 %v2816_v41 }
 0x25f   : > { %v1956_v7 = vpack.c.bf16 %v1796_v38, %v1794_v37  ;;  %v2321_v49 = vpop.f32.mrb[146].mxu1 }
 0x260   : > { %v2322_v8 = vadd.f32 %v4860_v44, %v2321_v49  ;;  %v2323_v52 = vpop.f32.mrb[147].mxu1  ;;  %v2709_v53 = vmax.f32 %v2319_v54, 0.0 }
 0x261   : > { %2532 = vmatprep.mubr.bf16.mxu1 %v1956_v7 }
 0x262   : > { %v2710_v62 = vmax.f32 %v2322_v8, 0.0  ;;  %2533 = vmatmul.mubr.bf16.gmra.mrb[252].mxu1 %v1955_v39 }
 0x263   : > { %2540 = vmatprep.mubr.bf16.mxu1 %v4433_v61 }
 0x264   : > { %v2817_v11 = vpack.c.bf16 %v2710_v62, %v2709_v53 }
 0x265   : > { %v2326_v1 = vpop.f32.mrb[148].mxu1 }
 0x266   : > { %v2327_v5 = vadd.f32 %v4860_v44, %v2326_v1  ;;  %v2328_v6 = vpop.f32.mrb[149].mxu1  ;;  %3946 = vmatprep.mubr.bf16.mxu0 %v2817_v11 }
 0x267   : > { %v2329_v12 = vpop.f32.mrb[150].mxu1 }
 0x268   : > { %v2330_v20 = vadd.f32 %v4860_v44, %v2329_v12  ;;  %v2331_v13 = vpop.f32.mrb[151].mxu1  ;;  %v2711_v15 = vmax.f32 %v2327_v5, 0.0 }
 0x26a   : > { %v2712_v16 = vmax.f32 %v2330_v20, 0.0  ;;  %2541 = vmatmul.mubr.bf16.gmra.mrb[0].mxu1 %v4430_v57 }
 0x26b   : > { %2548 = vmatprep.mubr.bf16.mxu1 %v4451_v30 }
 0x26c   : > { %v2818_v17 = vpack.c.bf16 %v2712_v16, %v2711_v15 }
 0x26d   : > { %v2334_v21 = vpop.f32.mrb[152].mxu1 }
 0x26e   : > { %v2335_v61 = vadd.f32 %v4860_v44, %v2334_v21  ;;  %v2336_v3 = vpop.f32.mrb[153].mxu1  ;;  %3947 = vmatmul.mubr.bf16.gmra.mrb[232].mxu0 %v2818_v17 }
 0x26f   : > { %v2337_v23 = vpop.f32.mrb[154].mxu1 }
 0x270   : > { %v2338_v24 = vadd.f32 %v4860_v44, %v2337_v23  ;;  %v2339_v27 = vpop.f32.mrb[155].mxu1  ;;  %v2713_v29 = vmax.f32 %v2335_v61, 0.0 }
 0x272   : > { %v2714_v33 = vmax.f32 %v2338_v24, 0.0  ;;  %2549 = vmatmul.mubr.bf16.gmra.mrb[4].mxu1 %v4448_v26 }
 0x273   : > { %2556 = vmatprep.mubr.bf16.mxu1 %v4466_v60 }
 0x274   : > { %v2819_v41 = vpack.c.bf16 %v2714_v33, %v2713_v29 }
 0x275   : > { %v2342_v57 = vpop.f32.mrb[156].mxu1 }
 0x276   : > { %v2343_v30 = vadd.f32 %v4860_v44, %v2342_v57  ;;  %v2344_v34 = vpop.f32.mrb[157].mxu1  ;;  %3950 = vmatprep.mubr.bf16.mxu0 %v2819_v41 }
 0x277   : > { %v2345_v37 = vpop.f32.mrb[158].mxu1 }
 0x278   : > { %v2346_v38 = vadd.f32 %v4860_v44, %v2345_v37  ;;  %v2347_v40 = vpop.f32.mrb[159].mxu1  ;;  %v2715_v39 = vmax.f32 %v2343_v30, 0.0 }
 0x279   : > { %v4899_v40 = vld [vmem:[%s5397_s6] ss:$0 sm:$0xff] }
 0x27a   : > { %v2716_v54 = vmax.f32 %v2346_v38, 0.0  ;;  %2557 = vmatmul.mubr.bf16.gmra.mrb[8].mxu1 %v4463_v55 }
 0x27b   : > { %2564 = vmatprep.mubr.bf16.mxu1 %v4481_v31 }
 0x27c   : > { %v2820_v47 = vpack.c.bf16 %v2716_v54, %v2715_v39 }
 0x27d   : > { %v2350_v26 = vpop.f32.mrb[160].mxu1 }
 0x27e   : > { %v2351_v60 = vadd.f32 %v4860_v44, %v2350_v26  ;;  %v2352_v7 = vpop.f32.mrb[161].mxu1  ;;  %3951 = vmatmul.mubr.bf16.gmra.mrb[236].mxu0 %v2820_v47 }
 0x27f   : > { %v2353_v49 = vpop.f32.mrb[162].mxu1 }
 0x280   : > { %v2354_v8 = vadd.f32 %v4860_v44, %v2353_v49  ;;  %v2355_v52 = vpop.f32.mrb[163].mxu1  ;;  %v2717_v53 = vmax.f32 %v2351_v60, 0.0 }
 0x282   : > { %v2718_v62 = vmax.f32 %v2354_v8, 0.0  ;;  %2565 = vmatmul.mubr.bf16.gmra.mrb[12].mxu1 %v4478_v25 }
 0x283   : > { %2572 = vmatprep.mubr.bf16.mxu1 %v4496_v0 }
 0x284   : > { %v2821_v11 = vpack.c.bf16 %v2718_v62, %v2717_v53 }
 0x285   : > { %v2358_v55 = vpop.f32.mrb[164].mxu1 }
 0x286   : > { %v2359_v31 = vadd.f32 %v4860_v44, %v2358_v55  ;;  %v2360_v1 = vpop.f32.mrb[165].mxu1  ;;  %3954 = vmatprep.mubr.bf16.mxu0 %v2821_v11 }
 0x287   : > { %v2361_v5 = vpop.f32.mrb[166].mxu1 }
 0x288   : > { %v2362_v6 = vadd.f32 %v4860_v44, %v2361_v5  ;;  %v2363_v12 = vpop.f32.mrb[167].mxu1  ;;  %v2719_v20 = vmax.f32 %v2359_v31, 0.0 }
 0x28a   : > { %v2720_v13 = vmax.f32 %v2362_v6, 0.0  ;;  %2573 = vmatmul.mubr.bf16.gmra.mrb[16].mxu1 %v4493_v58 }
 0x28b   : > { %2580 = vmatprep.mubr.bf16.mxu1 %v4511_v36 }
 0x28c   : > { %v2822_v25 = vpack.c.bf16 %v2720_v13, %v2719_v20 }
 0x28d   : > { %v2366_v15 = vpop.f32.mrb[168].mxu1 }
 0x28e   : > { %v2367_v0 = vadd.f32 %v4860_v44, %v2366_v15  ;;  %v2368_v16 = vpop.f32.mrb[169].mxu1  ;;  %3955 = vmatmul.mubr.bf16.gmra.mrb[240].mxu0 %v2822_v25 }
 0x28f   : > { %v2369_v17 = vpop.f32.mrb[170].mxu1 }
 0x290   : > { %v2370_v21 = vadd.f32 %v4860_v44, %v2369_v17  ;;  %v2371_v61 = vpop.f32.mrb[171].mxu1  ;;  %v2721_v3 = vmax.f32 %v2367_v0, 0.0 }
 0x292   : > { %v2722_v23 = vmax.f32 %v2370_v21, 0.0  ;;  %2581 = vmatmul.mubr.bf16.gmra.mrb[20].mxu1 %v4508_v32 }
 0x293   : > { %2588 = vmatprep.mubr.bf16.mxu1 %v4526_v10 }
 0x294   : > { %v2823_v58 = vpack.c.bf16 %v2722_v23, %v2721_v3 }
 0x295   : > { %v2374_v36 = vpop.f32.mrb[172].mxu1 }
 0x296   : > { %v2375_v24 = vadd.f32 %v4860_v44, %v2374_v36  ;;  %v2376_v27 = vpop.f32.mrb[173].mxu1  ;;  %3958 = vmatprep.mubr.bf16.mxu0 %v2823_v58 }
 0x297   : > { %v2377_v29 = vpop.f32.mrb[174].mxu1 }
 0x298   : > { %v2378_v33 = vadd.f32 %v4860_v44, %v2377_v29  ;;  %v2379_v41 = vpop.f32.mrb[175].mxu1  ;;  %v2723_v57 = vmax.f32 %v2375_v24, 0.0 }
 0x29a   : > { %v2724_v30 = vmax.f32 %v2378_v33, 0.0  ;;  %2589 = vmatmul.mubr.bf16.gmra.mrb[24].mxu1 %v4523_v4 }
 0x29b   : > { %2596 = vmatprep.mubr.bf16.mxu1 %v4544_v46 }
 0x29c   : > { %v2824_v32 = vpack.c.bf16 %v2724_v30, %v2723_v57 }
 0x29d   : > { %v2382_v10 = vpop.f32.mrb[176].mxu1 }
 0x29e   : > { %v2383_v34 = vadd.f32 %v4860_v44, %v2382_v10  ;;  %v2384_v37 = vpop.f32.mrb[177].mxu1  ;;  %3959 = vmatmul.mubr.bf16.gmra.mrb[244].mxu0 %v2824_v32 }
 0x29f   : > { %v2385_v38 = vpop.f32.mrb[178].mxu1 }
 0x2a0   : > { %v2386_v39 = vadd.f32 %v4860_v44, %v2385_v38  ;;  %v2387_v54 = vpop.f32.mrb[179].mxu1  ;;  %v2725_v46 = vmax.f32 %v2383_v34, 0.0 }
 0x2a1   : > { %v3908_v4 = vpop.f32.mrb[192].mxu0 }
 0x2a2   : > { %v2726_v47 = vmax.f32 %v2386_v39, 0.0  ;;  %v2975_v26 = vadd.f32 %v3908_v4, %v4899_v40  ;;  %2597 = vmatmul.mubr.bf16.gmra.mrb[28].mxu1 %v4541_v42  ;;  %v2966_v60 = vpop.f32.mrb[193].mxu0 }
 0x2a3   : > { %v2967_v7 = vadd.f32 %v4899_v40, %v2966_v60  ;;  %2604 = vmatprep.mubr.bf16.mxu1 %v4559_v22  ;;  %v3909_v49 = vpop.f32.mrb[194].mxu0 }
 0x2a4   : > { %v2825_v8 = vpack.c.bf16 %v2726_v47, %v2725_v46  ;;  %3479 = vst.msk [vmem:[%s4905_s8 + $0x10] sm:$0xff] %vm732_vm1, %v2975_v26  ;;  %v2978_v52 = vadd.f32 %v3909_v49, %v4899_v40  ;;  %v2969_v53 = vpop.f32.mrb[195].mxu0 }
 0x2a5   : > { %3477 = vst.msk [vmem:[%s4905_s8] sm:$0xff] %vm732_vm1, %v2967_v7  ;;  %v2970_v62 = vadd.f32 %v4899_v40, %v2969_v53  ;;  %v2390_v11 = vpop.f32.mrb[180].mxu1 }
 0x2a6   : > { %3480 = vst.msk [vmem:[%s4905_s8 + $0x18] sm:$0xff] %vm732_vm1, %v2978_v52  ;;  %v2391_v42 = vadd.f32 %v4860_v44, %v2390_v11  ;;  %v2392_v55 = vpop.f32.mrb[181].mxu1  ;;  %3962 = vmatprep.mubr.bf16.mxu0 %v2825_v8 }
 0x2a7   : > { %3478 = vst.msk [vmem:[%s4905_s8 + $0x8] sm:$0xff] %vm732_vm1, %v2970_v62  ;;  %v2393_v22 = vpop.f32.mrb[182].mxu1 }
 0x2a8   : > { %v2394_v31 = vadd.f32 %v4860_v44, %v2393_v22  ;;  %v2395_v1 = vpop.f32.mrb[183].mxu1  ;;  %v2727_v5 = vmax.f32 %v2391_v42, 0.0 }
 0x2aa   : > { %v2728_v6 = vmax.f32 %v2394_v31, 0.0  ;;  %2605 = vmatmul.mubr.bf16.gmra.mrb[32].mxu1 %v4556_v18 }
 0x2ab   : > { %2612 = vmatprep.mubr.bf16.mxu1 %v4577_v2 }
 0x2ac   : > { %v2826_v12 = vpack.c.bf16 %v2728_v6, %v2727_v5 }
 0x2ad   : > { %v2398_v20 = vpop.f32.mrb[184].mxu1 }
 0x2ae   : > { %v2399_v13 = vadd.f32 %v4860_v44, %v2398_v20  ;;  %v2400_v25 = vpop.f32.mrb[185].mxu1  ;;  %3963 = vmatmul.mubr.bf16.gmra.mrb[248].mxu0 %v2826_v12 }
 0x2af   : > { %v2401_v15 = vpop.f32.mrb[186].mxu1 }
 0x2b0   : > { %v2402_v0 = vadd.f32 %v4860_v44, %v2401_v15  ;;  %v2403_v16 = vpop.f32.mrb[187].mxu1  ;;  %v2729_v21 = vmax.f32 %v2399_v13, 0.0 }
 0x2b1   : > { %v3912_v17 = vpop.f32.mrb[196].mxu0 }
 0x2b2   : > { %v2730_v61 = vmax.f32 %v2402_v0, 0.0  ;;  %v2991_v18 = vadd.f32 %v3912_v17, %v4899_v40  ;;  %2613 = vmatmul.mubr.bf16.gmra.mrb[36].mxu1 %v4574_v59  ;;  %v2982_v2 = vpop.f32.mrb[197].mxu0 }
 0x2b3   : > { %v2983_v3 = vadd.f32 %v4899_v40, %v2982_v2  ;;  %2620 = vmatprep.mubr.bf16.mxu1 %v4598_v48  ;;  %v3913_v23 = vpop.f32.mrb[198].mxu0 }
 0x2b4   : > { %v2827_v58 = vpack.c.bf16 %v2730_v61, %v2729_v21  ;;  %3483 = vst.msk [vmem:[%s4905_s8 + $0x30] sm:$0xff] %vm732_vm1, %v2991_v18  ;;  %v2994_v36 = vadd.f32 %v3913_v23, %v4899_v40  ;;  %v2985_v24 = vpop.f32.mrb[199].mxu0 }
 0x2b5   : > { %3481 = vst.msk [vmem:[%s4905_s8 + $0x20] sm:$0xff] %vm732_vm1, %v2983_v3  ;;  %v2986_v27 = vadd.f32 %v4899_v40, %v2985_v24  ;;  %v2406_v29 = vpop.f32.mrb[188].mxu1 }
 0x2b6   : > { %3484 = vst.msk [vmem:[%s4905_s8 + $0x38] sm:$0xff] %vm732_vm1, %v2994_v36  ;;  %v2407_v59 = vadd.f32 %v4860_v44, %v2406_v29  ;;  %v2408_v33 = vpop.f32.mrb[189].mxu1  ;;  %3966 = vmatprep.mubr.bf16.mxu0 %v2827_v58 }
 0x2b7   : > { %3482 = vst.msk [vmem:[%s4905_s8 + $0x28] sm:$0xff] %vm732_vm1, %v2986_v27  ;;  %v2409_v48 = vpop.f32.mrb[190].mxu1 }
 0x2b8   : > { %v2410_v41 = vadd.f32 %v4860_v44, %v2409_v48  ;;  %v2411_v57 = vpop.f32.mrb[191].mxu1  ;;  %v2731_v30 = vmax.f32 %v2407_v59, 0.0 }
 0x2ba   : > { %v2732_v32 = vmax.f32 %v2410_v41, 0.0  ;;  %2621 = vmatmul.mubr.bf16.gmra.mrb[40].mxu1 %v4595_v43 }
 0x2bb   : > { %2628 = vmatprep.mubr.bf16.mxu1 %v4619_v35 }
 0x2bc   : > { %v2828_v10 = vpack.c.bf16 %v2732_v32, %v2731_v30 }
 0x2bd   : > { %v2414_v34 = vpop.f32.mrb[192].mxu1 }
 0x2be   : > { %v2415_v37 = vadd.f32 %v4860_v44, %v2414_v34  ;;  %v2416_v38 = vpop.f32.mrb[193].mxu1  ;;  %3967 = vmatmul.mubr.bf16.gmra.mrb[252].mxu0 %v2828_v10 }
 0x2bf   : > { %v2417_v39 = vpop.f32.mrb[194].mxu1 }
 0x2c0   : > { %v2418_v54 = vadd.f32 %v4860_v44, %v2417_v39  ;;  %v2419_v4 = vpop.f32.mrb[195].mxu1  ;;  %v2733_v47 = vmax.f32 %v2415_v37, 0.0 }
 0x2c1   : > { %v3916_v46 = vpop.f32.mrb[200].mxu0 }
 0x2c2   : > { %v2734_v26 = vmax.f32 %v2418_v54, 0.0  ;;  %v3007_v43 = vadd.f32 %v3916_v46, %v4899_v40  ;;  %2629 = vmatmul.mubr.bf16.gmra.mrb[44].mxu1 %v4616_v28  ;;  %v2998_v35 = vpop.f32.mrb[201].mxu0 }
 0x2c3   : > { %v2999_v60 = vadd.f32 %v4899_v40, %v2998_v35  ;;  %2636 = vmatprep.mubr.bf16.mxu1 %v4634_v19  ;;  %v3917_v7 = vpop.f32.mrb[202].mxu0 }
 0x2c4   : > { %v2829_v49 = vpack.c.bf16 %v2734_v26, %v2733_v47  ;;  %3487 = vst.msk [vmem:[%s4905_s8 + $0x50] sm:$0xff] %vm732_vm1, %v3007_v43  ;;  %v3010_v8 = vadd.f32 %v3917_v7, %v4899_v40  ;;  %v3001_v52 = vpop.f32.mrb[203].mxu0 }
 0x2c5   : > { %3485 = vst.msk [vmem:[%s4905_s8 + $0x40] sm:$0xff] %vm732_vm1, %v2999_v60  ;;  %v3002_v53 = vadd.f32 %v4899_v40, %v3001_v52  ;;  %v2422_v62 = vpop.f32.mrb[196].mxu1 }
 0x2c6   : > { %3488 = vst.msk [vmem:[%s4905_s8 + $0x58] sm:$0xff] %vm732_vm1, %v3010_v8  ;;  %v2423_v28 = vadd.f32 %v4860_v44, %v2422_v62  ;;  %v2424_v11 = vpop.f32.mrb[197].mxu1  ;;  %3970 = vmatprep.mubr.bf16.mxu0 %v2829_v49 }
 0x2c7   : > { %3486 = vst.msk [vmem:[%s4905_s8 + $0x48] sm:$0xff] %vm732_vm1, %v3002_v53  ;;  %v2425_v19 = vpop.f32.mrb[198].mxu1 }
 0x2c8   : > { %v2426_v42 = vadd.f32 %v4860_v44, %v2425_v19  ;;  %v2427_v55 = vpop.f32.mrb[199].mxu1  ;;  %v2735_v22 = vmax.f32 %v2423_v28, 0.0 }
 0x2ca   : > { %v2736_v31 = vmax.f32 %v2426_v42, 0.0  ;;  %2637 = vmatmul.mubr.bf16.gmra.mrb[48].mxu1 %v4631_v14 }
 0x2cb   : > { %2644 = vmatprep.mubr.bf16.mxu1 %v4649_v9 }
 0x2cc   : > { %v2830_v1 = vpack.c.bf16 %v2736_v31, %v2735_v22 }
 0x2cd   : > { %v2430_v5 = vpop.f32.mrb[200].mxu1 }
 0x2ce   : > { %v2431_v6 = vadd.f32 %v4860_v44, %v2430_v5  ;;  %v2432_v12 = vpop.f32.mrb[201].mxu1  ;;  %3971 = vmatmul.mubr.bf16.gmra.mrb[0].mxu0 %v2830_v1 }
 0x2cf   : > { %v2433_v20 = vpop.f32.mrb[202].mxu1 }
 0x2d0   : > { %v2434_v13 = vadd.f32 %v4860_v44, %v2433_v20  ;;  %v2435_v25 = vpop.f32.mrb[203].mxu1  ;;  %v2737_v0 = vmax.f32 %v2431_v6, 0.0 }
 0x2d1   : > { %v3920_v15 = vpop.f32.mrb[204].mxu0 }
 0x2d2   : > { %v2738_v16 = vmax.f32 %v2434_v13, 0.0  ;;  %v3023_v14 = vadd.f32 %v3920_v15, %v4899_v40  ;;  %2645 = vmatmul.mubr.bf16.gmra.mrb[52].mxu1 %v4646_v63  ;;  %v3014_v9 = vpop.f32.mrb[205].mxu0 }
 0x2d3   : > { %v3015_v17 = vadd.f32 %v4899_v40, %v3014_v9  ;;  %2652 = vmatprep.mubr.bf16.mxu1 %v4664_v56  ;;  %v3921_v21 = vpop.f32.mrb[206].mxu0 }
 0x2d4   : > { %v2831_v61 = vpack.c.bf16 %v2738_v16, %v2737_v0  ;;  %3491 = vst.msk [vmem:[%s4905_s8 + $0x70] sm:$0xff] %vm732_vm1, %v3023_v14  ;;  %v3026_v18 = vadd.f32 %v3921_v21, %v4899_v40  ;;  %v3017_v2 = vpop.f32.mrb[207].mxu0 }
 0x2d5   : > { %3489 = vst.msk [vmem:[%s4905_s8 + $0x60] sm:$0xff] %vm732_vm1, %v3015_v17  ;;  %v3018_v3 = vadd.f32 %v4899_v40, %v3017_v2  ;;  %v2438_v23 = vpop.f32.mrb[204].mxu1 }
 0x2d6   : > { %3492 = vst.msk [vmem:[%s4905_s8 + $0x78] sm:$0xff] %vm732_vm1, %v3026_v18  ;;  %v2439_v63 = vadd.f32 %v4860_v44, %v2438_v23  ;;  %v2440_v58 = vpop.f32.mrb[205].mxu1  ;;  %3974 = vmatprep.mubr.bf16.mxu0 %v2831_v61 }
 0x2d7   : > { %3490 = vst.msk [vmem:[%s4905_s8 + $0x68] sm:$0xff] %vm732_vm1, %v3018_v3  ;;  %v2441_v56 = vpop.f32.mrb[206].mxu1 }
 0x2d8   : > { %v2442_v36 = vadd.f32 %v4860_v44, %v2441_v56  ;;  %v2443_v24 = vpop.f32.mrb[207].mxu1  ;;  %v2739_v27 = vmax.f32 %v2439_v63, 0.0 }
 0x2da   : > { %v2740_v29 = vmax.f32 %v2442_v36, 0.0  ;;  %2653 = vmatmul.mubr.bf16.gmra.mrb[56].mxu1 %v4661_v51 }
 0x2db   : > { %2660 = vmatprep.mubr.bf16.mxu1 %v4679_v50 }
 0x2dc   : > { %v2832_v59 = vpack.c.bf16 %v2740_v29, %v2739_v27 }
 0x2dd   : > { %v2446_v33 = vpop.f32.mrb[208].mxu1 }
 0x2de   : > { %v2447_v48 = vadd.f32 %v4860_v44, %v2446_v33  ;;  %v2448_v41 = vpop.f32.mrb[209].mxu1  ;;  %3975 = vmatmul.mubr.bf16.gmra.mrb[4].mxu0 %v2832_v59 }
 0x2df   : > { %v2449_v57 = vpop.f32.mrb[210].mxu1 }
 0x2e0   : > { %v2450_v30 = vadd.f32 %v4860_v44, %v2449_v57  ;;  %v2451_v32 = vpop.f32.mrb[211].mxu1  ;;  %v2741_v34 = vmax.f32 %v2447_v48, 0.0 }
 0x2e1   : > { %v3924_v10 = vpop.f32.mrb[208].mxu0 }
 0x2e2   : > { %v2742_v37 = vmax.f32 %v2450_v30, 0.0  ;;  %v3039_v51 = vadd.f32 %v3924_v10, %v4899_v40  ;;  %2661 = vmatmul.mubr.bf16.gmra.mrb[60].mxu1 %v4676_v45  ;;  %v3030_v50 = vpop.f32.mrb[209].mxu0 }
 0x2e3   : > { %v3031_v38 = vadd.f32 %v4899_v40, %v3030_v50  ;;  %v3925_v39 = vpop.f32.mrb[210].mxu0 }
 0x2e4   : > { %v2833_v54 = vpack.c.bf16 %v2742_v37, %v2741_v34  ;;  %3495 = vst.msk [vmem:[%s4905_s8 + $0x90] sm:$0xff] %vm732_vm1, %v3039_v51  ;;  %v3042_v4 = vadd.f32 %v3925_v39, %v4899_v40  ;;  %v3033_v46 = vpop.f32.mrb[211].mxu0 }
 0x2e5   : > { %3493 = vst.msk [vmem:[%s4905_s8 + $0x80] sm:$0xff] %vm732_vm1, %v3031_v38  ;;  %v3034_v47 = vadd.f32 %v4899_v40, %v3033_v46  ;;  %v2454_v26 = vpop.f32.mrb[212].mxu1 }
 0x2e6   : > { %3496 = vst.msk [vmem:[%s4905_s8 + $0x98] sm:$0xff] %vm732_vm1, %v3042_v4  ;;  %v2455_v43 = vadd.f32 %v4860_v44, %v2454_v26  ;;  %v2456_v45 = vpop.f32.mrb[213].mxu1  ;;  %3978 = vmatprep.mubr.bf16.mxu0 %v2833_v54 }
 0x2e7   : > { %3494 = vst.msk [vmem:[%s4905_s8 + $0x88] sm:$0xff] %vm732_vm1, %v3034_v47  ;;  %v2457_v35 = vpop.f32.mrb[214].mxu1 }
 0x2e8   : > { %v2458_v60 = vadd.f32 %v4860_v44, %v2457_v35  ;;  %v2459_v7 = vpop.f32.mrb[215].mxu1  ;;  %v2743_v49 = vmax.f32 %v2455_v43, 0.0 }
 0x2ea   : > { %v2744_v8 = vmax.f32 %v2458_v60, 0.0 }
 0x2ec   : > { %v2834_v52 = vpack.c.bf16 %v2744_v8, %v2743_v49 }
 0x2ed   : > { %v2462_v53 = vpop.f32.mrb[216].mxu1 }
 0x2ee   : > { %v2463_v62 = vadd.f32 %v4860_v44, %v2462_v53  ;;  %v2464_v28 = vpop.f32.mrb[217].mxu1  ;;  %3979 = vmatmul.mubr.bf16.gmra.mrb[8].mxu0 %v2834_v52 }
 0x2ef   : > { %v2465_v11 = vpop.f32.mrb[218].mxu1 }
 0x2f0   : > { %v2466_v19 = vadd.f32 %v4860_v44, %v2465_v11  ;;  %v2467_v42 = vpop.f32.mrb[219].mxu1  ;;  %v2745_v22 = vmax.f32 %v2463_v62, 0.0 }
 0x2f1   : > { %v3928_v55 = vpop.f32.mrb[212].mxu0 }
 0x2f2   : > { %v2746_v31 = vmax.f32 %v2466_v19, 0.0  ;;  %v3055_v1 = vadd.f32 %v3928_v55, %v4899_v40  ;;  %v3046_v5 = vpop.f32.mrb[213].mxu0 }
 0x2f3   : > { %v3047_v6 = vadd.f32 %v4899_v40, %v3046_v5  ;;  %v3929_v12 = vpop.f32.mrb[214].mxu0 }
 0x2f4   : > { %v2835_v20 = vpack.c.bf16 %v2746_v31, %v2745_v22  ;;  %3499 = vst.msk [vmem:[%s4905_s8 + $0xb0] sm:$0xff] %vm732_vm1, %v3055_v1  ;;  %v3058_v13 = vadd.f32 %v3929_v12, %v4899_v40  ;;  %v3049_v25 = vpop.f32.mrb[215].mxu0 }
 0x2f5   : > { %3497 = vst.msk [vmem:[%s4905_s8 + $0xa0] sm:$0xff] %vm732_vm1, %v3047_v6  ;;  %v3050_v15 = vadd.f32 %v4899_v40, %v3049_v25  ;;  %v2470_v0 = vpop.f32.mrb[220].mxu1 }
 0x2f6   : > { %3500 = vst.msk [vmem:[%s4905_s8 + $0xb8] sm:$0xff] %vm732_vm1, %v3058_v13  ;;  %v2471_v16 = vadd.f32 %v4860_v44, %v2470_v0  ;;  %v2472_v14 = vpop.f32.mrb[221].mxu1  ;;  %3982 = vmatprep.mubr.bf16.mxu0 %v2835_v20 }
 0x2f7   : > { %3498 = vst.msk [vmem:[%s4905_s8 + $0xa8] sm:$0xff] %vm732_vm1, %v3050_v15  ;;  %v2473_v9 = vpop.f32.mrb[222].mxu1 }
 0x2f8   : > { %v2474_v17 = vadd.f32 %v4860_v44, %v2473_v9  ;;  %v2475_v21 = vpop.f32.mrb[223].mxu1  ;;  %v2747_v61 = vmax.f32 %v2471_v16, 0.0 }
 0x2fa   : > { %v2748_v18 = vmax.f32 %v2474_v17, 0.0 }
 0x2fc   : > { %v2836_v2 = vpack.c.bf16 %v2748_v18, %v2747_v61 }
 0x2fd   : > { %v2478_v3 = vpop.f32.mrb[224].mxu1 }
 0x2fe   : > { %v2479_v23 = vadd.f32 %v4860_v44, %v2478_v3  ;;  %v2480_v63 = vpop.f32.mrb[225].mxu1  ;;  %3983 = vmatmul.mubr.bf16.gmra.mrb[12].mxu0 %v2836_v2 }
 0x2ff   : > { %v2481_v58 = vpop.f32.mrb[226].mxu1 }
 0x300   : > { %v2482_v56 = vadd.f32 %v4860_v44, %v2481_v58  ;;  %v2483_v36 = vpop.f32.mrb[227].mxu1  ;;  %v2749_v27 = vmax.f32 %v2479_v23, 0.0 }
 0x301   : > { %v3932_v24 = vpop.f32.mrb[216].mxu0 }
 0x302   : > { %v2750_v29 = vmax.f32 %v2482_v56, 0.0  ;;  %v3071_v59 = vadd.f32 %v3932_v24, %v4899_v40  ;;  %v3062_v33 = vpop.f32.mrb[217].mxu0 }
 0x303   : > { %v3063_v48 = vadd.f32 %v4899_v40, %v3062_v33  ;;  %v3933_v41 = vpop.f32.mrb[218].mxu0 }
 0x304   : > { %v2837_v57 = vpack.c.bf16 %v2750_v29, %v2749_v27  ;;  %3503 = vst.msk [vmem:[%s4905_s8 + $0xd0] sm:$0xff] %vm732_vm1, %v3071_v59  ;;  %v3074_v30 = vadd.f32 %v3933_v41, %v4899_v40  ;;  %v3065_v32 = vpop.f32.mrb[219].mxu0 }
 0x305   : > { %3501 = vst.msk [vmem:[%s4905_s8 + $0xc0] sm:$0xff] %vm732_vm1, %v3063_v48  ;;  %v3066_v10 = vadd.f32 %v4899_v40, %v3065_v32  ;;  %v2486_v34 = vpop.f32.mrb[228].mxu1 }
 0x306   : > { %3504 = vst.msk [vmem:[%s4905_s8 + $0xd8] sm:$0xff] %vm732_vm1, %v3074_v30  ;;  %v2487_v37 = vadd.f32 %v4860_v44, %v2486_v34  ;;  %v2488_v51 = vpop.f32.mrb[229].mxu1  ;;  %3986 = vmatprep.mubr.bf16.mxu0 %v2837_v57 }
 0x307   : > { %3502 = vst.msk [vmem:[%s4905_s8 + $0xc8] sm:$0xff] %vm732_vm1, %v3066_v10  ;;  %v2489_v50 = vpop.f32.mrb[230].mxu1 }
 0x308   : > { %v2490_v38 = vadd.f32 %v4860_v44, %v2489_v50  ;;  %v2491_v39 = vpop.f32.mrb[231].mxu1  ;;  %v2751_v54 = vmax.f32 %v2487_v37, 0.0 }
 0x30a   : > { %v2752_v4 = vmax.f32 %v2490_v38, 0.0 }
 0x30c   : > { %v2838_v46 = vpack.c.bf16 %v2752_v4, %v2751_v54 }
 0x30d   : > { %v2494_v47 = vpop.f32.mrb[232].mxu1 }
 0x30e   : > { %v2495_v26 = vadd.f32 %v4860_v44, %v2494_v47  ;;  %v2496_v43 = vpop.f32.mrb[233].mxu1  ;;  %3987 = vmatmul.mubr.bf16.gmra.mrb[16].mxu0 %v2838_v46 }
 0x30f   : > { %v2497_v45 = vpop.f32.mrb[234].mxu1 }
 0x310   : > { %v2498_v35 = vadd.f32 %v4860_v44, %v2497_v45  ;;  %v2499_v60 = vpop.f32.mrb[235].mxu1  ;;  %v2753_v49 = vmax.f32 %v2495_v26, 0.0 }
 0x311   : > { %v3936_v7 = vpop.f32.mrb[220].mxu0 }
 0x312   : > { %v2754_v8 = vmax.f32 %v2498_v35, 0.0  ;;  %v3087_v52 = vadd.f32 %v3936_v7, %v4899_v40  ;;  %v3078_v53 = vpop.f32.mrb[221].mxu0 }
 0x313   : > { %v3079_v62 = vadd.f32 %v4899_v40, %v3078_v53  ;;  %v3937_v28 = vpop.f32.mrb[222].mxu0 }
 0x314   : > { %v2839_v11 = vpack.c.bf16 %v2754_v8, %v2753_v49  ;;  %3507 = vst.msk [vmem:[%s4905_s8 + $0xf0] sm:$0xff] %vm732_vm1, %v3087_v52  ;;  %v3090_v19 = vadd.f32 %v3937_v28, %v4899_v40  ;;  %v3081_v42 = vpop.f32.mrb[223].mxu0 }
 0x315   : > { %3505 = vst.msk [vmem:[%s4905_s8 + $0xe0] sm:$0xff] %vm732_vm1, %v3079_v62  ;;  %v3082_v55 = vadd.f32 %v4899_v40, %v3081_v42  ;;  %v2502_v22 = vpop.f32.mrb[236].mxu1 }
 0x316   : > { %3508 = vst.msk [vmem:[%s4905_s8 + $0xf8] sm:$0xff] %vm732_vm1, %v3090_v19  ;;  %v2503_v31 = vadd.f32 %v4860_v44, %v2502_v22  ;;  %v2504_v1 = vpop.f32.mrb[237].mxu1  ;;  %3990 = vmatprep.mubr.bf16.mxu0 %v2839_v11 }
 0x317   : > { %3506 = vst.msk [vmem:[%s4905_s8 + $0xe8] sm:$0xff] %vm732_vm1, %v3082_v55  ;;  %v2505_v5 = vpop.f32.mrb[238].mxu1 }
 0x318   : > { %v2506_v6 = vadd.f32 %v4860_v44, %v2505_v5  ;;  %v2507_v12 = vpop.f32.mrb[239].mxu1  ;;  %v2755_v20 = vmax.f32 %v2503_v31, 0.0 }
 0x31a   : > { %v2756_v13 = vmax.f32 %v2506_v6, 0.0 }
 0x31c   : > { %v2840_v25 = vpack.c.bf16 %v2756_v13, %v2755_v20 }
 0x31d   : > { %v2510_v15 = vpop.f32.mrb[240].mxu1 }
 0x31e   : > { %v2511_v0 = vadd.f32 %v4860_v44, %v2510_v15  ;;  %v2512_v16 = vpop.f32.mrb[241].mxu1  ;;  %3991 = vmatmul.mubr.bf16.gmra.mrb[20].mxu0 %v2840_v25 }
 0x31f   : > { %v2513_v14 = vpop.f32.mrb[242].mxu1 }
 0x320   : > { %v2514_v9 = vadd.f32 %v4860_v44, %v2513_v14  ;;  %v2515_v17 = vpop.f32.mrb[243].mxu1  ;;  %v2757_v61 = vmax.f32 %v2511_v0, 0.0 }
 0x321   : > { %v3940_v21 = vpop.f32.mrb[224].mxu0 }
 0x322   : > { %v2758_v18 = vmax.f32 %v2514_v9, 0.0  ;;  %v3103_v2 = vadd.f32 %v3940_v21, %v4899_v40  ;;  %v3094_v3 = vpop.f32.mrb[225].mxu0 }
 0x323   : > { %v3095_v23 = vadd.f32 %v4899_v40, %v3094_v3  ;;  %v3941_v63 = vpop.f32.mrb[226].mxu0 }
 0x324   : > { %v2841_v58 = vpack.c.bf16 %v2758_v18, %v2757_v61  ;;  %3511 = vst.msk [vmem:[%s4905_s8 + $0x110] sm:$0xff] %vm732_vm1, %v3103_v2  ;;  %v3106_v56 = vadd.f32 %v3941_v63, %v4899_v40  ;;  %v3097_v36 = vpop.f32.mrb[227].mxu0 }
 0x325   : > { %3509 = vst.msk [vmem:[%s4905_s8 + $0x100] sm:$0xff] %vm732_vm1, %v3095_v23  ;;  %v3098_v24 = vadd.f32 %v4899_v40, %v3097_v36  ;;  %v2518_v27 = vpop.f32.mrb[244].mxu1 }
 0x326   : > { %3512 = vst.msk [vmem:[%s4905_s8 + $0x118] sm:$0xff] %vm732_vm1, %v3106_v56  ;;  %v2519_v29 = vadd.f32 %v4860_v44, %v2518_v27  ;;  %v2520_v59 = vpop.f32.mrb[245].mxu1  ;;  %3994 = vmatprep.mubr.bf16.mxu0 %v2841_v58 }
 0x327   : > { %3510 = vst.msk [vmem:[%s4905_s8 + $0x108] sm:$0xff] %vm732_vm1, %v3098_v24  ;;  %v2521_v33 = vpop.f32.mrb[246].mxu1 }
 0x328   : > { %v2522_v48 = vadd.f32 %v4860_v44, %v2521_v33  ;;  %v2523_v41 = vpop.f32.mrb[247].mxu1  ;;  %v2759_v57 = vmax.f32 %v2519_v29, 0.0 }
 0x32a   : > { %v2760_v30 = vmax.f32 %v2522_v48, 0.0 }
 0x32c   : > { %v2842_v32 = vpack.c.bf16 %v2760_v30, %v2759_v57 }
 0x32d   : > { %v2526_v10 = vpop.f32.mrb[248].mxu1 }
 0x32e   : > { %v2527_v34 = vadd.f32 %v4860_v44, %v2526_v10  ;;  %v2528_v37 = vpop.f32.mrb[249].mxu1  ;;  %3995 = vmatmul.mubr.bf16.gmra.mrb[24].mxu0 %v2842_v32 }
 0x32f   : > { %v2529_v51 = vpop.f32.mrb[250].mxu1 }
 0x330   : > { %v2530_v50 = vadd.f32 %v4860_v44, %v2529_v51  ;;  %v2531_v38 = vpop.f32.mrb[251].mxu1  ;;  %v2761_v54 = vmax.f32 %v2527_v34, 0.0 }
 0x331   : > { %v3944_v39 = vpop.f32.mrb[228].mxu0 }
 0x332   : > { %v2762_v4 = vmax.f32 %v2530_v50, 0.0  ;;  %v3119_v46 = vadd.f32 %v3944_v39, %v4899_v40  ;;  %v3110_v47 = vpop.f32.mrb[229].mxu0 }
 0x333   : > { %v3111_v26 = vadd.f32 %v4899_v40, %v3110_v47  ;;  %v3945_v43 = vpop.f32.mrb[230].mxu0 }
 0x334   : > { %v2843_v45 = vpack.c.bf16 %v2762_v4, %v2761_v54  ;;  %3515 = vst.msk [vmem:[%s4905_s8 + $0x130] sm:$0xff] %vm732_vm1, %v3119_v46  ;;  %v3122_v35 = vadd.f32 %v3945_v43, %v4899_v40  ;;  %v3113_v60 = vpop.f32.mrb[231].mxu0 }
 0x335   : > { %3513 = vst.msk [vmem:[%s4905_s8 + $0x120] sm:$0xff] %vm732_vm1, %v3111_v26  ;;  %v3114_v7 = vadd.f32 %v4899_v40, %v3113_v60  ;;  %v2534_v49 = vpop.f32.mrb[252].mxu1 }
 0x336   : > { %3516 = vst.msk [vmem:[%s4905_s8 + $0x138] sm:$0xff] %vm732_vm1, %v3122_v35  ;;  %v2535_v8 = vadd.f32 %v4860_v44, %v2534_v49  ;;  %v2536_v52 = vpop.f32.mrb[253].mxu1  ;;  %3998 = vmatprep.mubr.bf16.mxu0 %v2843_v45 }
 0x337   : > { %3514 = vst.msk [vmem:[%s4905_s8 + $0x128] sm:$0xff] %vm732_vm1, %v3114_v7  ;;  %v2537_v53 = vpop.f32.mrb[254].mxu1 }
 0x338   : > { %v2538_v62 = vadd.f32 %v4860_v44, %v2537_v53  ;;  %v2539_v28 = vpop.f32.mrb[255].mxu1  ;;  %v2763_v11 = vmax.f32 %v2535_v8, 0.0 }
 0x33a   : > { %v2764_v19 = vmax.f32 %v2538_v62, 0.0 }
 0x33c   : > { %v2844_v42 = vpack.c.bf16 %v2764_v19, %v2763_v11 }
 0x33d   : > { %v2542_v55 = vpop.f32.mrb[0].mxu1 }
 0x33e   : > { %v2543_v22 = vadd.f32 %v4860_v44, %v2542_v55  ;;  %v2544_v31 = vpop.f32.mrb[1].mxu1  ;;  %3999 = vmatmul.mubr.bf16.gmra.mrb[28].mxu0 %v2844_v42 }
 0x33f   : > { %v2545_v1 = vpop.f32.mrb[2].mxu1 }
 0x340   : > { %v2546_v5 = vadd.f32 %v4860_v44, %v2545_v1  ;;  %v2547_v6 = vpop.f32.mrb[3].mxu1  ;;  %v2765_v20 = vmax.f32 %v2543_v22, 0.0 }
 0x341   : > { %v3948_v12 = vpop.f32.mrb[232].mxu0 }
 0x342   : > { %v2766_v13 = vmax.f32 %v2546_v5, 0.0  ;;  %v3135_v25 = vadd.f32 %v3948_v12, %v4899_v40  ;;  %v3126_v15 = vpop.f32.mrb[233].mxu0 }
 0x343   : > { %v3127_v0 = vadd.f32 %v4899_v40, %v3126_v15  ;;  %v3949_v16 = vpop.f32.mrb[234].mxu0 }
 0x344   : > { %v2845_v14 = vpack.c.bf16 %v2766_v13, %v2765_v20  ;;  %3519 = vst.msk [vmem:[%s4905_s8 + $0x150] sm:$0xff] %vm732_vm1, %v3135_v25  ;;  %v3138_v9 = vadd.f32 %v3949_v16, %v4899_v40  ;;  %v3129_v17 = vpop.f32.mrb[235].mxu0  ;;  %v5129_v20 = vld [vmem:[%s5395_s4] ss:$0 sm:$0xff] }
 0x345   : > { %3517 = vst.msk [vmem:[%s4905_s8 + $0x140] sm:$0xff] %vm732_vm1, %v3127_v0  ;;  %v3130_v21 = vadd.f32 %v4899_v40, %v3129_v17  ;;  %v2550_v61 = vpop.f32.mrb[4].mxu1 }
 0x346   : > { %3520 = vst.msk [vmem:[%s4905_s8 + $0x158] sm:$0xff] %vm732_vm1, %v3138_v9  ;;  %v2551_v18 = vadd.f32 %v4860_v44, %v2550_v61  ;;  %v2552_v2 = vpop.f32.mrb[5].mxu1  ;;  %4002 = vmatprep.mubr.bf16.mxu0 %v2845_v14 }
 0x347   : > { %3518 = vst.msk [vmem:[%s4905_s8 + $0x148] sm:$0xff] %vm732_vm1, %v3130_v21  ;;  %v2553_v3 = vpop.f32.mrb[6].mxu1 }
 0x348   : > { %v2554_v23 = vadd.f32 %v4860_v44, %v2553_v3  ;;  %v2555_v63 = vpop.f32.mrb[7].mxu1  ;;  %v2767_v58 = vmax.f32 %v2551_v18, 0.0 }
 0x34a   : > { %v2768_v56 = vmax.f32 %v2554_v23, 0.0 }
 0x34c   : > { %v2846_v36 = vpack.c.bf16 %v2768_v56, %v2767_v58 }
 0x34d   : > { %v2558_v24 = vpop.f32.mrb[8].mxu1 }
 0x34e   : > { %v2559_v27 = vadd.f32 %v4860_v44, %v2558_v24  ;;  %v2560_v29 = vpop.f32.mrb[9].mxu1  ;;  %4003 = vmatmul.mubr.bf16.gmra.mrb[32].mxu0 %v2846_v36 }
 0x34f   : > { %v2561_v59 = vpop.f32.mrb[10].mxu1 }
 0x350   : > { %v2562_v33 = vadd.f32 %v4860_v44, %v2561_v59  ;;  %v2563_v48 = vpop.f32.mrb[11].mxu1  ;;  %v2769_v57 = vmax.f32 %v2559_v27, 0.0 }
 0x351   : > { %v3952_v41 = vpop.f32.mrb[236].mxu0 }
 0x352   : > { %v2770_v30 = vmax.f32 %v2562_v33, 0.0  ;;  %v3151_v32 = vadd.f32 %v3952_v41, %v4899_v40  ;;  %v3142_v10 = vpop.f32.mrb[237].mxu0 }
 0x353   : > { %v3143_v34 = vadd.f32 %v4899_v40, %v3142_v10  ;;  %v3953_v37 = vpop.f32.mrb[238].mxu0 }
 0x354   : > { %v2847_v51 = vpack.c.bf16 %v2770_v30, %v2769_v57  ;;  %3523 = vst.msk [vmem:[%s4905_s8 + $0x170] sm:$0xff] %vm732_vm1, %v3151_v32  ;;  %v3154_v50 = vadd.f32 %v3953_v37, %v4899_v40  ;;  %v3145_v38 = vpop.f32.mrb[239].mxu0 }
 0x355   : > { %3521 = vst.msk [vmem:[%s4905_s8 + $0x160] sm:$0xff] %vm732_vm1, %v3143_v34  ;;  %v3146_v39 = vadd.f32 %v4899_v40, %v3145_v38  ;;  %v2566_v54 = vpop.f32.mrb[12].mxu1 }
 0x356   : > { %3524 = vst.msk [vmem:[%s4905_s8 + $0x178] sm:$0xff] %vm732_vm1, %v3154_v50  ;;  %v2567_v4 = vadd.f32 %v4860_v44, %v2566_v54  ;;  %v2568_v46 = vpop.f32.mrb[13].mxu1  ;;  %4006 = vmatprep.mubr.bf16.mxu0 %v2847_v51 }
 0x357   : > { %3522 = vst.msk [vmem:[%s4905_s8 + $0x168] sm:$0xff] %vm732_vm1, %v3146_v39  ;;  %v2569_v47 = vpop.f32.mrb[14].mxu1 }
 0x358   : > { %v2570_v26 = vadd.f32 %v4860_v44, %v2569_v47  ;;  %v2571_v43 = vpop.f32.mrb[15].mxu1  ;;  %v2771_v45 = vmax.f32 %v2567_v4, 0.0 }
 0x35a   : > { %v2772_v35 = vmax.f32 %v2570_v26, 0.0 }
 0x35c   : > { %v2848_v60 = vpack.c.bf16 %v2772_v35, %v2771_v45 }
 0x35d   : > { %v2574_v7 = vpop.f32.mrb[16].mxu1 }
 0x35e   : > { %v2575_v49 = vadd.f32 %v4860_v44, %v2574_v7  ;;  %v2576_v8 = vpop.f32.mrb[17].mxu1  ;;  %4007 = vmatmul.mubr.bf16.gmra.mrb[36].mxu0 %v2848_v60 }
 0x35f   : > { %v2577_v52 = vpop.f32.mrb[18].mxu1 }
 0x360   : > { %v2578_v53 = vadd.f32 %v4860_v44, %v2577_v52  ;;  %v2579_v62 = vpop.f32.mrb[19].mxu1  ;;  %v2773_v11 = vmax.f32 %v2575_v49, 0.0 }
 0x361   : > { %v3956_v28 = vpop.f32.mrb[240].mxu0 }
 0x362   : > { %v2774_v19 = vmax.f32 %v2578_v53, 0.0  ;;  %v3167_v42 = vadd.f32 %v3956_v28, %v4899_v40  ;;  %v3158_v55 = vpop.f32.mrb[241].mxu0 }
 0x363   : > { %v3159_v22 = vadd.f32 %v4899_v40, %v3158_v55  ;;  %v3957_v31 = vpop.f32.mrb[242].mxu0 }
 0x364   : > { %v2849_v1 = vpack.c.bf16 %v2774_v19, %v2773_v11  ;;  %3527 = vst.msk [vmem:[%s4905_s8 + $0x190] sm:$0xff] %vm732_vm1, %v3167_v42  ;;  %v3170_v5 = vadd.f32 %v3957_v31, %v4899_v40  ;;  %v3161_v6 = vpop.f32.mrb[243].mxu0 }
 0x365   : > { %3525 = vst.msk [vmem:[%s4905_s8 + $0x180] sm:$0xff] %vm732_vm1, %v3159_v22  ;;  %v3162_v44 = vadd.f32 %v4899_v40, %v3161_v6  ;;  %v2582_v12 = vpop.f32.mrb[20].mxu1 }
 0x366   : > { %3528 = vst.msk [vmem:[%s4905_s8 + $0x198] sm:$0xff] %vm732_vm1, %v3170_v5  ;;  %v2583_v13 = vadd.f32 %v5129_v20, %v2582_v12  ;;  %v2584_v25 = vpop.f32.mrb[21].mxu1  ;;  %4010 = vmatprep.mubr.bf16.mxu0 %v2849_v1 }
 0x367   : > { %3526 = vst.msk [vmem:[%s4905_s8 + $0x188] sm:$0xff] %vm732_vm1, %v3162_v44  ;;  %v2585_v15 = vpop.f32.mrb[22].mxu1 }
 0x368   : > { %v2586_v0 = vadd.f32 %v5129_v20, %v2585_v15  ;;  %v2587_v16 = vpop.f32.mrb[23].mxu1  ;;  %v2775_v14 = vmax.f32 %v2583_v13, 0.0 }
 0x36a   : > { %v2776_v9 = vmax.f32 %v2586_v0, 0.0 }
 0x36c   : > { %v2850_v17 = vpack.c.bf16 %v2776_v9, %v2775_v14 }
 0x36d   : > { %v2590_v21 = vpop.f32.mrb[24].mxu1 }
 0x36e   : > { %v2591_v61 = vadd.f32 %v5129_v20, %v2590_v21  ;;  %v2592_v18 = vpop.f32.mrb[25].mxu1  ;;  %4011 = vmatmul.mubr.bf16.gmra.mrb[40].mxu0 %v2850_v17 }
 0x36f   : > { %v2593_v2 = vpop.f32.mrb[26].mxu1 }
 0x370   : > { %v2594_v3 = vadd.f32 %v5129_v20, %v2593_v2  ;;  %v2595_v23 = vpop.f32.mrb[27].mxu1  ;;  %v2777_v58 = vmax.f32 %v2591_v61, 0.0 }
 0x371   : > { %v3960_v63 = vpop.f32.mrb[244].mxu0 }
 0x372   : > { %v2778_v56 = vmax.f32 %v2594_v3, 0.0  ;;  %v3183_v36 = vadd.f32 %v3960_v63, %v4899_v40  ;;  %v3174_v24 = vpop.f32.mrb[245].mxu0  ;;  %v5179_v63 = vld [vmem:[%s5397_s6] ss:$0 sm:$0xff] }
 0x373   : > { %v3175_v27 = vadd.f32 %v4899_v40, %v3174_v24  ;;  %v3961_v29 = vpop.f32.mrb[246].mxu0 }
 0x374   : > { %v2851_v59 = vpack.c.bf16 %v2778_v56, %v2777_v58  ;;  %3531 = vst.msk [vmem:[%s4905_s8 + $0x1b0] sm:$0xff] %vm732_vm1, %v3183_v36  ;;  %v3186_v33 = vadd.f32 %v3961_v29, %v4899_v40  ;;  %v3177_v48 = vpop.f32.mrb[247].mxu0 }
 0x375   : > { %3529 = vst.msk [vmem:[%s4905_s8 + $0x1a0] sm:$0xff] %vm732_vm1, %v3175_v27  ;;  %v3178_v41 = vadd.f32 %v4899_v40, %v3177_v48  ;;  %v2598_v57 = vpop.f32.mrb[28].mxu1 }
 0x376   : > { %3532 = vst.msk [vmem:[%s4905_s8 + $0x1b8] sm:$0xff] %vm732_vm1, %v3186_v33  ;;  %v2599_v30 = vadd.f32 %v5129_v20, %v2598_v57  ;;  %v2600_v32 = vpop.f32.mrb[29].mxu1  ;;  %4014 = vmatprep.mubr.bf16.mxu0 %v2851_v59 }
 0x377   : > { %3530 = vst.msk [vmem:[%s4905_s8 + $0x1a8] sm:$0xff] %vm732_vm1, %v3178_v41  ;;  %v2601_v10 = vpop.f32.mrb[30].mxu1 }
 0x378   : > { %v2602_v34 = vadd.f32 %v5129_v20, %v2601_v10  ;;  %v2603_v37 = vpop.f32.mrb[31].mxu1  ;;  %v2779_v51 = vmax.f32 %v2599_v30, 0.0 }
 0x37a   : > { %v2780_v50 = vmax.f32 %v2602_v34, 0.0 }
 0x37c   : > { %v2852_v38 = vpack.c.bf16 %v2780_v50, %v2779_v51 }
 0x37d   : > { %v2606_v39 = vpop.f32.mrb[32].mxu1 }
 0x37e   : > { %v2607_v54 = vadd.f32 %v5129_v20, %v2606_v39  ;;  %v2608_v4 = vpop.f32.mrb[33].mxu1  ;;  %4015 = vmatmul.mubr.bf16.gmra.mrb[44].mxu0 %v2852_v38 }
 0x37f   : > { %v2609_v46 = vpop.f32.mrb[34].mxu1 }
 0x380   : > { %v2610_v47 = vadd.f32 %v5129_v20, %v2609_v46  ;;  %v2611_v26 = vpop.f32.mrb[35].mxu1  ;;  %v2781_v45 = vmax.f32 %v2607_v54, 0.0 }
 0x381   : > { %v3964_v43 = vpop.f32.mrb[248].mxu0 }
 0x382   : > { %v2782_v35 = vmax.f32 %v2610_v47, 0.0  ;;  %v3199_v60 = vadd.f32 %v3964_v43, %v4899_v40  ;;  %v3190_v7 = vpop.f32.mrb[249].mxu0 }
 0x383   : > { %v3191_v49 = vadd.f32 %v4899_v40, %v3190_v7  ;;  %v3965_v8 = vpop.f32.mrb[250].mxu0 }
 0x384   : > { %v2853_v52 = vpack.c.bf16 %v2782_v35, %v2781_v45  ;;  %3535 = vst.msk [vmem:[%s4905_s8 + $0x1d0] sm:$0xff] %vm732_vm1, %v3199_v60  ;;  %v3202_v53 = vadd.f32 %v3965_v8, %v4899_v40  ;;  %v3193_v62 = vpop.f32.mrb[251].mxu0 }
 0x385   : > { %3533 = vst.msk [vmem:[%s4905_s8 + $0x1c0] sm:$0xff] %vm732_vm1, %v3191_v49  ;;  %v3194_v28 = vadd.f32 %v4899_v40, %v3193_v62  ;;  %v2614_v11 = vpop.f32.mrb[36].mxu1 }
 0x386   : > { %3536 = vst.msk [vmem:[%s4905_s8 + $0x1d8] sm:$0xff] %vm732_vm1, %v3202_v53  ;;  %v2615_v19 = vadd.f32 %v5129_v20, %v2614_v11  ;;  %v2616_v42 = vpop.f32.mrb[37].mxu1  ;;  %4018 = vmatprep.mubr.bf16.mxu0 %v2853_v52 }
 0x387   : > { %3534 = vst.msk [vmem:[%s4905_s8 + $0x1c8] sm:$0xff] %vm732_vm1, %v3194_v28  ;;  %v2617_v55 = vpop.f32.mrb[38].mxu1 }
 0x388   : > { %v2618_v22 = vadd.f32 %v5129_v20, %v2617_v55  ;;  %v2619_v31 = vpop.f32.mrb[39].mxu1  ;;  %v2783_v1 = vmax.f32 %v2615_v19, 0.0 }
 0x38a   : > { %v2784_v5 = vmax.f32 %v2618_v22, 0.0 }
 0x38c   : > { %v2854_v6 = vpack.c.bf16 %v2784_v5, %v2783_v1 }
 0x38d   : > { %v2622_v44 = vpop.f32.mrb[40].mxu1 }
 0x38e   : > { %v2623_v12 = vadd.f32 %v5129_v20, %v2622_v44  ;;  %v2624_v13 = vpop.f32.mrb[41].mxu1  ;;  %4019 = vmatmul.mubr.bf16.gmra.mrb[48].mxu0 %v2854_v6 }
 0x38f   : > { %v2625_v25 = vpop.f32.mrb[42].mxu1 }
 0x390   : > { %v2626_v15 = vadd.f32 %v5129_v20, %v2625_v25  ;;  %v2627_v0 = vpop.f32.mrb[43].mxu1  ;;  %v2785_v14 = vmax.f32 %v2623_v12, 0.0 }
 0x391   : > { %v3968_v16 = vpop.f32.mrb[252].mxu0 }
 0x392   : > { %v2786_v9 = vmax.f32 %v2626_v15, 0.0  ;;  %v3215_v17 = vadd.f32 %v3968_v16, %v4899_v40  ;;  %v3206_v21 = vpop.f32.mrb[253].mxu0 }
 0x393   : > { %v3207_v61 = vadd.f32 %v4899_v40, %v3206_v21  ;;  %v3969_v18 = vpop.f32.mrb[254].mxu0 }
 0x394   : > { %v2855_v2 = vpack.c.bf16 %v2786_v9, %v2785_v14  ;;  %3539 = vst.msk [vmem:[%s4905_s8 + $0x1f0] sm:$0xff] %vm732_vm1, %v3215_v17  ;;  %v3218_v3 = vadd.f32 %v3969_v18, %v4899_v40  ;;  %v3209_v23 = vpop.f32.mrb[255].mxu0 }
 0x395   : > { %3537 = vst.msk [vmem:[%s4905_s8 + $0x1e0] sm:$0xff] %vm732_vm1, %v3207_v61  ;;  %v3210_v58 = vadd.f32 %v5179_v63, %v3209_v23  ;;  %v2630_v56 = vpop.f32.mrb[44].mxu1 }
 0x396   : > { %3540 = vst.msk [vmem:[%s4905_s8 + $0x1f8] sm:$0xff] %vm732_vm1, %v3218_v3  ;;  %v2631_v36 = vadd.f32 %v5129_v20, %v2630_v56  ;;  %v2632_v24 = vpop.f32.mrb[45].mxu1  ;;  %4022 = vmatprep.mubr.bf16.mxu0 %v2855_v2 }
 0x397   : > { %3538 = vst.msk [vmem:[%s4905_s8 + $0x1e8] sm:$0xff] %vm732_vm1, %v3210_v58  ;;  %v2633_v40 = vpop.f32.mrb[46].mxu1 }
 0x398   : > { %v2634_v27 = vadd.f32 %v5129_v20, %v2633_v40  ;;  %v2635_v29 = vpop.f32.mrb[47].mxu1  ;;  %v2787_v59 = vmax.f32 %v2631_v36, 0.0 }
 0x39a   : > { %v2788_v33 = vmax.f32 %v2634_v27, 0.0 }
 0x39c   : > { %v2856_v48 = vpack.c.bf16 %v2788_v33, %v2787_v59 }
 0x39d   : > { %v2638_v41 = vpop.f32.mrb[48].mxu1 }
 0x39e   : > { %v2639_v57 = vadd.f32 %v5129_v20, %v2638_v41  ;;  %v2640_v30 = vpop.f32.mrb[49].mxu1  ;;  %4023 = vmatmul.mubr.bf16.gmra.mrb[52].mxu0 %v2856_v48 }
 0x39f   : > { %v2641_v32 = vpop.f32.mrb[50].mxu1 }
 0x3a0   : > { %v2642_v10 = vadd.f32 %v5129_v20, %v2641_v32  ;;  %v2643_v34 = vpop.f32.mrb[51].mxu1  ;;  %v2789_v51 = vmax.f32 %v2639_v57, 0.0 }
 0x3a1   : > { %v3972_v37 = vpop.f32.mrb[0].mxu0 }
 0x3a2   : > { %v2790_v50 = vmax.f32 %v2642_v10, 0.0  ;;  %v3231_v38 = vadd.f32 %v5179_v63, %v3972_v37  ;;  %v3222_v39 = vpop.f32.mrb[1].mxu0 }
 0x3a3   : > { %v3223_v54 = vadd.f32 %v5179_v63, %v3222_v39  ;;  %v3973_v4 = vpop.f32.mrb[2].mxu0 }
 0x3a4   : > { %v2857_v46 = vpack.c.bf16 %v2790_v50, %v2789_v51  ;;  %3543 = vst.msk [vmem:[%s4905_s8 + $0x210] sm:$0xff] %vm732_vm1, %v3231_v38  ;;  %v3234_v47 = vadd.f32 %v5179_v63, %v3973_v4  ;;  %v3225_v26 = vpop.f32.mrb[3].mxu0 }
 0x3a5   : > { %3541 = vst.msk [vmem:[%s4905_s8 + $0x200] sm:$0xff] %vm732_vm1, %v3223_v54  ;;  %v3226_v43 = vadd.f32 %v5179_v63, %v3225_v26  ;;  %v2646_v45 = vpop.f32.mrb[52].mxu1 }
 0x3a6   : > { %3544 = vst.msk [vmem:[%s4905_s8 + $0x218] sm:$0xff] %vm732_vm1, %v3234_v47  ;;  %v2647_v35 = vadd.f32 %v5129_v20, %v2646_v45  ;;  %v2648_v60 = vpop.f32.mrb[53].mxu1  ;;  %4026 = vmatprep.mubr.bf16.mxu0 %v2857_v46 }
 0x3a7   : > { %3542 = vst.msk [vmem:[%s4905_s8 + $0x208] sm:$0xff] %vm732_vm1, %v3226_v43  ;;  %v2649_v7 = vpop.f32.mrb[54].mxu1 }
 0x3a8   : > { %v2650_v49 = vadd.f32 %v5129_v20, %v2649_v7  ;;  %v2651_v8 = vpop.f32.mrb[55].mxu1  ;;  %v2791_v52 = vmax.f32 %v2647_v35, 0.0 }
 0x3aa   : > { %v2792_v53 = vmax.f32 %v2650_v49, 0.0 }
 0x3ac   : > { %v2858_v62 = vpack.c.bf16 %v2792_v53, %v2791_v52 }
 0x3ad   : > { %v2654_v28 = vpop.f32.mrb[56].mxu1 }
 0x3ae   : > { %v2655_v11 = vadd.f32 %v5129_v20, %v2654_v28  ;;  %v2656_v19 = vpop.f32.mrb[57].mxu1  ;;  %4027 = vmatmul.mubr.bf16.gmra.mrb[56].mxu0 %v2858_v62 }
 0x3af   : > { %v2657_v42 = vpop.f32.mrb[58].mxu1 }
 0x3b0   : > { %v2658_v55 = vadd.f32 %v5129_v20, %v2657_v42  ;;  %v2659_v22 = vpop.f32.mrb[59].mxu1  ;;  %v2793_v1 = vmax.f32 %v2655_v11, 0.0 }
 0x3b1   : > { %v3976_v31 = vpop.f32.mrb[4].mxu0 }
 0x3b2   : > { %v2794_v5 = vmax.f32 %v2658_v55, 0.0  ;;  %v3247_v6 = vadd.f32 %v5179_v63, %v3976_v31  ;;  %v3238_v44 = vpop.f32.mrb[5].mxu0 }
 0x3b3   : > { %v3239_v12 = vadd.f32 %v5179_v63, %v3238_v44  ;;  %v3977_v13 = vpop.f32.mrb[6].mxu0 }
 0x3b4   : > { %v2859_v25 = vpack.c.bf16 %v2794_v5, %v2793_v1  ;;  %3547 = vst.msk [vmem:[%s4905_s8 + $0x230] sm:$0xff] %vm732_vm1, %v3247_v6  ;;  %v3250_v15 = vadd.f32 %v5179_v63, %v3977_v13  ;;  %v3241_v0 = vpop.f32.mrb[7].mxu0 }
 0x3b5   : > { %3545 = vst.msk [vmem:[%s4905_s8 + $0x220] sm:$0xff] %vm732_vm1, %v3239_v12  ;;  %v3242_v16 = vadd.f32 %v5179_v63, %v3241_v0  ;;  %v2662_v14 = vpop.f32.mrb[60].mxu1 }
 0x3b6   : > { %3548 = vst.msk [vmem:[%s4905_s8 + $0x238] sm:$0xff] %vm732_vm1, %v3250_v15  ;;  %v2663_v9 = vadd.f32 %v5129_v20, %v2662_v14  ;;  %v2664_v17 = vpop.f32.mrb[61].mxu1  ;;  %4030 = vmatprep.mubr.bf16.mxu0 %v2859_v25 }
 0x3b7   : > { %3546 = vst.msk [vmem:[%s4905_s8 + $0x228] sm:$0xff] %vm732_vm1, %v3242_v16  ;;  %v2665_v21 = vpop.f32.mrb[62].mxu1 }
 0x3b8   : > { %v2666_v61 = vadd.f32 %v5129_v20, %v2665_v21  ;;  %v2667_v18 = vpop.f32.mrb[63].mxu1  ;;  %v2795_v2 = vmax.f32 %v2663_v9, 0.0 }
 0x3ba   : > { %v2796_v3 = vmax.f32 %v2666_v61, 0.0 }
 0x3bc   : > { %v2860_v23 = vpack.c.bf16 %v2796_v3, %v2795_v2 }
 0x3be   : > { %4031 = vmatmul.mubr.bf16.gmra.mrb[60].mxu0 %v2860_v23 }
 0x3c1   : > { %v3980_v58 = vpop.f32.mrb[8].mxu0 }
 0x3c2   : > { %v3263_v56 = vadd.f32 %v5179_v63, %v3980_v58  ;;  %v3254_v36 = vpop.f32.mrb[9].mxu0 }
 0x3c3   : > { %v3255_v24 = vadd.f32 %v5179_v63, %v3254_v36  ;;  %v3981_v40 = vpop.f32.mrb[10].mxu0 }
 0x3c4   : > { %3551 = vst.msk [vmem:[%s4905_s8 + $0x250] sm:$0xff] %vm732_vm1, %v3263_v56  ;;  %v3266_v20 = vadd.f32 %v5179_v63, %v3981_v40  ;;  %v3257_v27 = vpop.f32.mrb[11].mxu0 }
 0x3c5   : > { %3549 = vst.msk [vmem:[%s4905_s8 + $0x240] sm:$0xff] %vm732_vm1, %v3255_v24  ;;  %v3258_v29 = vadd.f32 %v5179_v63, %v3257_v27 }
 0x3c6   : > { %3552 = vst.msk [vmem:[%s4905_s8 + $0x258] sm:$0xff] %vm732_vm1, %v3266_v20 }
 0x3c7   : > { %3550 = vst.msk [vmem:[%s4905_s8 + $0x248] sm:$0xff] %vm732_vm1, %v3258_v29 }
 0x3d1   : > { %v3984_v59 = vpop.f32.mrb[12].mxu0 }
 0x3d2   : > { %v3279_v33 = vadd.f32 %v5179_v63, %v3984_v59  ;;  %v3270_v48 = vpop.f32.mrb[13].mxu0 }
 0x3d3   : > { %v3271_v41 = vadd.f32 %v5179_v63, %v3270_v48  ;;  %v3985_v57 = vpop.f32.mrb[14].mxu0 }
 0x3d4   : > { %3555 = vst.msk [vmem:[%s4905_s8 + $0x270] sm:$0xff] %vm732_vm1, %v3279_v33  ;;  %v3282_v30 = vadd.f32 %v5179_v63, %v3985_v57  ;;  %v3273_v32 = vpop.f32.mrb[15].mxu0 }
 0x3d5   : > { %3553 = vst.msk [vmem:[%s4905_s8 + $0x260] sm:$0xff] %vm732_vm1, %v3271_v41  ;;  %v3274_v10 = vadd.f32 %v5179_v63, %v3273_v32 }
 0x3d6   : > { %3556 = vst.msk [vmem:[%s4905_s8 + $0x278] sm:$0xff] %vm732_vm1, %v3282_v30 }
 0x3d7   : > { %3554 = vst.msk [vmem:[%s4905_s8 + $0x268] sm:$0xff] %vm732_vm1, %v3274_v10 }
 0x3e1   : > { %v3988_v34 = vpop.f32.mrb[16].mxu0 }
 0x3e2   : > { %v3295_v37 = vadd.f32 %v5179_v63, %v3988_v34  ;;  %v3286_v51 = vpop.f32.mrb[17].mxu0 }
 0x3e3   : > { %v3287_v50 = vadd.f32 %v5179_v63, %v3286_v51  ;;  %v3989_v38 = vpop.f32.mrb[18].mxu0 }
 0x3e4   : > { %3559 = vst.msk [vmem:[%s4905_s8 + $0x290] sm:$0xff] %vm732_vm1, %v3295_v37  ;;  %v3298_v39 = vadd.f32 %v5179_v63, %v3989_v38  ;;  %v3289_v54 = vpop.f32.mrb[19].mxu0 }
 0x3e5   : > { %3557 = vst.msk [vmem:[%s4905_s8 + $0x280] sm:$0xff] %vm732_vm1, %v3287_v50  ;;  %v3290_v4 = vadd.f32 %v5179_v63, %v3289_v54 }
 0x3e6   : > { %3560 = vst.msk [vmem:[%s4905_s8 + $0x298] sm:$0xff] %vm732_vm1, %v3298_v39 }
 0x3e7   : > { %3558 = vst.msk [vmem:[%s4905_s8 + $0x288] sm:$0xff] %vm732_vm1, %v3290_v4 }
 0x3f1   : > { %v3992_v46 = vpop.f32.mrb[20].mxu0 }
 0x3f2   : > { %v3311_v47 = vadd.f32 %v5179_v63, %v3992_v46  ;;  %v3302_v26 = vpop.f32.mrb[21].mxu0 }
 0x3f3   : > { %v3303_v43 = vadd.f32 %v5179_v63, %v3302_v26  ;;  %v3993_v45 = vpop.f32.mrb[22].mxu0 }
 0x3f4   : > { %3563 = vst.msk [vmem:[%s4905_s8 + $0x2b0] sm:$0xff] %vm732_vm1, %v3311_v47  ;;  %v3314_v35 = vadd.f32 %v5179_v63, %v3993_v45  ;;  %v3305_v60 = vpop.f32.mrb[23].mxu0 }
 0x3f5   : > { %3561 = vst.msk [vmem:[%s4905_s8 + $0x2a0] sm:$0xff] %vm732_vm1, %v3303_v43  ;;  %v3306_v7 = vadd.f32 %v5179_v63, %v3305_v60 }
 0x3f6   : > { %3564 = vst.msk [vmem:[%s4905_s8 + $0x2b8] sm:$0xff] %vm732_vm1, %v3314_v35 }
 0x3f7   : > { %3562 = vst.msk [vmem:[%s4905_s8 + $0x2a8] sm:$0xff] %vm732_vm1, %v3306_v7 }
 0x401   : > { %v3996_v49 = vpop.f32.mrb[24].mxu0 }
 0x402   : > { %v3327_v8 = vadd.f32 %v5179_v63, %v3996_v49  ;;  %v3318_v52 = vpop.f32.mrb[25].mxu0 }
 0x403   : > { %v3319_v53 = vadd.f32 %v5179_v63, %v3318_v52  ;;  %v3997_v62 = vpop.f32.mrb[26].mxu0 }
 0x404   : > { %3567 = vst.msk [vmem:[%s4905_s8 + $0x2d0] sm:$0xff] %vm732_vm1, %v3327_v8  ;;  %v3330_v28 = vadd.f32 %v5179_v63, %v3997_v62  ;;  %v3321_v11 = vpop.f32.mrb[27].mxu0 }
 0x405   : > { %3565 = vst.msk [vmem:[%s4905_s8 + $0x2c0] sm:$0xff] %vm732_vm1, %v3319_v53  ;;  %v3322_v19 = vadd.f32 %v5179_v63, %v3321_v11 }
 0x406   : > { %3568 = vst.msk [vmem:[%s4905_s8 + $0x2d8] sm:$0xff] %vm732_vm1, %v3330_v28 }
 0x407   : > { %3566 = vst.msk [vmem:[%s4905_s8 + $0x2c8] sm:$0xff] %vm732_vm1, %v3322_v19 }
 0x411   : > { %v4000_v42 = vpop.f32.mrb[28].mxu0 }
 0x412   : > { %v3343_v55 = vadd.f32 %v5179_v63, %v4000_v42  ;;  %v3334_v22 = vpop.f32.mrb[29].mxu0 }
 0x413   : > { %v3335_v31 = vadd.f32 %v5179_v63, %v3334_v22  ;;  %v4001_v1 = vpop.f32.mrb[30].mxu0 }
 0x414   : > { %3571 = vst.msk [vmem:[%s4905_s8 + $0x2f0] sm:$0xff] %vm732_vm1, %v3343_v55  ;;  %v3346_v5 = vadd.f32 %v5179_v63, %v4001_v1  ;;  %v3337_v6 = vpop.f32.mrb[31].mxu0 }
 0x415   : > { %3569 = vst.msk [vmem:[%s4905_s8 + $0x2e0] sm:$0xff] %vm732_vm1, %v3335_v31  ;;  %v3338_v44 = vadd.f32 %v5179_v63, %v3337_v6 }
 0x416   : > { %3572 = vst.msk [vmem:[%s4905_s8 + $0x2f8] sm:$0xff] %vm732_vm1, %v3346_v5 }
 0x417   : > { %3570 = vst.msk [vmem:[%s4905_s8 + $0x2e8] sm:$0xff] %vm732_vm1, %v3338_v44 }
 0x421   : > { %v4004_v12 = vpop.f32.mrb[32].mxu0 }
 0x422   : > { %v3359_v13 = vadd.f32 %v5179_v63, %v4004_v12  ;;  %v3350_v25 = vpop.f32.mrb[33].mxu0 }
 0x423   : > { %v3351_v15 = vadd.f32 %v5179_v63, %v3350_v25  ;;  %v4005_v0 = vpop.f32.mrb[34].mxu0 }
 0x424   : > { %3575 = vst.msk [vmem:[%s4905_s8 + $0x310] sm:$0xff] %vm732_vm1, %v3359_v13  ;;  %v3362_v16 = vadd.f32 %v5179_v63, %v4005_v0  ;;  %v3353_v14 = vpop.f32.mrb[35].mxu0 }
 0x425   : > { %3573 = vst.msk [vmem:[%s4905_s8 + $0x300] sm:$0xff] %vm732_vm1, %v3351_v15  ;;  %v3354_v9 = vadd.f32 %v5179_v63, %v3353_v14 }
 0x426   : > { %3576 = vst.msk [vmem:[%s4905_s8 + $0x318] sm:$0xff] %vm732_vm1, %v3362_v16 }
 0x427   : > { %3574 = vst.msk [vmem:[%s4905_s8 + $0x308] sm:$0xff] %vm732_vm1, %v3354_v9 }
 0x431   : > { %v4008_v17 = vpop.f32.mrb[36].mxu0 }
 0x432   : > { %v3375_v21 = vadd.f32 %v5179_v63, %v4008_v17  ;;  %v3366_v61 = vpop.f32.mrb[37].mxu0 }
 0x433   : > { %v3367_v18 = vadd.f32 %v5179_v63, %v3366_v61  ;;  %v4009_v2 = vpop.f32.mrb[38].mxu0 }
 0x434   : > { %3579 = vst.msk [vmem:[%s4905_s8 + $0x330] sm:$0xff] %vm732_vm1, %v3375_v21  ;;  %v3378_v3 = vadd.f32 %v5179_v63, %v4009_v2  ;;  %v3369_v23 = vpop.f32.mrb[39].mxu0 }
 0x435   : > { %3577 = vst.msk [vmem:[%s4905_s8 + $0x320] sm:$0xff] %vm732_vm1, %v3367_v18  ;;  %v3370_v58 = vadd.f32 %v5179_v63, %v3369_v23 }
 0x436   : > { %3580 = vst.msk [vmem:[%s4905_s8 + $0x338] sm:$0xff] %vm732_vm1, %v3378_v3 }
 0x437   : > { %3578 = vst.msk [vmem:[%s4905_s8 + $0x328] sm:$0xff] %vm732_vm1, %v3370_v58 }
 0x441   : > { %v4012_v56 = vpop.f32.mrb[40].mxu0 }
 0x442   : > { %v3391_v36 = vadd.f32 %v5179_v63, %v4012_v56  ;;  %v3382_v24 = vpop.f32.mrb[41].mxu0 }
 0x443   : > { %v3383_v40 = vadd.f32 %v5179_v63, %v3382_v24  ;;  %v4013_v20 = vpop.f32.mrb[42].mxu0 }
 0x444   : > { %3583 = vst.msk [vmem:[%s4905_s8 + $0x350] sm:$0xff] %vm732_vm1, %v3391_v36  ;;  %v3394_v27 = vadd.f32 %v5179_v63, %v4013_v20  ;;  %v3385_v29 = vpop.f32.mrb[43].mxu0 }
 0x445   : > { %3581 = vst.msk [vmem:[%s4905_s8 + $0x340] sm:$0xff] %vm732_vm1, %v3383_v40  ;;  %v3386_v59 = vadd.f32 %v5179_v63, %v3385_v29 }
 0x446   : > { %3584 = vst.msk [vmem:[%s4905_s8 + $0x358] sm:$0xff] %vm732_vm1, %v3394_v27 }
 0x447   : > { %3582 = vst.msk [vmem:[%s4905_s8 + $0x348] sm:$0xff] %vm732_vm1, %v3386_v59 }
 0x451   : > { %v4016_v33 = vpop.f32.mrb[44].mxu0 }
 0x452   : > { %v3407_v48 = vadd.f32 %v5179_v63, %v4016_v33  ;;  %v3398_v41 = vpop.f32.mrb[45].mxu0 }
 0x453   : > { %v3399_v57 = vadd.f32 %v5179_v63, %v3398_v41  ;;  %v4017_v30 = vpop.f32.mrb[46].mxu0 }
 0x454   : > { %3587 = vst.msk [vmem:[%s4905_s8 + $0x370] sm:$0xff] %vm732_vm1, %v3407_v48  ;;  %v3410_v32 = vadd.f32 %v5179_v63, %v4017_v30  ;;  %v3401_v10 = vpop.f32.mrb[47].mxu0 }
 0x455   : > { %3585 = vst.msk [vmem:[%s4905_s8 + $0x360] sm:$0xff] %vm732_vm1, %v3399_v57  ;;  %v3402_v34 = vadd.f32 %v5179_v63, %v3401_v10 }
 0x456   : > { %3588 = vst.msk [vmem:[%s4905_s8 + $0x378] sm:$0xff] %vm732_vm1, %v3410_v32 }
 0x457   : > { %3586 = vst.msk [vmem:[%s4905_s8 + $0x368] sm:$0xff] %vm732_vm1, %v3402_v34 }
 0x461   : > { %v4020_v37 = vpop.f32.mrb[48].mxu0 }
 0x462   : > { %v3423_v51 = vadd.f32 %v5179_v63, %v4020_v37  ;;  %v3414_v50 = vpop.f32.mrb[49].mxu0 }
 0x463   : > { %v3415_v38 = vadd.f32 %v5179_v63, %v3414_v50  ;;  %v4021_v39 = vpop.f32.mrb[50].mxu0 }
 0x464   : > { %3591 = vst.msk [vmem:[%s4905_s8 + $0x390] sm:$0xff] %vm732_vm1, %v3423_v51  ;;  %v3426_v54 = vadd.f32 %v5179_v63, %v4021_v39  ;;  %v3417_v4 = vpop.f32.mrb[51].mxu0 }
 0x465   : > { %3589 = vst.msk [vmem:[%s4905_s8 + $0x380] sm:$0xff] %vm732_vm1, %v3415_v38  ;;  %v3418_v46 = vadd.f32 %v5179_v63, %v3417_v4 }
 0x466   : > { %3592 = vst.msk [vmem:[%s4905_s8 + $0x398] sm:$0xff] %vm732_vm1, %v3426_v54 }
 0x467   : > { %3590 = vst.msk [vmem:[%s4905_s8 + $0x388] sm:$0xff] %vm732_vm1, %v3418_v46 }
 0x471   : > { %v4024_v47 = vpop.f32.mrb[52].mxu0 }
 0x472   : > { %v3439_v26 = vadd.f32 %v5179_v63, %v4024_v47  ;;  %v3430_v43 = vpop.f32.mrb[53].mxu0 }
 0x473   : > { %v3431_v45 = vadd.f32 %v5179_v63, %v3430_v43  ;;  %v4025_v35 = vpop.f32.mrb[54].mxu0 }
 0x474   : > { %3595 = vst.msk [vmem:[%s4905_s8 + $0x3b0] sm:$0xff] %vm732_vm1, %v3439_v26  ;;  %v3442_v60 = vadd.f32 %v5179_v63, %v4025_v35  ;;  %v3433_v7 = vpop.f32.mrb[55].mxu0 }
 0x475   : > { %3593 = vst.msk [vmem:[%s4905_s8 + $0x3a0] sm:$0xff] %vm732_vm1, %v3431_v45  ;;  %v3434_v49 = vadd.f32 %v5179_v63, %v3433_v7 }
 0x476   : > { %3596 = vst.msk [vmem:[%s4905_s8 + $0x3b8] sm:$0xff] %vm732_vm1, %v3442_v60 }
 0x477   : > { %3594 = vst.msk [vmem:[%s4905_s8 + $0x3a8] sm:$0xff] %vm732_vm1, %v3434_v49 }
 0x481   : > { %v4028_v8 = vpop.f32.mrb[56].mxu0 }
 0x482   : > { %v3455_v52 = vadd.f32 %v5179_v63, %v4028_v8  ;;  %v3446_v53 = vpop.f32.mrb[57].mxu0 }
 0x483   : > { %v3447_v62 = vadd.f32 %v5179_v63, %v3446_v53  ;;  %v4029_v28 = vpop.f32.mrb[58].mxu0 }
 0x484   : > { %3599 = vst.msk [vmem:[%s4905_s8 + $0x3d0] sm:$0xff] %vm732_vm1, %v3455_v52  ;;  %v3458_v11 = vadd.f32 %v5179_v63, %v4029_v28  ;;  %v3449_v19 = vpop.f32.mrb[59].mxu0 }
 0x485   : > { %3597 = vst.msk [vmem:[%s4905_s8 + $0x3c0] sm:$0xff] %vm732_vm1, %v3447_v62  ;;  %v3450_v42 = vadd.f32 %v5179_v63, %v3449_v19 }
 0x486   : > { %3600 = vst.msk [vmem:[%s4905_s8 + $0x3d8] sm:$0xff] %vm732_vm1, %v3458_v11 }
 0x487   : > { %3598 = vst.msk [vmem:[%s4905_s8 + $0x3c8] sm:$0xff] %vm732_vm1, %v3450_v42 }
 0x491   : > { %v4032_v55 = vpop.f32.mrb[60].mxu0 }
 0x492   : > { %v3471_v22 = vadd.f32 %v5179_v63, %v4032_v55  ;;  %v3462_v31 = vpop.f32.mrb[61].mxu0 }
 0x493   : > { %v3463_v1 = vadd.f32 %v5179_v63, %v3462_v31  ;;  %v4033_v5 = vpop.f32.mrb[62].mxu0 }
 0x494   : > { %3603 = vst.msk [vmem:[%s4905_s8 + $0x3f0] sm:$0xff] %vm732_vm1, %v3471_v22  ;;  %v3474_v6 = vadd.f32 %v5179_v63, %v4033_v5  ;;  %v3465_v44 = vpop.f32.mrb[63].mxu0 }
 0x495   : > { %3601 = vst.msk [vmem:[%s4905_s8 + $0x3e0] sm:$0xff] %vm732_vm1, %v3463_v1  ;;  %v3466_v12 = vadd.f32 %v5179_v63, %v3465_v44 }
 0x496   : > { %3604 = vst.msk [vmem:[%s4905_s8 + $0x3f8] sm:$0xff] %vm732_vm1, %v3474_v6 }
 0x497   : > { %3602 = vst.msk [vmem:[%s4905_s8 + $0x3e8] sm:$0xff] %vm732_vm1, %v3466_v12 }
 0x498 PF: > { %s17_s24 = sadd.s32 1, %s4144_s24  }
 0x499   : > { %p14_p4 = scmp.ge.s32.totalorder %s17_s24, 6  }
 0x49b   :  { %16 = sbr.rel (!%p14_p4) target bundleno = 1 (0x1), region = 76 }

</bundles_post_ra>
